<compile_context>
chip_gen: v7x
topology: tpu7x:2x2x1
jax: 0.10.0
libtpu: 0.0.40
codegen_flags: <defaults>
</compile_context>

<pallas_src>
import functools

import jax
import jax.numpy as jnp
import numpy as np
from jax.experimental import pallas as pl
from jax.experimental.pallas import tpu as pltpu

LEAKY_SLOPE = 0.2
BN_EPS = 1e-5
PHASES = ((0, 0), (0, 1), (1, 0), (1, 1))   # stride-2 phase order (row, col)
_RC = 256                                   # in-kernel row chunk (keeps acc in vregs)


def _round_up(x, m):
    return (x + m - 1) // m * m


def _vmem_limit_bytes():
    # Per-generation scoped-VMEM limit: ~60% of per-core VMEM, clamped so the same
    # code holds on v5e/v6e (128 MiB) and v7x (64 MiB per TensorCore).
    try:
        cap = int(pltpu.get_tpu_info().vmem_capacity_bytes)
    except Exception:
        cap = 64 * 1024 * 1024
    return int(min(88 * 2 ** 20, max(32 * 2 ** 20, int(0.6 * cap))))


VMEM_LIMIT = _vmem_limit_bytes()
TILE_BUDGET = VMEM_LIMIT // 2    # budget for one conv call's per-step blocks


def _leaky(z):
    return jnp.maximum(z, LEAKY_SLOPE * z)   # single VPU op (vs cmp+select)


# ------------------------------------------------------------------ Pallas kernel ---
def _conv_tap_kernel(*refs, offs, tm, th, cout, act, prescale, with_stats):
    """One row-tile of a conv expressed as a sum of per-tap matmuls over the flattened
    (padded) NHWC activation.

    Output rows [t*tm, (t+1)*tm) need the contiguous input band [t*tm, (t+1)*tm + th).
    The band arrives as two auto-pipelined blocks (xa: tm body rows, xb: th halo rows
    = the head of the next tile) that are staged into VMEM scratch `band`, applying the
    previous layer's BatchNorm+LeakyReLU ("prescale") on the fly.  Each tap then
    contributes  acc += band[off : off+rows] @ W_tap  on the MXU.
    Ragged / padded rows produce garbage outputs that the host discards; the BN stats
    are masked against the host-provided validity mask so they never see those rows.
    """
    it = iter(refs)
    xa_ref = next(it)                             # (tm, cin)
    xb_ref = next(it)                             # (th, cin)  halo rows
    w_ref = next(it)                              # (ntaps, cin, cout) VMEM-resident
    scale_ref = next(it) if prescale else None    # (1, cin)
    shift_ref = next(it) if prescale else None    # (1, cin)
    mask_ref = next(it) if with_stats else None   # (tm, 1)   validity mask
    o_ref = next(it)                              # (tm, cout)
    stat_ref = next(it) if with_stats else None   # (8, cout) row0=sum, row1=sumsq
    band_ref = next(it)                           # scratch VMEM (tm+th, cin)

    ntaps = len(offs)
    rc = min(_RC, tm)
    n_full, rem = tm // rc, tm % rc

    sc = scale_ref[...] if prescale else None
    sh = shift_ref[...] if prescale else None

    # ---- stage the band (fused BN+LeakyReLU of the previous layer) ------------------
    def stage(dst0, src_ref, src0, rows):
        v = src_ref[pl.ds(src0, rows), :]
        if prescale:
            v = _leaky(v * sc + sh)
        band_ref[pl.ds(dst0, rows), :] = v

    if n_full <= 4:
        for i in range(n_full):
            stage(i * rc, xa_ref, i * rc, rc)
    else:
        def _stage_body(i, carry):
            r0 = pl.multiple_of(i * rc, rc)
            stage(r0, xa_ref, r0, rc)
            return carry
        jax.lax.fori_loop(0, n_full, _stage_body, 0)
    if rem:
        stage(n_full * rc, xa_ref, n_full * rc, rem)
    stage(tm, xb_ref, 0, th)

    # ---- tap-accumulated matmul + fused activation + partial BN stats ---------------
    def do_chunk(r0, rows, s1, s2):
        acc = jnp.zeros((rows, cout), jnp.float32)
        for t in range(ntaps):
            xs = band_ref[pl.ds(r0 + offs[t], rows), :]
            acc = acc + jnp.dot(xs, w_ref[t], preferred_element_type=jnp.float32)
        if with_stats:
            msk = mask_ref[pl.ds(r0, rows), :]
            am = acc * msk
            s1 = s1 + jnp.sum(am, axis=0, keepdims=True)
            s2 = s2 + jnp.sum(am * acc, axis=0, keepdims=True)
        if act == "leaky":
            y = _leaky(acc)
        elif act == "sigmoid":
            y = 1.0 / (1.0 + jnp.exp(-acc))
        else:
            y = acc
        o_ref[pl.ds(r0, rows), :] = y
        return s1, s2

    s1 = jnp.zeros((1, cout), jnp.float32)
    s2 = jnp.zeros((1, cout), jnp.float32)
    if n_full <= 4:
        for i in range(n_full):
            s1, s2 = do_chunk(i * rc, rc, s1, s2)
    else:
        def _body(i, carry):
            r0 = pl.multiple_of(i * rc, rc)
            return do_chunk(r0, rc, *carry)
        s1, s2 = jax.lax.fori_loop(0, n_full, _body, (s1, s2))
    if rem:
        s1, s2 = do_chunk(n_full * rc, rem, s1, s2)

    if with_stats:
        # Layout contract with _finalize_bn: row 0 = per-channel sum, row 1 = sum of
        # squares over this tile's *valid* rows; rows 2..7 are never read host-side.
        stat_ref[0:1, :] = s1
        stat_ref[1:2, :] = s2


# ------------------------------------------------------------------ call wrapper ----
def _plan_tiles(m_full, maxoff, cin, cout, with_stats):
    """Halo size th and row-tile tm for one conv.  tm is sized from the per-generation
    VMEM budget (bigger tiles amortize the ~0.35us grid-step overhead and raise HBM
    utilization), is a multiple of th so the halo BlockSpec index stays integral, and
    is clamped so the grid has >= 2 steps whenever possible (v7x megacore)."""
    th = _round_up(max(maxoff, 8), 8)
    ci, co = max(cin, 128), max(cout, 128)            # lane-padded VMEM footprint
    per_row = 4 * (3 * ci + 2 * co)                   # xa(2x) + band + out(2x)
    if with_stats:
        per_row += 2 * 512                            # double-buffered (tm,1) mask
    tm_cap = max(th, TILE_BUDGET // per_row)
    tm_cap = min(tm_cap, 16 * 1024)
    tm_cap = min(tm_cap, _round_up(-(-m_full // 2), 8))
    tm = th * max(1, tm_cap // th)
    nt = -(-m_full // tm)
    mext = nt * tm + th
    return tm, th, nt, mext


def _conv_flat(xf, w_taps, offs, *, act, stats_mask=None, prescale=None):
    """y_full[r] = act( sum_t prescale(xf)[r + offs[t]] @ w_taps[t] ).

    xf: (m_full, cin) flattened (padded) NHWC activation.  Returns the (nt*tm, cout)
    full-grid output (caller slices the valid rows) plus, when stats_mask is given,
    per-tile (sum, sumsq) BatchNorm partials."""
    m_full, cin = xf.shape
    ntaps, cin_w, cout = w_taps.shape
    assert cin_w == cin and len(offs) == ntaps
    with_stats = stats_mask is not None
    has_pre = prescale is not None

    tm, th, nt, mext = _plan_tiles(m_full, max(offs), cin, cout, with_stats)
    ratio = tm // th

    xf_p = jnp.pad(xf.astype(jnp.float32), ((0, mext - m_full), (0, 0)))
    args = [xf_p, xf_p, w_taps.astype(jnp.float32)]
    in_specs = [
        pl.BlockSpec((tm, cin), lambda t: (t, 0)),                 # body rows
        pl.BlockSpec((th, cin), lambda t: ((t + 1) * ratio, 0)),   # halo rows
        pl.BlockSpec((ntaps, cin, cout), lambda t: (0, 0, 0)),     # weights (resident)
    ]
    if has_pre:
        sc, sh = prescale
        args += [sc.reshape(1, cin).astype(jnp.float32),
                 sh.reshape(1, cin).astype(jnp.float32)]
        in_specs += [pl.BlockSpec((1, cin), lambda t: (0, 0)),
                     pl.BlockSpec((1, cin), lambda t: (0, 0))]
    if with_stats:
        mask_p = jnp.pad(stats_mask.astype(jnp.float32),
                         ((0, mext - m_full), (0, 0)))
        args.append(mask_p)
        in_specs.append(pl.BlockSpec((tm, 1), lambda t: (t, 0)))

    out_shape = [jax.ShapeDtypeStruct((nt * tm, cout), jnp.float32)]
    out_specs = [pl.BlockSpec((tm, cout), lambda t: (t, 0))]
    if with_stats:
        out_shape.append(jax.ShapeDtypeStruct((8 * nt, cout), jnp.float32))
        out_specs.append(pl.BlockSpec((8, cout), lambda t: (t, 0)))

    kernel = functools.partial(
        _conv_tap_kernel, offs=tuple(int(o) for o in offs), tm=tm, th=th, cout=cout,
        act=act, prescale=has_pre, with_stats=with_stats)

    outs = pl.pallas_call(
        kernel,
        grid=(nt,),
        in_specs=in_specs,
        out_specs=tuple(out_specs),
        out_shape=tuple(out_shape),
        scratch_shapes=[pltpu.VMEM((tm + th, cin), jnp.float32)],
        compiler_params=pltpu.CompilerParams(
            dimension_semantics=("parallel",),
            vmem_limit_bytes=VMEM_LIMIT),
    )(*args)
    return (outs[0], outs[1]) if with_stats else outs[0]


# ------------------------------------------------------------------ host helpers ----
def _valid_mask(n, hg, wg, oh, ow):
    row_ok = (jnp.arange(hg) < oh)[:, None]
    col_ok = (jnp.arange(wg) < ow)[None, :]
    m = (row_ok & col_ok).astype(jnp.float32).reshape(1, hg * wg, 1)
    return jnp.broadcast_to(m, (n, hg * wg, 1)).reshape(n * hg * wg, 1)


def _finalize_bn(stats, count):
    # stats rows 0::8 are per-tile channel sums, rows 1::8 sums of squares (layout
    # contract with _conv_tap_kernel).  Single-pass E[x^2]-E[x]^2 in f32 -- fine at
    # these magnitudes; a Welford-style merge would be safer for trained networks.
    s1 = jnp.sum(stats[0::8], axis=0)
    s2 = jnp.sum(stats[1::8], axis=0)
    mean = s1 / count
    var = jnp.maximum(s2 / count - mean * mean, 0.0)     # biased var (training BN)
    scale = jax.lax.rsqrt(var + BN_EPS)
    return scale, -mean * scale                          # y = x*scale + shift


def _w_taps_3x3(w_oihw):            # (Cout, Cin, 3, 3) -> (9, Cin, Cout)
    return jnp.stack([w_oihw[:, :, i, j].T for i in range(3) for j in range(3)], 0)


def _w_taps_s2_packed(w_oihw):      # (128, 64, 4, 4) -> (4, 256, 128), phase packed
    mats = []
    for a in range(2):
        for b in range(2):
            rows = [w_oihw[:, :, 2 * a + p, 2 * b + q].T for (p, q) in PHASES]
            mats.append(jnp.concatenate(rows, axis=0))
    return jnp.stack(mats, axis=0)


def _w_taps_final(w_oihw, pad_to=128):   # (1, 128, 4, 4) -> (16, 128, 128); col 0 real
    taps = jnp.stack([w_oihw[:, :, i, j].T for i in range(4) for j in range(4)], 0)
    return jnp.pad(taps, ((0, 0), (0, 0), (0, pad_to - taps.shape[-1])))


# ------------------------------------------------------------------ forward ---------
def discriminator_forward(x_nchw, params):
    """Input (N, 16, H, W) float32; output (N*OH4*OW4,) sigmoid scores (== torch)."""
    x = jnp.transpose(x_nchw, (0, 2, 3, 1)).astype(jnp.float32)     # NHWC
    n, h, w, cin = x.shape
    assert cin == 16 and h % 2 == 0 and w % 2 == 0 and h >= 8 and w >= 8

    hp, wp = h + 2, w + 2
    offs3x3 = tuple(i * wp + j for i in range(3) for j in range(3))

    # conv1: 16->32, 3x3, s1, p1, LeakyReLU fused in-kernel.
    xf1 = jnp.pad(x, ((0, 0), (1, 1), (1, 1), (0, 0))).reshape(n * hp * wp, 16)
    y1 = _conv_flat(xf1, _w_taps_3x3(params["w1"]), offs3x3, act="leaky")
    a1 = y1[:n * hp * wp].reshape(n, hp, wp, 32)[:, :h, :w, :]

    # conv2: 32->64, 3x3, s1, p1 (raw output); per-channel BN stats fused in-kernel.
    xf2 = jnp.pad(a1, ((0, 0), (1, 1), (1, 1), (0, 0))).reshape(n * hp * wp, 32)
    mask2 = _valid_mask(n, hp, wp, h, w)
    y2, st2 = _conv_flat(xf2, _w_taps_3x3(params["w2"]), offs3x3, act="none",
                         stats_mask=mask2)
    sc2, sh2 = _finalize_bn(st2, n * h * w)
    raw2 = y2[:n * hp * wp].reshape(n, hp, wp, 64)[:, :h, :w, :]

    # conv3: 64->128, 4x4, s2, p1, rewritten as a 2x2 stride-1 conv over 4 phase grids
    # packed into channels (Cin 64 -> 256).  BN2+LeakyReLU are fused as this conv's
    # prescale; the zero padding stays exact because the border is filled with the
    # BN-neutral value v_c = -shift/scale (leaky(v_c*scale+shift) == 0).
    vpad2 = -sh2 / sc2
    x3p = jnp.broadcast_to(vpad2, (n, hp, wp, 64))
    x3p = x3p.at[:, 1:h + 1, 1:w + 1, :].set(raw2)
    xpk3 = jnp.concatenate([x3p[:, p::2, q::2, :] for (p, q) in PHASES], axis=-1)
    hpg, wpg = hp // 2, wp // 2
    oh3, ow3 = h // 2, w // 2
    xf3 = xpk3.reshape(n * hpg * wpg, 256)
    offs2x2 = tuple(a * wpg + b for a in range(2) for b in range(2))
    mask3 = _valid_mask(n, hpg, wpg, oh3, ow3)
    y3, st3 = _conv_flat(xf3, _w_taps_s2_packed(params["w3"]), offs2x2, act="none",
                         stats_mask=mask3,
                         prescale=(jnp.tile(sc2, 4), jnp.tile(sh2, 4)))
    sc3, sh3 = _finalize_bn(st3, n * oh3 * ow3)
    raw3 = y3[:n * hpg * wpg].reshape(n, hpg, wpg, 128)[:, :oh3, :ow3, :]

    # conv4: 128->1, 4x4, s1, p0, Sigmoid; BN3+LeakyReLU fused as prescale.  Cout is
    # zero-padded 1 -> 128 for lane-dense stores; the real score is column 0.
    xf4 = raw3.reshape(n * oh3 * ow3, 128)
    offs4x4 = tuple(i * ow3 + j for i in range(4) for j in range(4))
    y4 = _conv_flat(xf4, _w_taps_final(params["w4"]), offs4x4, act="sigmoid",
                    prescale=(sc3, sh3))
    oh4, ow4 = oh3 - 3, ow3 - 3
    out = y4[:n * oh3 * ow3].reshape(n, oh3, ow3, 128)[:, :oh4, :ow4, 0]
    return out.reshape(-1)          # == torch output.view(-1, 1).squeeze(1)


# ------------------------------------------------------------------ reference -------
def _ref_forward(x_nchw, params):
    def conv(x, wt, stride, pad):
        return jax.lax.conv_general_dilated(
            x, wt, window_strides=(stride, stride),
            padding=((pad, pad), (pad, pad)),
            dimension_numbers=("NCHW", "OIHW", "NCHW"))

    def bn(x):
        mean = jnp.mean(x, axis=(0, 2, 3), keepdims=True)
        var = jnp.mean((x - mean) ** 2, axis=(0, 2, 3), keepdims=True)
        return (x - mean) * jax.lax.rsqrt(var + BN_EPS)

    lk = lambda v: jnp.where(v > 0, v, LEAKY_SLOPE * v)
    x = lk(conv(x_nchw, params["w1"], 1, 1))
    x = lk(bn(conv(x, params["w2"], 1, 1)))
    x = lk(bn(conv(x, params["w3"], 2, 1)))
    x = jax.nn.sigmoid(conv(x, params["w4"], 1, 0))
    return x.reshape(-1)


# ------------------------------------------------------------------ main ------------
if __name__ == "__main__":
    key = jax.random.PRNGKey(0)
    kx, k1, k2, k3, k4 = jax.random.split(key, 5)

    # Spatial 8x8 so the final 4x4 valid conv reduces to 1x1 (output shape (N,)).
    N, H, W = 2, 8, 8
    x = jax.random.normal(kx, (N, 16, H, W), jnp.float32)

    # Deterministic synthetic weights (DCGAN-style N(0, 0.02) init), PyTorch OIHW.
    params = {
        "w1": 0.02 * jax.random.normal(k1, (32, 16, 3, 3), jnp.float32),
        "w2": 0.02 * jax.random.normal(k2, (64, 32, 3, 3), jnp.float32),
        "w3": 0.02 * jax.random.normal(k3, (128, 64, 4, 4), jnp.float32),
        "w4": 0.02 * jax.random.normal(k4, (1, 128, 4, 4), jnp.float32),
    }

    fwd = jax.jit(discriminator_forward)
    out = jax.block_until_ready(fwd(x, params))
    ref = jax.block_until_ready(_ref_forward(x, params))

    assert out.shape == ref.shape == (N,), (out.shape, ref.shape)
    np.testing.assert_allclose(np.asarray(out), np.asarray(ref), rtol=1e-4, atol=2e-5)
    print("KERNEL_OK")
</pallas_src>

<mosaic_0001>
module attributes {stable_mosaic.version = 11 : i64} {
  func.func @_conv_tap_kernel(%arg0: i32, %arg1: memref<96x16xf32, #tpu.memory_space<vmem>>, %arg2: memref<24x16xf32, #tpu.memory_space<vmem>>, %arg3: memref<9x16x32xf32, #tpu.memory_space<vmem>>, %arg4: memref<96x32xf32, #tpu.memory_space<vmem>>, %arg5: memref<120x16xf32, #tpu.memory_space<vmem>>) attributes {dimension_semantics = [#tpu.dimension_semantics<parallel>], iteration_bounds = array<i64: 3>, scalar_prefetch = 0 : i64, scratch_operands = 1 : i64, tpu.core_type = #tpu.core_type<tc>, window_params = [{transform_indices = @transform_0, window_bounds = array<i64: 96, 16>}, {transform_indices = @transform_1, window_bounds = array<i64: 24, 16>}, {pipeline_mode = #tpu.pipeline_mode<synchronous>, transform_indices = @transform_2, window_bounds = array<i64: 9, 16, 32>}, {transform_indices = @transform_3, window_bounds = array<i64: 96, 32>}]} {
    %c0 = arith.constant 0 : index
    %c0_0 = arith.constant 0 : index
    %0 = vector.load %arg1[%c0, %c0_0] : memref<96x16xf32, #tpu.memory_space<vmem>>, vector<96x16xf32>
    %c0_1 = arith.constant 0 : index
    %c0_2 = arith.constant 0 : index
    %1 = vector.load %arg5[%c0_1, %c0_2] : memref<120x16xf32, #tpu.memory_space<vmem>>, vector<96x16xf32>
    tpu.vector_store %arg5[%c0_1, %c0_2], %0 {strides = array<i32>} : memref<120x16xf32, #tpu.memory_space<vmem>>, vector<96x16xf32>,
    %c0_3 = arith.constant 0 : index
    %c0_4 = arith.constant 0 : index
    %2 = vector.load %arg2[%c0_3, %c0_4] : memref<24x16xf32, #tpu.memory_space<vmem>>, vector<24x16xf32>
    %c96 = arith.constant 96 : index
    %c0_5 = arith.constant 0 : index
    %3 = vector.load %arg5[%c96, %c0_5] : memref<120x16xf32, #tpu.memory_space<vmem>>, vector<24x16xf32>
    tpu.vector_store %arg5[%c96, %c0_5], %2 {strides = array<i32>} : memref<120x16xf32, #tpu.memory_space<vmem>>, vector<24x16xf32>,
    %cst = arith.constant 0.000000e+00 : f32
    %4 = vector.broadcast %cst : f32 to vector<96x32xf32>
    %c0_6 = arith.constant 0 : index
    %c0_7 = arith.constant 0 : index
    %5 = vector.load %arg5[%c0_6, %c0_7] : memref<120x16xf32, #tpu.memory_space<vmem>>, vector<96x16xf32>
    %c0_8 = arith.constant 0 : index
    %c0_9 = arith.constant 0 : index
    %c0_10 = arith.constant 0 : index
    %6 = vector.load %arg3[%c0_8, %c0_9, %c0_10] : memref<9x16x32xf32, #tpu.memory_space<vmem>>, vector<1x16x32xf32>
    %7 = vector.shape_cast %6 : vector<1x16x32xf32> to vector<16x32xf32>
    %cst_11 = arith.constant dense<0.000000e+00> : vector<96x32xf32>
    %8 = tpu.matmul %5, %7, %cst_11 {dimension_numbers = #tpu.dot_dimension_numbers<[1], [0], [0], [1], [0, 0, 1, 1], [], []>} : vector<96x16xf32>, vector<16x32xf32>, vector<96x32xf32> -> vector<96x32xf32>
    %9 = arith.addf %4, %8 : vector<96x32xf32>
    %c1 = arith.constant 1 : index
    %c0_12 = arith.constant 0 : index
    %10 = vector.load %arg5[%c1, %c0_12] : memref<120x16xf32, #tpu.memory_space<vmem>>, vector<96x16xf32>
    %c1_13 = arith.constant 1 : index
    %c0_14 = arith.constant 0 : index
    %c0_15 = arith.constant 0 : index
    %11 = vector.load %arg3[%c1_13, %c0_14, %c0_15] : memref<9x16x32xf32, #tpu.memory_space<vmem>>, vector<1x16x32xf32>
    %12 = vector.shape_cast %11 : vector<1x16x32xf32> to vector<16x32xf32>
    %cst_16 = arith.constant dense<0.000000e+00> : vector<96x32xf32>
    %13 = tpu.matmul %10, %12, %cst_16 {dimension_numbers = #tpu.dot_dimension_numbers<[1], [0], [0], [1], [0, 0, 1, 1], [], []>} : vector<96x16xf32>, vector<16x32xf32>, vector<96x32xf32> -> vector<96x32xf32>
    %14 = arith.addf %9, %13 : vector<96x32xf32>
    %c2 = arith.constant 2 : index
    %c0_17 = arith.constant 0 : index
    %15 = vector.load %arg5[%c2, %c0_17] : memref<120x16xf32, #tpu.memory_space<vmem>>, vector<96x16xf32>
    %c2_18 = arith.constant 2 : index
    %c0_19 = arith.constant 0 : index
    %c0_20 = arith.constant 0 : index
    %16 = vector.load %arg3[%c2_18, %c0_19, %c0_20] : memref<9x16x32xf32, #tpu.memory_space<vmem>>, vector<1x16x32xf32>
    %17 = vector.shape_cast %16 : vector<1x16x32xf32> to vector<16x32xf32>
    %cst_21 = arith.constant dense<0.000000e+00> : vector<96x32xf32>
    %18 = tpu.matmul %15, %17, %cst_21 {dimension_numbers = #tpu.dot_dimension_numbers<[1], [0], [0], [1], [0, 0, 1, 1], [], []>} : vector<96x16xf32>, vector<16x32xf32>, vector<96x32xf32> -> vector<96x32xf32>
    %19 = arith.addf %14, %18 : vector<96x32xf32>
    %c10 = arith.constant 10 : index
    %c0_22 = arith.constant 0 : index
    %20 = vector.load %arg5[%c10, %c0_22] : memref<120x16xf32, #tpu.memory_space<vmem>>, vector<96x16xf32>
    %c3 = arith.constant 3 : index
    %c0_23 = arith.constant 0 : index
    %c0_24 = arith.constant 0 : index
    %21 = vector.load %arg3[%c3, %c0_23, %c0_24] : memref<9x16x32xf32, #tpu.memory_space<vmem>>, vector<1x16x32xf32>
    %22 = vector.shape_cast %21 : vector<1x16x32xf32> to vector<16x32xf32>
    %cst_25 = arith.constant dense<0.000000e+00> : vector<96x32xf32>
    %23 = tpu.matmul %20, %22, %cst_25 {dimension_numbers = #tpu.dot_dimension_numbers<[1], [0], [0], [1], [0, 0, 1, 1], [], []>} : vector<96x16xf32>, vector<16x32xf32>, vector<96x32xf32> -> vector<96x32xf32>
    %24 = arith.addf %19, %23 : vector<96x32xf32>
    %c11 = arith.constant 11 : index
    %c0_26 = arith.constant 0 : index
    %25 = vector.load %arg5[%c11, %c0_26] : memref<120x16xf32, #tpu.memory_space<vmem>>, vector<96x16xf32>
    %c4 = arith.constant 4 : index
    %c0_27 = arith.constant 0 : index
    %c0_28 = arith.constant 0 : index
    %26 = vector.load %arg3[%c4, %c0_27, %c0_28] : memref<9x16x32xf32, #tpu.memory_space<vmem>>, vector<1x16x32xf32>
    %27 = vector.shape_cast %26 : vector<1x16x32xf32> to vector<16x32xf32>
    %cst_29 = arith.constant dense<0.000000e+00> : vector<96x32xf32>
    %28 = tpu.matmul %25, %27, %cst_29 {dimension_numbers = #tpu.dot_dimension_numbers<[1], [0], [0], [1], [0, 0, 1, 1], [], []>} : vector<96x16xf32>, vector<16x32xf32>, vector<96x32xf32> -> vector<96x32xf32>
    %29 = arith.addf %24, %28 : vector<96x32xf32>
    %c12 = arith.constant 12 : index
    %c0_30 = arith.constant 0 : index
    %30 = vector.load %arg5[%c12, %c0_30] : memref<120x16xf32, #tpu.memory_space<vmem>>, vector<96x16xf32>
    %c5 = arith.constant 5 : index
    %c0_31 = arith.constant 0 : index
    %c0_32 = arith.constant 0 : index
    %31 = vector.load %arg3[%c5, %c0_31, %c0_32] : memref<9x16x32xf32, #tpu.memory_space<vmem>>, vector<1x16x32xf32>
    %32 = vector.shape_cast %31 : vector<1x16x32xf32> to vector<16x32xf32>
    %cst_33 = arith.constant dense<0.000000e+00> : vector<96x32xf32>
    %33 = tpu.matmul %30, %32, %cst_33 {dimension_numbers = #tpu.dot_dimension_numbers<[1], [0], [0], [1], [0, 0, 1, 1], [], []>} : vector<96x16xf32>, vector<16x32xf32>, vector<96x32xf32> -> vector<96x32xf32>
    %34 = arith.addf %29, %33 : vector<96x32xf32>
    %c20 = arith.constant 20 : index
    %c0_34 = arith.constant 0 : index
    %35 = vector.load %arg5[%c20, %c0_34] : memref<120x16xf32, #tpu.memory_space<vmem>>, vector<96x16xf32>
    %c6 = arith.constant 6 : index
    %c0_35 = arith.constant 0 : index
    %c0_36 = arith.constant 0 : index
    %36 = vector.load %arg3[%c6, %c0_35, %c0_36] : memref<9x16x32xf32, #tpu.memory_space<vmem>>, vector<1x16x32xf32>
    %37 = vector.shape_cast %36 : vector<1x16x32xf32> to vector<16x32xf32>
    %cst_37 = arith.constant dense<0.000000e+00> : vector<96x32xf32>
    %38 = tpu.matmul %35, %37, %cst_37 {dimension_numbers = #tpu.dot_dimension_numbers<[1], [0], [0], [1], [0, 0, 1, 1], [], []>} : vector<96x16xf32>, vector<16x32xf32>, vector<96x32xf32> -> vector<96x32xf32>
    %39 = arith.addf %34, %38 : vector<96x32xf32>
    %c21 = arith.constant 21 : index
    %c0_38 = arith.constant 0 : index
    %40 = vector.load %arg5[%c21, %c0_38] : memref<120x16xf32, #tpu.memory_space<vmem>>, vector<96x16xf32>
    %c7 = arith.constant 7 : index
    %c0_39 = arith.constant 0 : index
    %c0_40 = arith.constant 0 : index
    %41 = vector.load %arg3[%c7, %c0_39, %c0_40] : memref<9x16x32xf32, #tpu.memory_space<vmem>>, vector<1x16x32xf32>
    %42 = vector.shape_cast %41 : vector<1x16x32xf32> to vector<16x32xf32>
    %cst_41 = arith.constant dense<0.000000e+00> : vector<96x32xf32>
    %43 = tpu.matmul %40, %42, %cst_41 {dimension_numbers = #tpu.dot_dimension_numbers<[1], [0], [0], [1], [0, 0, 1, 1], [], []>} : vector<96x16xf32>, vector<16x32xf32>, vector<96x32xf32> -> vector<96x32xf32>
    %44 = arith.addf %39, %43 : vector<96x32xf32>
    %c22 = arith.constant 22 : index
    %c0_42 = arith.constant 0 : index
    %45 = vector.load %arg5[%c22, %c0_42] : memref<120x16xf32, #tpu.memory_space<vmem>>, vector<96x16xf32>
    %c8 = arith.constant 8 : index
    %c0_43 = arith.constant 0 : index
    %c0_44 = arith.constant 0 : index
    %46 = vector.load %arg3[%c8, %c0_43, %c0_44] : memref<9x16x32xf32, #tpu.memory_space<vmem>>, vector<1x16x32xf32>
    %47 = vector.shape_cast %46 : vector<1x16x32xf32> to vector<16x32xf32>
    %cst_45 = arith.constant dense<0.000000e+00> : vector<96x32xf32>
    %48 = tpu.matmul %45, %47, %cst_45 {dimension_numbers = #tpu.dot_dimension_numbers<[1], [0], [0], [1], [0, 0, 1, 1], [], []>} : vector<96x16xf32>, vector<16x32xf32>, vector<96x32xf32> -> vector<96x32xf32>
    %49 = arith.addf %44, %48 : vector<96x32xf32>
    %cst_46 = arith.constant 2.000000e-01 : f32
    %50 = vector.broadcast %cst_46 : f32 to vector<96x32xf32>
    %51 = arith.mulf %50, %49 : vector<96x32xf32>
    %52 = arith.maximumf %49, %51 : vector<96x32xf32>
    %c0_47 = arith.constant 0 : index
    %c0_48 = arith.constant 0 : index
    %53 = vector.load %arg4[%c0_47, %c0_48] : memref<96x32xf32, #tpu.memory_space<vmem>>, vector<96x32xf32>
    tpu.vector_store %arg4[%c0_47, %c0_48], %52 {strides = array<i32>} : memref<96x32xf32, #tpu.memory_space<vmem>>, vector<96x32xf32>,
    return
  }
  func.func @transform_0(%arg0: i32) -> (i32, i32) {
    %c0_i32 = arith.constant 0 : i32
    %c0_i32_0 = arith.constant 0 : i32
    return %arg0, %c0_i32 : i32, i32
  }
  func.func @transform_1(%arg0: i32) -> (i32, i32) {
    %c1_i32 = arith.constant 1 : i32
    %0 = arith.addi %arg0, %c1_i32 : i32
    %c4_i32 = arith.constant 4 : i32
    %1 = arith.muli %0, %c4_i32 : i32
    %c0_i32 = arith.constant 0 : i32
    %c0_i32_0 = arith.constant 0 : i32
    return %1, %c0_i32 : i32, i32
  }
  func.func @transform_2(%arg0: i32) -> (i32, i32, i32) {
    %c0_i32 = arith.constant 0 : i32
    %c0_i32_0 = arith.constant 0 : i32
    %c0_i32_1 = arith.constant 0 : i32
    %c0_i32_2 = arith.constant 0 : i32
    return %c0_i32, %c0_i32_0, %c0_i32_1 : i32, i32, i32
  }
  func.func @transform_3(%arg0: i32) -> (i32, i32) {
    %c0_i32 = arith.constant 0 : i32
    %c0_i32_0 = arith.constant 0 : i32
    return %arg0, %c0_i32 : i32, i32
  }
}

module attributes {stable_mosaic.version = 11 : i64} {
  func.func @_conv_tap_kernel(%arg0: i32, %arg1: memref<96x32xf32, #tpu.memory_space<vmem>>, %arg2: memref<24x32xf32, #tpu.memory_space<vmem>>, %arg3: memref<9x32x64xf32, #tpu.memory_space<vmem>>, %arg4: memref<96x1xf32, #tpu.memory_space<vmem>>, %arg5: memref<96x64xf32, #tpu.memory_space<vmem>>, %arg6: memref<8x64xf32, #tpu.memory_space<vmem>>, %arg7: memref<120x32xf32, #tpu.memory_space<vmem>>) attributes {dimension_semantics = [#tpu.dimension_semantics<parallel>], iteration_bounds = array<i64: 3>, scalar_prefetch = 0 : i64, scratch_operands = 1 : i64, tpu.core_type = #tpu.core_type<tc>, window_params = [{transform_indices = @transform_0, window_bounds = array<i64: 96, 32>}, {transform_indices = @transform_1, window_bounds = array<i64: 24, 32>}, {pipeline_mode = #tpu.pipeline_mode<synchronous>, transform_indices = @transform_2, window_bounds = array<i64: 9, 32, 64>}, {transform_indices = @transform_3, window_bounds = array<i64: 96, 1>}, {transform_indices = @transform_4, window_bounds = array<i64: 96, 64>}, {transform_indices = @transform_5, window_bounds = array<i64: 8, 64>}]} {
    %c0 = arith.constant 0 : index
    %c0_0 = arith.constant 0 : index
    %0 = vector.load %arg1[%c0, %c0_0] : memref<96x32xf32, #tpu.memory_space<vmem>>, vector<96x32xf32>
    %c0_1 = arith.constant 0 : index
    %c0_2 = arith.constant 0 : index
    %1 = vector.load %arg7[%c0_1, %c0_2] : memref<120x32xf32, #tpu.memory_space<vmem>>, vector<96x32xf32>
    tpu.vector_store %arg7[%c0_1, %c0_2], %0 {strides = array<i32>} : memref<120x32xf32, #tpu.memory_space<vmem>>, vector<96x32xf32>,
    %c0_3 = arith.constant 0 : index
    %c0_4 = arith.constant 0 : index
    %2 = vector.load %arg2[%c0_3, %c0_4] : memref<24x32xf32, #tpu.memory_space<vmem>>, vector<24x32xf32>
    %c96 = arith.constant 96 : index
    %c0_5 = arith.constant 0 : index
    %3 = vector.load %arg7[%c96, %c0_5] : memref<120x32xf32, #tpu.memory_space<vmem>>, vector<24x32xf32>
    tpu.vector_store %arg7[%c96, %c0_5], %2 {strides = array<i32>} : memref<120x32xf32, #tpu.memory_space<vmem>>, vector<24x32xf32>,
    %cst = arith.constant 0.000000e+00 : f32
    %4 = vector.broadcast %cst : f32 to vector<1x64xf32>
    %cst_6 = arith.constant 0.000000e+00 : f32
    %5 = vector.broadcast %cst_6 : f32 to vector<1x64xf32>
    %cst_7 = arith.constant 0.000000e+00 : f32
    %6 = vector.broadcast %cst_7 : f32 to vector<96x64xf32>
    %c0_8 = arith.constant 0 : index
    %c0_9 = arith.constant 0 : index
    %7 = vector.load %arg7[%c0_8, %c0_9] : memref<120x32xf32, #tpu.memory_space<vmem>>, vector<96x32xf32>
    %c0_10 = arith.constant 0 : index
    %c0_11 = arith.constant 0 : index
    %c0_12 = arith.constant 0 : index
    %8 = vector.load %arg3[%c0_10, %c0_11, %c0_12] : memref<9x32x64xf32, #tpu.memory_space<vmem>>, vector<1x32x64xf32>
    %9 = vector.shape_cast %8 : vector<1x32x64xf32> to vector<32x64xf32>
    %cst_13 = arith.constant dense<0.000000e+00> : vector<96x64xf32>
    %10 = tpu.matmul %7, %9, %cst_13 {dimension_numbers = #tpu.dot_dimension_numbers<[1], [0], [0], [1], [0, 0, 1, 1], [], []>} : vector<96x32xf32>, vector<32x64xf32>, vector<96x64xf32> -> vector<96x64xf32>
    %11 = arith.addf %6, %10 : vector<96x64xf32>
    %c1 = arith.constant 1 : index
    %c0_14 = arith.constant 0 : index
    %12 = vector.load %arg7[%c1, %c0_14] : memref<120x32xf32, #tpu.memory_space<vmem>>, vector<96x32xf32>
    %c1_15 = arith.constant 1 : index
    %c0_16 = arith.constant 0 : index
    %c0_17 = arith.constant 0 : index
    %13 = vector.load %arg3[%c1_15, %c0_16, %c0_17] : memref<9x32x64xf32, #tpu.memory_space<vmem>>, vector<1x32x64xf32>
    %14 = vector.shape_cast %13 : vector<1x32x64xf32> to vector<32x64xf32>
    %cst_18 = arith.constant dense<0.000000e+00> : vector<96x64xf32>
    %15 = tpu.matmul %12, %14, %cst_18 {dimension_numbers = #tpu.dot_dimension_numbers<[1], [0], [0], [1], [0, 0, 1, 1], [], []>} : vector<96x32xf32>, vector<32x64xf32>, vector<96x64xf32> -> vector<96x64xf32>
    %16 = arith.addf %11, %15 : vector<96x64xf32>
    %c2 = arith.constant 2 : index
    %c0_19 = arith.constant 0 : index
    %17 = vector.load %arg7[%c2, %c0_19] : memref<120x32xf32, #tpu.memory_space<vmem>>, vector<96x32xf32>
    %c2_20 = arith.constant 2 : index
    %c0_21 = arith.constant 0 : index
    %c0_22 = arith.constant 0 : index
    %18 = vector.load %arg3[%c2_20, %c0_21, %c0_22] : memref<9x32x64xf32, #tpu.memory_space<vmem>>, vector<1x32x64xf32>
    %19 = vector.shape_cast %18 : vector<1x32x64xf32> to vector<32x64xf32>
    %cst_23 = arith.constant dense<0.000000e+00> : vector<96x64xf32>
    %20 = tpu.matmul %17, %19, %cst_23 {dimension_numbers = #tpu.dot_dimension_numbers<[1], [0], [0], [1], [0, 0, 1, 1], [], []>} : vector<96x32xf32>, vector<32x64xf32>, vector<96x64xf32> -> vector<96x64xf32>
    %21 = arith.addf %16, %20 : vector<96x64xf32>
    %c10 = arith.constant 10 : index
    %c0_24 = arith.constant 0 : index
    %22 = vector.load %arg7[%c10, %c0_24] : memref<120x32xf32, #tpu.memory_space<vmem>>, vector<96x32xf32>
    %c3 = arith.constant 3 : index
    %c0_25 = arith.constant 0 : index
    %c0_26 = arith.constant 0 : index
    %23 = vector.load %arg3[%c3, %c0_25, %c0_26] : memref<9x32x64xf32, #tpu.memory_space<vmem>>, vector<1x32x64xf32>
    %24 = vector.shape_cast %23 : vector<1x32x64xf32> to vector<32x64xf32>
    %cst_27 = arith.constant dense<0.000000e+00> : vector<96x64xf32>
    %25 = tpu.matmul %22, %24, %cst_27 {dimension_numbers = #tpu.dot_dimension_numbers<[1], [0], [0], [1], [0, 0, 1, 1], [], []>} : vector<96x32xf32>, vector<32x64xf32>, vector<96x64xf32> -> vector<96x64xf32>
    %26 = arith.addf %21, %25 : vector<96x64xf32>
    %c11 = arith.constant 11 : index
    %c0_28 = arith.constant 0 : index
    %27 = vector.load %arg7[%c11, %c0_28] : memref<120x32xf32, #tpu.memory_space<vmem>>, vector<96x32xf32>
    %c4 = arith.constant 4 : index
    %c0_29 = arith.constant 0 : index
    %c0_30 = arith.constant 0 : index
    %28 = vector.load %arg3[%c4, %c0_29, %c0_30] : memref<9x32x64xf32, #tpu.memory_space<vmem>>, vector<1x32x64xf32>
    %29 = vector.shape_cast %28 : vector<1x32x64xf32> to vector<32x64xf32>
    %cst_31 = arith.constant dense<0.000000e+00> : vector<96x64xf32>
    %30 = tpu.matmul %27, %29, %cst_31 {dimension_numbers = #tpu.dot_dimension_numbers<[1], [0], [0], [1], [0, 0, 1, 1], [], []>} : vector<96x32xf32>, vector<32x64xf32>, vector<96x64xf32> -> vector<96x64xf32>
    %31 = arith.addf %26, %30 : vector<96x64xf32>
    %c12 = arith.constant 12 : index
    %c0_32 = arith.constant 0 : index
    %32 = vector.load %arg7[%c12, %c0_32] : memref<120x32xf32, #tpu.memory_space<vmem>>, vector<96x32xf32>
    %c5 = arith.constant 5 : index
    %c0_33 = arith.constant 0 : index
    %c0_34 = arith.constant 0 : index
    %33 = vector.load %arg3[%c5, %c0_33, %c0_34] : memref<9x32x64xf32, #tpu.memory_space<vmem>>, vector<1x32x64xf32>
    %34 = vector.shape_cast %33 : vector<1x32x64xf32> to vector<32x64xf32>
    %cst_35 = arith.constant dense<0.000000e+00> : vector<96x64xf32>
    %35 = tpu.matmul %32, %34, %cst_35 {dimension_numbers = #tpu.dot_dimension_numbers<[1], [0], [0], [1], [0, 0, 1, 1], [], []>} : vector<96x32xf32>, vector<32x64xf32>, vector<96x64xf32> -> vector<96x64xf32>
    %36 = arith.addf %31, %35 : vector<96x64xf32>
    %c20 = arith.constant 20 : index
    %c0_36 = arith.constant 0 : index
    %37 = vector.load %arg7[%c20, %c0_36] : memref<120x32xf32, #tpu.memory_space<vmem>>, vector<96x32xf32>
    %c6 = arith.constant 6 : index
    %c0_37 = arith.constant 0 : index
    %c0_38 = arith.constant 0 : index
    %38 = vector.load %arg3[%c6, %c0_37, %c0_38] : memref<9x32x64xf32, #tpu.memory_space<vmem>>, vector<1x32x64xf32>
    %39 = vector.shape_cast %38 : vector<1x32x64xf32> to vector<32x64xf32>
    %cst_39 = arith.constant dense<0.000000e+00> : vector<96x64xf32>
    %40 = tpu.matmul %37, %39, %cst_39 {dimension_numbers = #tpu.dot_dimension_numbers<[1], [0], [0], [1], [0, 0, 1, 1], [], []>} : vector<96x32xf32>, vector<32x64xf32>, vector<96x64xf32> -> vector<96x64xf32>
    %41 = arith.addf %36, %40 : vector<96x64xf32>
    %c21 = arith.constant 21 : index
    %c0_40 = arith.constant 0 : index
    %42 = vector.load %arg7[%c21, %c0_40] : memref<120x32xf32, #tpu.memory_space<vmem>>, vector<96x32xf32>
    %c7 = arith.constant 7 : index
    %c0_41 = arith.constant 0 : index
    %c0_42 = arith.constant 0 : index
    %43 = vector.load %arg3[%c7, %c0_41, %c0_42] : memref<9x32x64xf32, #tpu.memory_space<vmem>>, vector<1x32x64xf32>
    %44 = vector.shape_cast %43 : vector<1x32x64xf32> to vector<32x64xf32>
    %cst_43 = arith.constant dense<0.000000e+00> : vector<96x64xf32>
    %45 = tpu.matmul %42, %44, %cst_43 {dimension_numbers = #tpu.dot_dimension_numbers<[1], [0], [0], [1], [0, 0, 1, 1], [], []>} : vector<96x32xf32>, vector<32x64xf32>, vector<96x64xf32> -> vector<96x64xf32>
    %46 = arith.addf %41, %45 : vector<96x64xf32>
    %c22 = arith.constant 22 : index
    %c0_44 = arith.constant 0 : index
    %47 = vector.load %arg7[%c22, %c0_44] : memref<120x32xf32, #tpu.memory_space<vmem>>, vector<96x32xf32>
    %c8 = arith.constant 8 : index
    %c0_45 = arith.constant 0 : index
    %c0_46 = arith.constant 0 : index
    %48 = vector.load %arg3[%c8, %c0_45, %c0_46] : memref<9x32x64xf32, #tpu.memory_space<vmem>>, vector<1x32x64xf32>
    %49 = vector.shape_cast %48 : vector<1x32x64xf32> to vector<32x64xf32>
    %cst_47 = arith.constant dense<0.000000e+00> : vector<96x64xf32>
    %50 = tpu.matmul %47, %49, %cst_47 {dimension_numbers = #tpu.dot_dimension_numbers<[1], [0], [0], [1], [0, 0, 1, 1], [], []>} : vector<96x32xf32>, vector<32x64xf32>, vector<96x64xf32> -> vector<96x64xf32>
    %51 = arith.addf %46, %50 : vector<96x64xf32>
    %c0_48 = arith.constant 0 : index
    %c0_49 = arith.constant 0 : index
    %52 = vector.load %arg4[%c0_48, %c0_49] : memref<96x1xf32, #tpu.memory_space<vmem>>, vector<96x1xf32>
    %53 = vector.broadcast %52 : vector<96x1xf32> to vector<96x64xf32>
    %54 = arith.mulf %51, %53 : vector<96x64xf32>
    %cst_50 = arith.constant dense<0.000000e+00> : vector<64xf32>
    %55 = vector.multi_reduction <add>, %54, %cst_50 [0] : vector<96x64xf32> to vector<64xf32>
    %56 = vector.shape_cast %55 : vector<64xf32> to vector<1x64xf32>
    %57 = arith.addf %4, %56 : vector<1x64xf32>
    %58 = arith.mulf %54, %51 : vector<96x64xf32>
    %cst_51 = arith.constant dense<0.000000e+00> : vector<64xf32>
    %59 = vector.multi_reduction <add>, %58, %cst_51 [0] : vector<96x64xf32> to vector<64xf32>
    %60 = vector.shape_cast %59 : vector<64xf32> to vector<1x64xf32>
    %61 = arith.addf %5, %60 : vector<1x64xf32>
    %c0_52 = arith.constant 0 : index
    %c0_53 = arith.constant 0 : index
    %62 = vector.load %arg5[%c0_52, %c0_53] : memref<96x64xf32, #tpu.memory_space<vmem>>, vector<96x64xf32>
    tpu.vector_store %arg5[%c0_52, %c0_53], %51 {strides = array<i32>} : memref<96x64xf32, #tpu.memory_space<vmem>>, vector<96x64xf32>,
    %c0_54 = arith.constant 0 : index
    %c0_55 = arith.constant 0 : index
    %63 = vector.load %arg6[%c0_54, %c0_55] : memref<8x64xf32, #tpu.memory_space<vmem>>, vector<1x64xf32>
    tpu.vector_store %arg6[%c0_54, %c0_55], %57 {strides = array<i32>} : memref<8x64xf32, #tpu.memory_space<vmem>>, vector<1x64xf32>,
    %c1_56 = arith.constant 1 : index
    %c0_57 = arith.constant 0 : index
    %64 = vector.load %arg6[%c1_56, %c0_57] : memref<8x64xf32, #tpu.memory_space<vmem>>, vector<1x64xf32>
    tpu.vector_store %arg6[%c1_56, %c0_57], %61 {strides = array<i32>} : memref<8x64xf32, #tpu.memory_space<vmem>>, vector<1x64xf32>,
    return
  }
  func.func @transform_0(%arg0: i32) -> (i32, i32) {
    %c0_i32 = arith.constant 0 : i32
    %c0_i32_0 = arith.constant 0 : i32
    return %arg0, %c0_i32 : i32, i32
  }
  func.func @transform_1(%arg0: i32) -> (i32, i32) {
    %c1_i32 = arith.constant 1 : i32
    %0 = arith.addi %arg0, %c1_i32 : i32
    %c4_i32 = arith.constant 4 : i32
    %1 = arith.muli %0, %c4_i32 : i32
    %c0_i32 = arith.constant 0 : i32
    %c0_i32_0 = arith.constant 0 : i32
    return %1, %c0_i32 : i32, i32
  }
  func.func @transform_2(%arg0: i32) -> (i32, i32, i32) {
    %c0_i32 = arith.constant 0 : i32
    %c0_i32_0 = arith.constant 0 : i32
    %c0_i32_1 = arith.constant 0 : i32
    %c0_i32_2 = arith.constant 0 : i32
    return %c0_i32, %c0_i32_0, %c0_i32_1 : i32, i32, i32
  }
  func.func @transform_3(%arg0: i32) -> (i32, i32) {
    %c0_i32 = arith.constant 0 : i32
    %c0_i32_0 = arith.constant 0 : i32
    return %arg0, %c0_i32 : i32, i32
  }
  func.func @transform_4(%arg0: i32) -> (i32, i32) {
    %c0_i32 = arith.constant 0 : i32
    %c0_i32_0 = arith.constant 0 : i32
    return %arg0, %c0_i32 : i32, i32
  }
  func.func @transform_5(%arg0: i32) -> (i32, i32) {
    %c0_i32 = arith.constant 0 : i32
    %c0_i32_0 = arith.constant 0 : i32
    return %arg0, %c0_i32 : i32, i32
  }
}

module attributes {stable_mosaic.version = 11 : i64} {
  func.func @_conv_tap_kernel(%arg0: i32, %arg1: memref<32x256xf32, #tpu.memory_space<vmem>>, %arg2: memref<8x256xf32, #tpu.memory_space<vmem>>, %arg3: memref<4x256x128xf32, #tpu.memory_space<vmem>>, %arg4: memref<1x256xf32, #tpu.memory_space<vmem>>, %arg5: memref<1x256xf32, #tpu.memory_space<vmem>>, %arg6: memref<32x1xf32, #tpu.memory_space<vmem>>, %arg7: memref<32x128xf32, #tpu.memory_space<vmem>>, %arg8: memref<8x128xf32, #tpu.memory_space<vmem>>, %arg9: memref<40x256xf32, #tpu.memory_space<vmem>>) attributes {dimension_semantics = [#tpu.dimension_semantics<parallel>], iteration_bounds = array<i64: 2>, scalar_prefetch = 0 : i64, scratch_operands = 1 : i64, tpu.core_type = #tpu.core_type<tc>, window_params = [{transform_indices = @transform_0, window_bounds = array<i64: 32, 256>}, {transform_indices = @transform_1, window_bounds = array<i64: 8, 256>}, {pipeline_mode = #tpu.pipeline_mode<synchronous>, transform_indices = @transform_2, window_bounds = array<i64: 4, 256, 128>}, {pipeline_mode = #tpu.pipeline_mode<synchronous>, transform_indices = @transform_3, window_bounds = array<i64: 1, 256>}, {pipeline_mode = #tpu.pipeline_mode<synchronous>, transform_indices = @transform_4, window_bounds = array<i64: 1, 256>}, {transform_indices = @transform_5, window_bounds = array<i64: 32, 1>}, {transform_indices = @transform_6, window_bounds = array<i64: 32, 128>}, {transform_indices = @transform_7, window_bounds = array<i64: 8, 128>}]} {
    %c0 = arith.constant 0 : index
    %c0_0 = arith.constant 0 : index
    %0 = vector.load %arg4[%c0, %c0_0] : memref<1x256xf32, #tpu.memory_space<vmem>>, vector<1x256xf32>
    %c0_1 = arith.constant 0 : index
    %c0_2 = arith.constant 0 : index
    %1 = vector.load %arg5[%c0_1, %c0_2] : memref<1x256xf32, #tpu.memory_space<vmem>>, vector<1x256xf32>
    %c0_3 = arith.constant 0 : index
    %c0_4 = arith.constant 0 : index
    %2 = vector.load %arg1[%c0_3, %c0_4] : memref<32x256xf32, #tpu.memory_space<vmem>>, vector<32x256xf32>
    %3 = vector.broadcast %0 : vector<1x256xf32> to vector<32x256xf32>
    %4 = arith.mulf %2, %3 : vector<32x256xf32>
    %5 = vector.broadcast %1 : vector<1x256xf32> to vector<32x256xf32>
    %6 = arith.addf %4, %5 : vector<32x256xf32>
    %cst = arith.constant 2.000000e-01 : f32
    %7 = vector.broadcast %cst : f32 to vector<32x256xf32>
    %8 = arith.mulf %7, %6 : vector<32x256xf32>
    %9 = arith.maximumf %6, %8 : vector<32x256xf32>
    %c0_5 = arith.constant 0 : index
    %c0_6 = arith.constant 0 : index
    %10 = vector.load %arg9[%c0_5, %c0_6] : memref<40x256xf32, #tpu.memory_space<vmem>>, vector<32x256xf32>
    tpu.vector_store %arg9[%c0_5, %c0_6], %9 {strides = array<i32>} : memref<40x256xf32, #tpu.memory_space<vmem>>, vector<32x256xf32>,
    %c0_7 = arith.constant 0 : index
    %c0_8 = arith.constant 0 : index
    %11 = vector.load %arg2[%c0_7, %c0_8] : memref<8x256xf32, #tpu.memory_space<vmem>>, vector<8x256xf32>
    %12 = vector.broadcast %0 : vector<1x256xf32> to vector<8x256xf32>
    %13 = arith.mulf %11, %12 : vector<8x256xf32>
    %14 = vector.broadcast %1 : vector<1x256xf32> to vector<8x256xf32>
    %15 = arith.addf %13, %14 : vector<8x256xf32>
    %cst_9 = arith.constant 2.000000e-01 : f32
    %16 = vector.broadcast %cst_9 : f32 to vector<8x256xf32>
    %17 = arith.mulf %16, %15 : vector<8x256xf32>
    %18 = arith.maximumf %15, %17 : vector<8x256xf32>
    %c32 = arith.constant 32 : index
    %c0_10 = arith.constant 0 : index
    %19 = vector.load %arg9[%c32, %c0_10] : memref<40x256xf32, #tpu.memory_space<vmem>>, vector<8x256xf32>
    tpu.vector_store %arg9[%c32, %c0_10], %18 {strides = array<i32>} : memref<40x256xf32, #tpu.memory_space<vmem>>, vector<8x256xf32>,
    %cst_11 = arith.constant 0.000000e+00 : f32
    %20 = vector.broadcast %cst_11 : f32 to vector<1x128xf32>
    %cst_12 = arith.constant 0.000000e+00 : f32
    %21 = vector.broadcast %cst_12 : f32 to vector<1x128xf32>
    %cst_13 = arith.constant 0.000000e+00 : f32
    %22 = vector.broadcast %cst_13 : f32 to vector<32x128xf32>
    %c0_14 = arith.constant 0 : index
    %c0_15 = arith.constant 0 : index
    %23 = vector.load %arg9[%c0_14, %c0_15] : memref<40x256xf32, #tpu.memory_space<vmem>>, vector<32x256xf32>
    %c0_16 = arith.constant 0 : index
    %c0_17 = arith.constant 0 : index
    %c0_18 = arith.constant 0 : index
    %24 = vector.load %arg3[%c0_16, %c0_17, %c0_18] : memref<4x256x128xf32, #tpu.memory_space<vmem>>, vector<1x256x128xf32>
    %25 = vector.shape_cast %24 : vector<1x256x128xf32> to vector<256x128xf32>
    %cst_19 = arith.constant dense<0.000000e+00> : vector<32x128xf32>
    %26 = tpu.matmul %23, %25, %cst_19 {dimension_numbers = #tpu.dot_dimension_numbers<[1], [0], [0], [1], [0, 0, 1, 1], [], []>} : vector<32x256xf32>, vector<256x128xf32>, vector<32x128xf32> -> vector<32x128xf32>
    %27 = arith.addf %22, %26 : vector<32x128xf32>
    %c1 = arith.constant 1 : index
    %c0_20 = arith.constant 0 : index
    %28 = vector.load %arg9[%c1, %c0_20] : memref<40x256xf32, #tpu.memory_space<vmem>>, vector<32x256xf32>
    %c1_21 = arith.constant 1 : index
    %c0_22 = arith.constant 0 : index
    %c0_23 = arith.constant 0 : index
    %29 = vector.load %arg3[%c1_21, %c0_22, %c0_23] : memref<4x256x128xf32, #tpu.memory_space<vmem>>, vector<1x256x128xf32>
    %30 = vector.shape_cast %29 : vector<1x256x128xf32> to vector<256x128xf32>
    %cst_24 = arith.constant dense<0.000000e+00> : vector<32x128xf32>
    %31 = tpu.matmul %28, %30, %cst_24 {dimension_numbers = #tpu.dot_dimension_numbers<[1], [0], [0], [1], [0, 0, 1, 1], [], []>} : vector<32x256xf32>, vector<256x128xf32>, vector<32x128xf32> -> vector<32x128xf32>
    %32 = arith.addf %27, %31 : vector<32x128xf32>
    %c5 = arith.constant 5 : index
    %c0_25 = arith.constant 0 : index
    %33 = vector.load %arg9[%c5, %c0_25] : memref<40x256xf32, #tpu.memory_space<vmem>>, vector<32x256xf32>
    %c2 = arith.constant 2 : index
    %c0_26 = arith.constant 0 : index
    %c0_27 = arith.constant 0 : index
    %34 = vector.load %arg3[%c2, %c0_26, %c0_27] : memref<4x256x128xf32, #tpu.memory_space<vmem>>, vector<1x256x128xf32>
    %35 = vector.shape_cast %34 : vector<1x256x128xf32> to vector<256x128xf32>
    %cst_28 = arith.constant dense<0.000000e+00> : vector<32x128xf32>
    %36 = tpu.matmul %33, %35, %cst_28 {dimension_numbers = #tpu.dot_dimension_numbers<[1], [0], [0], [1], [0, 0, 1, 1], [], []>} : vector<32x256xf32>, vector<256x128xf32>, vector<32x128xf32> -> vector<32x128xf32>
    %37 = arith.addf %32, %36 : vector<32x128xf32>
    %c6 = arith.constant 6 : index
    %c0_29 = arith.constant 0 : index
    %38 = vector.load %arg9[%c6, %c0_29] : memref<40x256xf32, #tpu.memory_space<vmem>>, vector<32x256xf32>
    %c3 = arith.constant 3 : index
    %c0_30 = arith.constant 0 : index
    %c0_31 = arith.constant 0 : index
    %39 = vector.load %arg3[%c3, %c0_30, %c0_31] : memref<4x256x128xf32, #tpu.memory_space<vmem>>, vector<1x256x128xf32>
    %40 = vector.shape_cast %39 : vector<1x256x128xf32> to vector<256x128xf32>
    %cst_32 = arith.constant dense<0.000000e+00> : vector<32x128xf32>
    %41 = tpu.matmul %38, %40, %cst_32 {dimension_numbers = #tpu.dot_dimension_numbers<[1], [0], [0], [1], [0, 0, 1, 1], [], []>} : vector<32x256xf32>, vector<256x128xf32>, vector<32x128xf32> -> vector<32x128xf32>
    %42 = arith.addf %37, %41 : vector<32x128xf32>
    %c0_33 = arith.constant 0 : index
    %c0_34 = arith.constant 0 : index
    %43 = vector.load %arg6[%c0_33, %c0_34] : memref<32x1xf32, #tpu.memory_space<vmem>>, vector<32x1xf32>
    %44 = vector.broadcast %43 : vector<32x1xf32> to vector<32x128xf32>
    %45 = arith.mulf %42, %44 : vector<32x128xf32>
    %cst_35 = arith.constant dense<0.000000e+00> : vector<128xf32>
    %46 = vector.multi_reduction <add>, %45, %cst_35 [0] : vector<32x128xf32> to vector<128xf32>
    %47 = vector.shape_cast %46 : vector<128xf32> to vector<1x128xf32>
    %48 = arith.addf %20, %47 : vector<1x128xf32>
    %49 = arith.mulf %45, %42 : vector<32x128xf32>
    %cst_36 = arith.constant dense<0.000000e+00> : vector<128xf32>
    %50 = vector.multi_reduction <add>, %49, %cst_36 [0] : vector<32x128xf32> to vector<128xf32>
    %51 = vector.shape_cast %50 : vector<128xf32> to vector<1x128xf32>
    %52 = arith.addf %21, %51 : vector<1x128xf32>
    %c0_37 = arith.constant 0 : index
    %c0_38 = arith.constant 0 : index
    %53 = vector.load %arg7[%c0_37, %c0_38] : memref<32x128xf32, #tpu.memory_space<vmem>>, vector<32x128xf32>
    tpu.vector_store %arg7[%c0_37, %c0_38], %42 {strides = array<i32>} : memref<32x128xf32, #tpu.memory_space<vmem>>, vector<32x128xf32>,
    %c0_39 = arith.constant 0 : index
    %c0_40 = arith.constant 0 : index
    %54 = vector.load %arg8[%c0_39, %c0_40] : memref<8x128xf32, #tpu.memory_space<vmem>>, vector<1x128xf32>
    tpu.vector_store %arg8[%c0_39, %c0_40], %48 {strides = array<i32>} : memref<8x128xf32, #tpu.memory_space<vmem>>, vector<1x128xf32>,
    %c1_41 = arith.constant 1 : index
    %c0_42 = arith.constant 0 : index
    %55 = vector.load %arg8[%c1_41, %c0_42] : memref<8x128xf32, #tpu.memory_space<vmem>>, vector<1x128xf32>
    tpu.vector_store %arg8[%c1_41, %c0_42], %52 {strides = array<i32>} : memref<8x128xf32, #tpu.memory_space<vmem>>, vector<1x128xf32>,
    return
  }
  func.func @transform_0(%arg0: i32) -> (i32, i32) {
    %c0_i32 = arith.constant 0 : i32
    %c0_i32_0 = arith.constant 0 : i32
    return %arg0, %c0_i32 : i32, i32
  }
  func.func @transform_1(%arg0: i32) -> (i32, i32) {
    %c1_i32 = arith.constant 1 : i32
    %0 = arith.addi %arg0, %c1_i32 : i32
    %c4_i32 = arith.constant 4 : i32
    %1 = arith.muli %0, %c4_i32 : i32
    %c0_i32 = arith.constant 0 : i32
    %c0_i32_0 = arith.constant 0 : i32
    return %1, %c0_i32 : i32, i32
  }
  func.func @transform_2(%arg0: i32) -> (i32, i32, i32) {
    %c0_i32 = arith.constant 0 : i32
    %c0_i32_0 = arith.constant 0 : i32
    %c0_i32_1 = arith.constant 0 : i32
    %c0_i32_2 = arith.constant 0 : i32
    return %c0_i32, %c0_i32_0, %c0_i32_1 : i32, i32, i32
  }
  func.func @transform_3(%arg0: i32) -> (i32, i32) {
    %c0_i32 = arith.constant 0 : i32
    %c0_i32_0 = arith.constant 0 : i32
    %c0_i32_1 = arith.constant 0 : i32
    return %c0_i32, %c0_i32_0 : i32, i32
  }
  func.func @transform_4(%arg0: i32) -> (i32, i32) {
    %c0_i32 = arith.constant 0 : i32
    %c0_i32_0 = arith.constant 0 : i32
    %c0_i32_1 = arith.constant 0 : i32
    return %c0_i32, %c0_i32_0 : i32, i32
  }
  func.func @transform_5(%arg0: i32) -> (i32, i32) {
    %c0_i32 = arith.constant 0 : i32
    %c0_i32_0 = arith.constant 0 : i32
    return %arg0, %c0_i32 : i32, i32
  }
  func.func @transform_6(%arg0: i32) -> (i32, i32) {
    %c0_i32 = arith.constant 0 : i32
    %c0_i32_0 = arith.constant 0 : i32
    return %arg0, %c0_i32 : i32, i32
  }
  func.func @transform_7(%arg0: i32) -> (i32, i32) {
    %c0_i32 = arith.constant 0 : i32
    %c0_i32_0 = arith.constant 0 : i32
    return %arg0, %c0_i32 : i32, i32
  }
}

module attributes {stable_mosaic.version = 11 : i64} {
  func.func @_conv_tap_kernel(%arg0: i32, %arg1: memref<16x128xf32, #tpu.memory_space<vmem>>, %arg2: memref<16x128xf32, #tpu.memory_space<vmem>>, %arg3: memref<16x128x128xf32, #tpu.memory_space<vmem>>, %arg4: memref<1x128xf32, #tpu.memory_space<vmem>>, %arg5: memref<1x128xf32, #tpu.memory_space<vmem>>, %arg6: memref<16x128xf32, #tpu.memory_space<vmem>>, %arg7: memref<32x128xf32, #tpu.memory_space<vmem>>) attributes {dimension_semantics = [#tpu.dimension_semantics<parallel>], iteration_bounds = array<i64: 2>, scalar_prefetch = 0 : i64, scratch_operands = 1 : i64, tpu.core_type = #tpu.core_type<tc>, window_params = [{transform_indices = @transform_0, window_bounds = array<i64: 16, 128>}, {transform_indices = @transform_1, window_bounds = array<i64: 16, 128>}, {pipeline_mode = #tpu.pipeline_mode<synchronous>, transform_indices = @transform_2, window_bounds = array<i64: 16, 128, 128>}, {pipeline_mode = #tpu.pipeline_mode<synchronous>, transform_indices = @transform_3, window_bounds = array<i64: 1, 128>}, {pipeline_mode = #tpu.pipeline_mode<synchronous>, transform_indices = @transform_4, window_bounds = array<i64: 1, 128>}, {transform_indices = @transform_5, window_bounds = array<i64: 16, 128>}]} {
    %c0 = arith.constant 0 : index
    %c0_0 = arith.constant 0 : index
    %0 = vector.load %arg4[%c0, %c0_0] : memref<1x128xf32, #tpu.memory_space<vmem>>, vector<1x128xf32>
    %c0_1 = arith.constant 0 : index
    %c0_2 = arith.constant 0 : index
    %1 = vector.load %arg5[%c0_1, %c0_2] : memref<1x128xf32, #tpu.memory_space<vmem>>, vector<1x128xf32>
    %c0_3 = arith.constant 0 : index
    %c0_4 = arith.constant 0 : index
    %2 = vector.load %arg1[%c0_3, %c0_4] : memref<16x128xf32, #tpu.memory_space<vmem>>, vector<16x128xf32>
    %3 = vector.broadcast %0 : vector<1x128xf32> to vector<16x128xf32>
    %4 = arith.mulf %2, %3 : vector<16x128xf32>
    %5 = vector.broadcast %1 : vector<1x128xf32> to vector<16x128xf32>
    %6 = arith.addf %4, %5 : vector<16x128xf32>
    %cst = arith.constant 2.000000e-01 : f32
    %7 = vector.broadcast %cst : f32 to vector<16x128xf32>
    %8 = arith.mulf %7, %6 : vector<16x128xf32>
    %9 = arith.maximumf %6, %8 : vector<16x128xf32>
    %c0_5 = arith.constant 0 : index
    %c0_6 = arith.constant 0 : index
    %10 = vector.load %arg7[%c0_5, %c0_6] : memref<32x128xf32, #tpu.memory_space<vmem>>, vector<16x128xf32>
    tpu.vector_store %arg7[%c0_5, %c0_6], %9 {strides = array<i32>} : memref<32x128xf32, #tpu.memory_space<vmem>>, vector<16x128xf32>,
    %c0_7 = arith.constant 0 : index
    %c0_8 = arith.constant 0 : index
    %11 = vector.load %arg2[%c0_7, %c0_8] : memref<16x128xf32, #tpu.memory_space<vmem>>, vector<16x128xf32>
    %12 = vector.broadcast %0 : vector<1x128xf32> to vector<16x128xf32>
    %13 = arith.mulf %11, %12 : vector<16x128xf32>
    %14 = vector.broadcast %1 : vector<1x128xf32> to vector<16x128xf32>
    %15 = arith.addf %13, %14 : vector<16x128xf32>
    %cst_9 = arith.constant 2.000000e-01 : f32
    %16 = vector.broadcast %cst_9 : f32 to vector<16x128xf32>
    %17 = arith.mulf %16, %15 : vector<16x128xf32>
    %18 = arith.maximumf %15, %17 : vector<16x128xf32>
    %c16 = arith.constant 16 : index
    %c0_10 = arith.constant 0 : index
    %19 = vector.load %arg7[%c16, %c0_10] : memref<32x128xf32, #tpu.memory_space<vmem>>, vector<16x128xf32>
    tpu.vector_store %arg7[%c16, %c0_10], %18 {strides = array<i32>} : memref<32x128xf32, #tpu.memory_space<vmem>>, vector<16x128xf32>,
    %cst_11 = arith.constant 0.000000e+00 : f32
    %20 = vector.broadcast %cst_11 : f32 to vector<16x128xf32>
    %c0_12 = arith.constant 0 : index
    %c0_13 = arith.constant 0 : index
    %21 = vector.load %arg7[%c0_12, %c0_13] : memref<32x128xf32, #tpu.memory_space<vmem>>, vector<16x128xf32>
    %c0_14 = arith.constant 0 : index
    %c0_15 = arith.constant 0 : index
    %c0_16 = arith.constant 0 : index
    %22 = vector.load %arg3[%c0_14, %c0_15, %c0_16] : memref<16x128x128xf32, #tpu.memory_space<vmem>>, vector<1x128x128xf32>
    %23 = vector.shape_cast %22 : vector<1x128x128xf32> to vector<128x128xf32>
    %cst_17 = arith.constant dense<0.000000e+00> : vector<16x128xf32>
    %24 = tpu.matmul %21, %23, %cst_17 {dimension_numbers = #tpu.dot_dimension_numbers<[1], [0], [0], [1], [0, 0, 1, 1], [], []>} : vector<16x128xf32>, vector<128x128xf32>, vector<16x128xf32> -> vector<16x128xf32>
    %25 = arith.addf %20, %24 : vector<16x128xf32>
    %c1 = arith.constant 1 : index
    %c0_18 = arith.constant 0 : index
    %26 = vector.load %arg7[%c1, %c0_18] : memref<32x128xf32, #tpu.memory_space<vmem>>, vector<16x128xf32>
    %c1_19 = arith.constant 1 : index
    %c0_20 = arith.constant 0 : index
    %c0_21 = arith.constant 0 : index
    %27 = vector.load %arg3[%c1_19, %c0_20, %c0_21] : memref<16x128x128xf32, #tpu.memory_space<vmem>>, vector<1x128x128xf32>
    %28 = vector.shape_cast %27 : vector<1x128x128xf32> to vector<128x128xf32>
    %cst_22 = arith.constant dense<0.000000e+00> : vector<16x128xf32>
    %29 = tpu.matmul %26, %28, %cst_22 {dimension_numbers = #tpu.dot_dimension_numbers<[1], [0], [0], [1], [0, 0, 1, 1], [], []>} : vector<16x128xf32>, vector<128x128xf32>, vector<16x128xf32> -> vector<16x128xf32>
    %30 = arith.addf %25, %29 : vector<16x128xf32>
    %c2 = arith.constant 2 : index
    %c0_23 = arith.constant 0 : index
    %31 = vector.load %arg7[%c2, %c0_23] : memref<32x128xf32, #tpu.memory_space<vmem>>, vector<16x128xf32>
    %c2_24 = arith.constant 2 : index
    %c0_25 = arith.constant 0 : index
    %c0_26 = arith.constant 0 : index
    %32 = vector.load %arg3[%c2_24, %c0_25, %c0_26] : memref<16x128x128xf32, #tpu.memory_space<vmem>>, vector<1x128x128xf32>
    %33 = vector.shape_cast %32 : vector<1x128x128xf32> to vector<128x128xf32>
    %cst_27 = arith.constant dense<0.000000e+00> : vector<16x128xf32>
    %34 = tpu.matmul %31, %33, %cst_27 {dimension_numbers = #tpu.dot_dimension_numbers<[1], [0], [0], [1], [0, 0, 1, 1], [], []>} : vector<16x128xf32>, vector<128x128xf32>, vector<16x128xf32> -> vector<16x128xf32>
    %35 = arith.addf %30, %34 : vector<16x128xf32>
    %c3 = arith.constant 3 : index
    %c0_28 = arith.constant 0 : index
    %36 = vector.load %arg7[%c3, %c0_28] : memref<32x128xf32, #tpu.memory_space<vmem>>, vector<16x128xf32>
    %c3_29 = arith.constant 3 : index
    %c0_30 = arith.constant 0 : index
    %c0_31 = arith.constant 0 : index
    %37 = vector.load %arg3[%c3_29, %c0_30, %c0_31] : memref<16x128x128xf32, #tpu.memory_space<vmem>>, vector<1x128x128xf32>
    %38 = vector.shape_cast %37 : vector<1x128x128xf32> to vector<128x128xf32>
    %cst_32 = arith.constant dense<0.000000e+00> : vector<16x128xf32>
    %39 = tpu.matmul %36, %38, %cst_32 {dimension_numbers = #tpu.dot_dimension_numbers<[1], [0], [0], [1], [0, 0, 1, 1], [], []>} : vector<16x128xf32>, vector<128x128xf32>, vector<16x128xf32> -> vector<16x128xf32>
    %40 = arith.addf %35, %39 : vector<16x128xf32>
    %c4 = arith.constant 4 : index
    %c0_33 = arith.constant 0 : index
    %41 = vector.load %arg7[%c4, %c0_33] : memref<32x128xf32, #tpu.memory_space<vmem>>, vector<16x128xf32>
    %c4_34 = arith.constant 4 : index
    %c0_35 = arith.constant 0 : index
    %c0_36 = arith.constant 0 : index
    %42 = vector.load %arg3[%c4_34, %c0_35, %c0_36] : memref<16x128x128xf32, #tpu.memory_space<vmem>>, vector<1x128x128xf32>
    %43 = vector.shape_cast %42 : vector<1x128x128xf32> to vector<128x128xf32>
    %cst_37 = arith.constant dense<0.000000e+00> : vector<16x128xf32>
    %44 = tpu.matmul %41, %43, %cst_37 {dimension_numbers = #tpu.dot_dimension_numbers<[1], [0], [0], [1], [0, 0, 1, 1], [], []>} : vector<16x128xf32>, vector<128x128xf32>, vector<16x128xf32> -> vector<16x128xf32>
    %45 = arith.addf %40, %44 : vector<16x128xf32>
    %c5 = arith.constant 5 : index
    %c0_38 = arith.constant 0 : index
    %46 = vector.load %arg7[%c5, %c0_38] : memref<32x128xf32, #tpu.memory_space<vmem>>, vector<16x128xf32>
    %c5_39 = arith.constant 5 : index
    %c0_40 = arith.constant 0 : index
    %c0_41 = arith.constant 0 : index
    %47 = vector.load %arg3[%c5_39, %c0_40, %c0_41] : memref<16x128x128xf32, #tpu.memory_space<vmem>>, vector<1x128x128xf32>
    %48 = vector.shape_cast %47 : vector<1x128x128xf32> to vector<128x128xf32>
    %cst_42 = arith.constant dense<0.000000e+00> : vector<16x128xf32>
    %49 = tpu.matmul %46, %48, %cst_42 {dimension_numbers = #tpu.dot_dimension_numbers<[1], [0], [0], [1], [0, 0, 1, 1], [], []>} : vector<16x128xf32>, vector<128x128xf32>, vector<16x128xf32> -> vector<16x128xf32>
    %50 = arith.addf %45, %49 : vector<16x128xf32>
    %c6 = arith.constant 6 : index
    %c0_43 = arith.constant 0 : index
    %51 = vector.load %arg7[%c6, %c0_43] : memref<32x128xf32, #tpu.memory_space<vmem>>, vector<16x128xf32>
    %c6_44 = arith.constant 6 : index
    %c0_45 = arith.constant 0 : index
    %c0_46 = arith.constant 0 : index
    %52 = vector.load %arg3[%c6_44, %c0_45, %c0_46] : memref<16x128x128xf32, #tpu.memory_space<vmem>>, vector<1x128x128xf32>
    %53 = vector.shape_cast %52 : vector<1x128x128xf32> to vector<128x128xf32>
    %cst_47 = arith.constant dense<0.000000e+00> : vector<16x128xf32>
    %54 = tpu.matmul %51, %53, %cst_47 {dimension_numbers = #tpu.dot_dimension_numbers<[1], [0], [0], [1], [0, 0, 1, 1], [], []>} : vector<16x128xf32>, vector<128x128xf32>, vector<16x128xf32> -> vector<16x128xf32>
    %55 = arith.addf %50, %54 : vector<16x128xf32>
    %c7 = arith.constant 7 : index
    %c0_48 = arith.constant 0 : index
    %56 = vector.load %arg7[%c7, %c0_48] : memref<32x128xf32, #tpu.memory_space<vmem>>, vector<16x128xf32>
    %c7_49 = arith.constant 7 : index
    %c0_50 = arith.constant 0 : index
    %c0_51 = arith.constant 0 : index
    %57 = vector.load %arg3[%c7_49, %c0_50, %c0_51] : memref<16x128x128xf32, #tpu.memory_space<vmem>>, vector<1x128x128xf32>
    %58 = vector.shape_cast %57 : vector<1x128x128xf32> to vector<128x128xf32>
    %cst_52 = arith.constant dense<0.000000e+00> : vector<16x128xf32>
    %59 = tpu.matmul %56, %58, %cst_52 {dimension_numbers = #tpu.dot_dimension_numbers<[1], [0], [0], [1], [0, 0, 1, 1], [], []>} : vector<16x128xf32>, vector<128x128xf32>, vector<16x128xf32> -> vector<16x128xf32>
    %60 = arith.addf %55, %59 : vector<16x128xf32>
    %c8 = arith.constant 8 : index
    %c0_53 = arith.constant 0 : index
    %61 = vector.load %arg7[%c8, %c0_53] : memref<32x128xf32, #tpu.memory_space<vmem>>, vector<16x128xf32>
    %c8_54 = arith.constant 8 : index
    %c0_55 = arith.constant 0 : index
    %c0_56 = arith.constant 0 : index
    %62 = vector.load %arg3[%c8_54, %c0_55, %c0_56] : memref<16x128x128xf32, #tpu.memory_space<vmem>>, vector<1x128x128xf32>
    %63 = vector.shape_cast %62 : vector<1x128x128xf32> to vector<128x128xf32>
    %cst_57 = arith.constant dense<0.000000e+00> : vector<16x128xf32>
    %64 = tpu.matmul %61, %63, %cst_57 {dimension_numbers = #tpu.dot_dimension_numbers<[1], [0], [0], [1], [0, 0, 1, 1], [], []>} : vector<16x128xf32>, vector<128x128xf32>, vector<16x128xf32> -> vector<16x128xf32>
    %65 = arith.addf %60, %64 : vector<16x128xf32>
    %c9 = arith.constant 9 : index
    %c0_58 = arith.constant 0 : index
    %66 = vector.load %arg7[%c9, %c0_58] : memref<32x128xf32, #tpu.memory_space<vmem>>, vector<16x128xf32>
    %c9_59 = arith.constant 9 : index
    %c0_60 = arith.constant 0 : index
    %c0_61 = arith.constant 0 : index
    %67 = vector.load %arg3[%c9_59, %c0_60, %c0_61] : memref<16x128x128xf32, #tpu.memory_space<vmem>>, vector<1x128x128xf32>
    %68 = vector.shape_cast %67 : vector<1x128x128xf32> to vector<128x128xf32>
    %cst_62 = arith.constant dense<0.000000e+00> : vector<16x128xf32>
    %69 = tpu.matmul %66, %68, %cst_62 {dimension_numbers = #tpu.dot_dimension_numbers<[1], [0], [0], [1], [0, 0, 1, 1], [], []>} : vector<16x128xf32>, vector<128x128xf32>, vector<16x128xf32> -> vector<16x128xf32>
    %70 = arith.addf %65, %69 : vector<16x128xf32>
    %c10 = arith.constant 10 : index
    %c0_63 = arith.constant 0 : index
    %71 = vector.load %arg7[%c10, %c0_63] : memref<32x128xf32, #tpu.memory_space<vmem>>, vector<16x128xf32>
    %c10_64 = arith.constant 10 : index
    %c0_65 = arith.constant 0 : index
    %c0_66 = arith.constant 0 : index
    %72 = vector.load %arg3[%c10_64, %c0_65, %c0_66] : memref<16x128x128xf32, #tpu.memory_space<vmem>>, vector<1x128x128xf32>
    %73 = vector.shape_cast %72 : vector<1x128x128xf32> to vector<128x128xf32>
    %cst_67 = arith.constant dense<0.000000e+00> : vector<16x128xf32>
    %74 = tpu.matmul %71, %73, %cst_67 {dimension_numbers = #tpu.dot_dimension_numbers<[1], [0], [0], [1], [0, 0, 1, 1], [], []>} : vector<16x128xf32>, vector<128x128xf32>, vector<16x128xf32> -> vector<16x128xf32>
    %75 = arith.addf %70, %74 : vector<16x128xf32>
    %c11 = arith.constant 11 : index
    %c0_68 = arith.constant 0 : index
    %76 = vector.load %arg7[%c11, %c0_68] : memref<32x128xf32, #tpu.memory_space<vmem>>, vector<16x128xf32>
    %c11_69 = arith.constant 11 : index
    %c0_70 = arith.constant 0 : index
    %c0_71 = arith.constant 0 : index
    %77 = vector.load %arg3[%c11_69, %c0_70, %c0_71] : memref<16x128x128xf32, #tpu.memory_space<vmem>>, vector<1x128x128xf32>
    %78 = vector.shape_cast %77 : vector<1x128x128xf32> to vector<128x128xf32>
    %cst_72 = arith.constant dense<0.000000e+00> : vector<16x128xf32>
    %79 = tpu.matmul %76, %78, %cst_72 {dimension_numbers = #tpu.dot_dimension_numbers<[1], [0], [0], [1], [0, 0, 1, 1], [], []>} : vector<16x128xf32>, vector<128x128xf32>, vector<16x128xf32> -> vector<16x128xf32>
    %80 = arith.addf %75, %79 : vector<16x128xf32>
    %c12 = arith.constant 12 : index
    %c0_73 = arith.constant 0 : index
    %81 = vector.load %arg7[%c12, %c0_73] : memref<32x128xf32, #tpu.memory_space<vmem>>, vector<16x128xf32>
    %c12_74 = arith.constant 12 : index
    %c0_75 = arith.constant 0 : index
    %c0_76 = arith.constant 0 : index
    %82 = vector.load %arg3[%c12_74, %c0_75, %c0_76] : memref<16x128x128xf32, #tpu.memory_space<vmem>>, vector<1x128x128xf32>
    %83 = vector.shape_cast %82 : vector<1x128x128xf32> to vector<128x128xf32>
    %cst_77 = arith.constant dense<0.000000e+00> : vector<16x128xf32>
    %84 = tpu.matmul %81, %83, %cst_77 {dimension_numbers = #tpu.dot_dimension_numbers<[1], [0], [0], [1], [0, 0, 1, 1], [], []>} : vector<16x128xf32>, vector<128x128xf32>, vector<16x128xf32> -> vector<16x128xf32>
    %85 = arith.addf %80, %84 : vector<16x128xf32>
    %c13 = arith.constant 13 : index
    %c0_78 = arith.constant 0 : index
    %86 = vector.load %arg7[%c13, %c0_78] : memref<32x128xf32, #tpu.memory_space<vmem>>, vector<16x128xf32>
    %c13_79 = arith.constant 13 : index
    %c0_80 = arith.constant 0 : index
    %c0_81 = arith.constant 0 : index
    %87 = vector.load %arg3[%c13_79, %c0_80, %c0_81] : memref<16x128x128xf32, #tpu.memory_space<vmem>>, vector<1x128x128xf32>
    %88 = vector.shape_cast %87 : vector<1x128x128xf32> to vector<128x128xf32>
    %cst_82 = arith.constant dense<0.000000e+00> : vector<16x128xf32>
    %89 = tpu.matmul %86, %88, %cst_82 {dimension_numbers = #tpu.dot_dimension_numbers<[1], [0], [0], [1], [0, 0, 1, 1], [], []>} : vector<16x128xf32>, vector<128x128xf32>, vector<16x128xf32> -> vector<16x128xf32>
    %90 = arith.addf %85, %89 : vector<16x128xf32>
    %c14 = arith.constant 14 : index
    %c0_83 = arith.constant 0 : index
    %91 = vector.load %arg7[%c14, %c0_83] : memref<32x128xf32, #tpu.memory_space<vmem>>, vector<16x128xf32>
    %c14_84 = arith.constant 14 : index
    %c0_85 = arith.constant 0 : index
    %c0_86 = arith.constant 0 : index
    %92 = vector.load %arg3[%c14_84, %c0_85, %c0_86] : memref<16x128x128xf32, #tpu.memory_space<vmem>>, vector<1x128x128xf32>
    %93 = vector.shape_cast %92 : vector<1x128x128xf32> to vector<128x128xf32>
    %cst_87 = arith.constant dense<0.000000e+00> : vector<16x128xf32>
    %94 = tpu.matmul %91, %93, %cst_87 {dimension_numbers = #tpu.dot_dimension_numbers<[1], [0], [0], [1], [0, 0, 1, 1], [], []>} : vector<16x128xf32>, vector<128x128xf32>, vector<16x128xf32> -> vector<16x128xf32>
    %95 = arith.addf %90, %94 : vector<16x128xf32>
    %c15 = arith.constant 15 : index
    %c0_88 = arith.constant 0 : index
    %96 = vector.load %arg7[%c15, %c0_88] : memref<32x128xf32, #tpu.memory_space<vmem>>, vector<16x128xf32>
    %c15_89 = arith.constant 15 : index
    %c0_90 = arith.constant 0 : index
    %c0_91 = arith.constant 0 : index
    %97 = vector.load %arg3[%c15_89, %c0_90, %c0_91] : memref<16x128x128xf32, #tpu.memory_space<vmem>>, vector<1x128x128xf32>
    %98 = vector.shape_cast %97 : vector<1x128x128xf32> to vector<128x128xf32>
    %cst_92 = arith.constant dense<0.000000e+00> : vector<16x128xf32>
    %99 = tpu.matmul %96, %98, %cst_92 {dimension_numbers = #tpu.dot_dimension_numbers<[1], [0], [0], [1], [0, 0, 1, 1], [], []>} : vector<16x128xf32>, vector<128x128xf32>, vector<16x128xf32> -> vector<16x128xf32>
    %100 = arith.addf %95, %99 : vector<16x128xf32>
    %cst_93 = arith.constant 0.000000e+00 : f32
    %101 = vector.broadcast %cst_93 : f32 to vector<16x128xf32>
    %102 = arith.subf %101, %100 : vector<16x128xf32>
    %103 = math.exp %102 : vector<16x128xf32>
    %cst_94 = arith.constant 1.000000e+00 : f32
    %104 = vector.broadcast %cst_94 : f32 to vector<16x128xf32>
    %105 = arith.addf %104, %103 : vector<16x128xf32>
    %cst_95 = arith.constant 1.000000e+00 : f32
    %106 = vector.broadcast %cst_95 : f32 to vector<16x128xf32>
    %107 = arith.divf %106, %105 : vector<16x128xf32>
    %c0_96 = arith.constant 0 : index
    %c0_97 = arith.constant 0 : index
    %108 = vector.load %arg6[%c0_96, %c0_97] : memref<16x128xf32, #tpu.memory_space<vmem>>, vector<16x128xf32>
    tpu.vector_store %arg6[%c0_96, %c0_97], %107 {strides = array<i32>} : memref<16x128xf32, #tpu.memory_space<vmem>>, vector<16x128xf32>,
    return
  }
  func.func @transform_0(%arg0: i32) -> (i32, i32) {
    %c0_i32 = arith.constant 0 : i32
    %c0_i32_0 = arith.constant 0 : i32
    return %arg0, %c0_i32 : i32, i32
  }
  func.func @transform_1(%arg0: i32) -> (i32, i32) {
    %c1_i32 = arith.constant 1 : i32
    %0 = arith.addi %arg0, %c1_i32 : i32
    %c1_i32_0 = arith.constant 1 : i32
    %1 = arith.muli %0, %c1_i32_0 : i32
    %c0_i32 = arith.constant 0 : i32
    %c0_i32_1 = arith.constant 0 : i32
    return %1, %c0_i32 : i32, i32
  }
  func.func @transform_2(%arg0: i32) -> (i32, i32, i32) {
    %c0_i32 = arith.constant 0 : i32
    %c0_i32_0 = arith.constant 0 : i32
    %c0_i32_1 = arith.constant 0 : i32
    %c0_i32_2 = arith.constant 0 : i32
    return %c0_i32, %c0_i32_0, %c0_i32_1 : i32, i32, i32
  }
  func.func @transform_3(%arg0: i32) -> (i32, i32) {
    %c0_i32 = arith.constant 0 : i32
    %c0_i32_0 = arith.constant 0 : i32
    %c0_i32_1 = arith.constant 0 : i32
    return %c0_i32, %c0_i32_0 : i32, i32
  }
  func.func @transform_4(%arg0: i32) -> (i32, i32) {
    %c0_i32 = arith.constant 0 : i32
    %c0_i32_0 = arith.constant 0 : i32
    %c0_i32_1 = arith.constant 0 : i32
    return %c0_i32, %c0_i32_0 : i32, i32
  }
  func.func @transform_5(%arg0: i32) -> (i32, i32) {
    %c0_i32 = arith.constant 0 : i32
    %c0_i32_0 = arith.constant 0 : i32
    return %arg0, %c0_i32 : i32, i32
  }
}

</mosaic_0001>

<bundles_post_ra>
// kernel: discriminator_forward.4
= control target key start
LH: loop header
LB: loop body
LE: loop exit
PB: predicated region body
PF: predicated region fallthrough
CT: control target
= control target key end

     0   :  { %s2671_s12 = smov 0   ;;  %s2914_s0 = inlined_call_operand.vmem [shape: f32[312,16], index: 0, kind: input, shape index: {}, may-alias: {0,1}]   ;;  %s2915_s1 = inlined_call_operand.vmem [shape: f32[312,16], index: 1, kind: input, shape index: {}, may-alias: {0,1}]   ;;  %s2916_s2 = inlined_call_operand.vmem [shape: f32[9,16,32], index: 2, kind: input, shape index: {}]   ;;  %s2917_s3 = inlined_call_operand.vmem [shape: f32[288,32], index: 3, kind: output, shape index: {}]  }
   0x1 LB: > { %s2033_s13 = sadd.s32 4294967295, %s2649_s12   ;;  %p2039_p0 = scmp.ge.s32.totalorder %s2649_s12, 1  ;;  %s2649_s12 = sphi %s2671_s12, %s13_s12  }
   0x2   : > { %p165_p1 = scmp.lt.s32.totalorder %s2649_s12, 4 }
   0x4   : > { %p166_p2 = pnand %p2039_p0, %p165_p1 }
   0x5   : > { %v2045_v0 = vld [vmem:[%s2916_s2 + $0x10] sm:$0xff] (!%p166_p2)  ;;  %v2046_v1 = vld [vmem:[%s2916_s2 + $0x18] sm:$0xff] (!%p166_p2)  ;;  %v2099_v2 = vld [vmem:[%s2916_s2 + $0x40] sm:$0xff] (!%p166_p2)  ;;  %s2688_s20 = smul.u32 (!%p166_p2), 12, %s2033_s13  ;;  %s214_s21 = sadd.s32 (!%p166_p2), 1, %s2033_s13  ;;  %vm242_vm0 = vcmask (!%p166_p2), 130048  }
   0x6   : > { %169 = sbr.rel (%p166_p2) target bundleno = 352 (0x160), region = 32  ;;  %v2501_v3 = vpack.c.bf16 (!%p166_p2), %v2046_v1, %v2045_v0  ;;  %v2100_v4 = vld [vmem:[%s2916_s2 + $0x48] sm:$0xff] (!%p166_p2)  ;;  %v273_v5 = vld [vmem:[%s2916_s2] sm:$0xff] (!%p166_p2)  ;;  %v2113_v9 = vld [vmem:[%s2916_s2 + $0x50] sm:$0xff] (!%p166_p2)  ;;  %vm1952_vm1 = vcmask (!%p166_p2), 261120  }
   0x7   : > { %v274_v6 = vld [vmem:[%s2916_s2 + $0x8] sm:$0xff] (!%p166_p2)  ;;  %s2042_s28 = smul.u32 (!%p166_p2), 12, %s214_s21  ;;  %v2699_v7 = vpack.c.bf16 (!%p166_p2), %v2100_v4, %v2099_v2  ;;  %p205_p3 = scmp.lt.s32.totalorder (!%p166_p2), %s2688_s20, 38  ;;  %v2114_v10 = vld [vmem:[%s2916_s2 + $0x58] sm:$0xff] (!%p166_p2)  ;;  %v2127_v27 = vld [vmem:[%s2916_s2 + $0x60] sm:$0xff] (!%p166_p2) }
   0x8   : > { %v2702_v8 = vpack.c.bf16 (!%p166_p2), %v274_v6, %v273_v5  ;;  %2502 = vmatprep.subr.bf16.mxu1 (!%p166_p2), %v2501_v3  ;;  %v2521_v11 = vpack.c.bf16 (!%p166_p2), %v2114_v10, %v2113_v9  ;;  %v2128_v28 = vld [vmem:[%s2916_s2 + $0x68] sm:$0xff] (!%p166_p2)  ;;  %v2071_v29 = vld [vmem:[%s2916_s2 + $0x20] sm:$0xff] (!%p166_p2)  ;;  %v2141_v47 = vld [vmem:[%s2916_s2 + $0x70] sm:$0xff] (!%p166_p2)  ;;  %p225_p5 = scmp.lt.s32.totalorder (!%p166_p2), %s2688_s20, 35 }
   0x9   : > { %p217_p4 = scmp.lt.s32.totalorder (!%p166_p2), %s2042_s28, 38  ;;  %2518 = vmatprep.subr.bf16.mxu0 (!%p166_p2), %v2699_v7  ;;  %2504 = vmatpush3.bf16.msra.mxu1 (!%p166_p2), %v2501_v3  ;;  %v2072_v30 = vld [vmem:[%s2916_s2 + $0x28] sm:$0xff] (!%p166_p2)  ;;  %v2525_v37 = vpack.c.bf16 (!%p166_p2), %v2128_v28, %v2127_v27  ;;  %v2142_v48 = vld [vmem:[%s2916_s2 + $0x78] sm:$0xff] (!%p166_p2)  ;;  %v2085_v62 = vld [vmem:[%s2916_s2 + $0x30] sm:$0xff] (!%p166_p2) }
   0xa   : > { %2520 = vmatpush3.bf16.msra.mxu0 (!%p166_p2), %v2699_v7  ;;  %2506 = vmatprep.subr.bf16.mxu1 (!%p166_p2), %v2702_v8  ;;  %v2749_v38 = vpack.c.bf16 (!%p166_p2), %v2072_v30, %v2071_v29  ;;  %v2529_v52 = vpack.c.bf16 (!%p166_p2), %v2142_v48, %v2141_v47  ;;  %v2086_v63 = vld [vmem:[%s2916_s2 + $0x38] sm:$0xff] (!%p166_p2) }
   0xb   : > { %2522 = vmatprep.subr.bf16.mxu0 (!%p166_p2), %v2521_v11  ;;  %v2513_v3 = vpack.c.bf16 (!%p166_p2), %v2086_v63, %v2085_v62 }
   0xd   : > { %s206_s6 = scalar_select %p205_p3, %s2688_s20, 38 }
   0xe   : > { %s2919_s28 = smov (!%p217_p4, %s2042_s28), 38  ;;  %s2921_s20 = smov (!%p225_p5, %s2688_s20), 35 }
   0xf   : > { %s2040_s7 = sshll.u32 %s206_s6, 3  ;;  %s2043_s11 = sshll.u32 %s2919_s28, 3 }
  0x10   : > { %s208_s10 = scalar_lea.vmem %s2914_s0, %s2040_s7  ;;  %s220_s15 = scalar_lea.vmem %s2915_s1, %s2043_s11 }
  0x11   : > { %v230_v12 = vld [vmem:[%s208_s10] sm:$0xff]  ;;  %v231_v13 = vld [vmem:[%s208_s10 + $0x8] sm:$0xff]  ;;  %v232_v14 = vld [vmem:[%s208_s10 + $0x10] sm:$0xff] }
  0x12   : > { %243 = vst.msk [vmem:[#allocation2] sm:$0xff] %vm242_vm0, %v230_v12  ;;  %244 = vst.msk [vmem:[#allocation2 + $0x8] sm:$0xff] %vm242_vm0, %v231_v13  ;;  %v233_v15 = vld [vmem:[%s208_s10 + $0x18] sm:$0xff]  ;;  %v234_v16 = vld [vmem:[%s208_s10 + $0x20] sm:$0xff] }
  0x13   : > { %245 = vst.msk [vmem:[#allocation2 + $0x10] sm:$0xff] %vm242_vm0, %v232_v14  ;;  %v235_v17 = vld [vmem:[%s208_s10 + $0x28] sm:$0xff]  ;;  %246 = vst.msk [vmem:[#allocation2 + $0x18] sm:$0xff] %vm242_vm0, %v233_v15  ;;  %v236_v18 = vld [vmem:[%s208_s10 + $0x30] sm:$0xff] }
  0x14   : > { %247 = vst.msk [vmem:[#allocation2 + $0x20] sm:$0xff] %vm242_vm0, %v234_v16  ;;  %248 = vst.msk [vmem:[#allocation2 + $0x28] sm:$0xff] %vm242_vm0, %v235_v17  ;;  %v237_v19 = vld [vmem:[%s208_s10 + $0x38] sm:$0xff]  ;;  %v238_v20 = vld [vmem:[%s208_s10 + $0x40] sm:$0xff] }
  0x15   : > { %249 = vst.msk [vmem:[#allocation2 + $0x30] sm:$0xff] %vm242_vm0, %v236_v18  ;;  %250 = vst.msk [vmem:[#allocation2 + $0x38] sm:$0xff] %vm242_vm0, %v237_v19  ;;  %v239_v21 = vld [vmem:[%s208_s10 + $0x48] sm:$0xff]  ;;  %v240_v22 = vld [vmem:[%s208_s10 + $0x50] sm:$0xff] }
  0x16   : > { %251 = vst.msk [vmem:[#allocation2 + $0x40] sm:$0xff] %vm242_vm0, %v238_v20  ;;  %v241_v23 = vld [vmem:[%s208_s10 + $0x58] sm:$0xff]  ;;  %252 = vst.msk [vmem:[#allocation2 + $0x48] sm:$0xff] %vm242_vm0, %v239_v21  ;;  %v255_v24 = vld [vmem:[%s220_s15] sm:$0xff]  ;;  %s2044_s10 = sshll.u32 %s2921_s20, 3 }
  0x17   : > { %253 = vst.msk [vmem:[#allocation2 + $0x50] sm:$0xff] %vm242_vm0, %v240_v22  ;;  %254 = vst.msk [vmem:[#allocation2 + $0x58] sm:$0xff] %vm242_vm0, %v241_v23  ;;  %v256_v25 = vld [vmem:[%s220_s15 + $0x8] sm:$0xff]  ;;  %v257_v26 = vld [vmem:[%s220_s15 + $0x10] sm:$0xff]  ;;  %s2885_s14 = scalar_lea.vmem %s2917_s3, %s2044_s10 }
  0x18   : > { %258 = vst.msk [vmem:[#allocation2 + $0x60] sm:$0xff] %vm242_vm0, %v255_v24  ;;  %259 = vst.msk [vmem:[#allocation2 + $0x68] sm:$0xff] %vm242_vm0, %v256_v25  ;;  %v2155_v13 = vld [vmem:[%s2916_s2 + $0x80] sm:$0xff]  ;;  %v2156_v14 = vld [vmem:[%s2916_s2 + $0x88] sm:$0xff] }
  0x19   : > { %260 = vst.msk [vmem:[#allocation2 + $0x70] sm:$0xff] %vm242_vm0, %v257_v26  ;;  %v275_v31 = vld [vmem:[#allocation2 + $0x1] sm:$0xff]  ;;  %v2533_v17 = vpack.c.bf16 %v2156_v14, %v2155_v13 }
  0x1a   : > { %v988_v32 = vld [vmem:[#allocation2 + $0xb] sm:$0xff]  ;;  %2307 = vmatprep.mubr.msk.f32.mxu1 %vm242_vm0, %v275_v31  ;;  %v989_v34 = vld [vmem:[#allocation2 + $0x13] sm:$0xff]  ;;  %v261_v60 = vld [vmem:[#allocation2] sm:$0xff] }
  0x1b   : > { %v276_v33 = vld [vmem:[#allocation2 + $0x9] sm:$0xff]  ;;  %2395 = vmatprep.mubr.msk.f32.mxu0 %vm242_vm0, %v988_v32  ;;  %v277_v35 = vld [vmem:[#allocation2 + $0x11] sm:$0xff]  ;;  %v990_v36 = vld [vmem:[#allocation2 + $0x1b] sm:$0xff] }
  0x1c   : > { %2308 = vmatmul.mubr.msk.f32.vlgmr.msra.gmra.mrb[0].mxu1 %vm242_vm0, %v276_v33  ;;  %2396 = vmatmul.mubr.msk.f32.vlgmr.msra.gmra.mrb[0].mxu0 %vm242_vm0, %v989_v34  ;;  %v278_v39 = vld [vmem:[#allocation2 + $0x19] sm:$0xff]  ;;  %v991_v40 = vld [vmem:[#allocation2 + $0x23] sm:$0xff]  ;;  %v992_v42 = vld [vmem:[#allocation2 + $0x2b] sm:$0xff] }
  0x1d   : > { %2508 = vmatpush3.bf16.msra.mxu1 %v2702_v8  ;;  %2524 = vmatpush3.bf16.msra.mxu0 %v2521_v11  ;;  %v279_v41 = vld [vmem:[#allocation2 + $0x21] sm:$0xff]  ;;  %v280_v43 = vld [vmem:[#allocation2 + $0x29] sm:$0xff]  ;;  %v993_v44 = vld [vmem:[#allocation2 + $0x33] sm:$0xff] }
  0x1e   : > { %2310 = vmatprep.mubr.msk.f32.mxu1 %vm242_vm0, %v277_v35  ;;  %2398 = vmatprep.mubr.msk.f32.mxu0 %vm242_vm0, %v990_v36  ;;  %v281_v45 = vld [vmem:[#allocation2 + $0x31] sm:$0xff]  ;;  %v282_v49 = vld [vmem:[#allocation2 + $0x39] sm:$0xff]  ;;  %v283_v51 = vld [vmem:[#allocation2 + $0x41] sm:$0xff] }
  0x1f   : > { %2526 = vmatprep.subr.bf16.mxu0 %v2525_v37  ;;  %2510 = vmatprep.subr.bf16.mxu1 %v2749_v38  ;;  %v1176_v46 = vld [vmem:[#allocation2 + $0xc] sm:$0xff]  ;;  %v1177_v50 = vld [vmem:[#allocation2 + $0x14] sm:$0xff]  ;;  %v1178_v53 = vld [vmem:[#allocation2 + $0x1c] sm:$0xff] }
  0x20   : > { %2311 = vmatmul.mubr.msk.f32.gmra.mrb[2].mxu1 %vm242_vm0, %v278_v39  ;;  %2399 = vmatmul.mubr.msk.f32.gmra.mrb[2].mxu0 %vm242_vm0, %v991_v40  ;;  %v284_v54 = vld [vmem:[#allocation2 + $0x49] sm:$0xff]  ;;  %v285_v56 = vld [vmem:[#allocation2 + $0x51] sm:$0xff]  ;;  %v286_v58 = vld [vmem:[#allocation2 + $0x59] sm:$0xff] }
  0x21   : > { %2313 = vmatprep.mubr.msk.f32.mxu1 %vm242_vm0, %v279_v41  ;;  %2401 = vmatprep.mubr.msk.f32.mxu0 %vm242_vm0, %v992_v42  ;;  %v1179_v55 = vld [vmem:[#allocation2 + $0x24] sm:$0xff]  ;;  %v1180_v57 = vld [vmem:[#allocation2 + $0x2c] sm:$0xff]  ;;  %v1181_v59 = vld [vmem:[#allocation2 + $0x34] sm:$0xff] }
  0x22   : > { %v1182_v61 = vld [vmem:[#allocation2 + $0x3c] sm:$0xff]  ;;  %v262_v0 = vld [vmem:[#allocation2 + $0x8] sm:$0xff]  ;;  %v263_v2 = vld [vmem:[#allocation2 + $0x10] sm:$0xff] }
  0x23   : > { %v1183_v1 = vld [vmem:[#allocation2 + $0x44] sm:$0xff]  ;;  %v1184_v4 = vld [vmem:[#allocation2 + $0x4c] sm:$0xff]  ;;  %v264_v5 = vld [vmem:[#allocation2 + $0x18] sm:$0xff] }
  0x24   : > { %2314 = vmatmul.mubr.msk.f32.gmra.mrb[4].mxu1 %vm242_vm0, %v280_v43  ;;  %2402 = vmatmul.mubr.msk.f32.gmra.mrb[4].mxu0 %vm242_vm0, %v993_v44  ;;  %v1185_v6 = vld [vmem:[#allocation2 + $0x54] sm:$0xff]  ;;  %v265_v8 = vld [vmem:[#allocation2 + $0x20] sm:$0xff]  ;;  %v266_v10 = vld [vmem:[#allocation2 + $0x28] sm:$0xff] }
  0x25   : > { %2316 = vmatprep.mubr.msk.f32.mxu1 %vm242_vm0, %v281_v45  ;;  %2417 = vmatprep.mubr.msk.f32.mxu0 %vm242_vm0, %v1176_v46  ;;  %v1186_v9 = vld [vmem:[#allocation2 + $0x5c] sm:$0xff]  ;;  %v1187_v11 = vld [vmem:[#allocation2 + $0x64] sm:$0xff]  ;;  %v267_v12 = vld [vmem:[#allocation2 + $0x30] sm:$0xff] }
  0x26   : > { %v268_v15 = vld [vmem:[#allocation2 + $0x38] sm:$0xff]  ;;  %v269_v16 = vld [vmem:[#allocation2 + $0x40] sm:$0xff]  ;;  %v270_v18 = vld [vmem:[#allocation2 + $0x48] sm:$0xff] }
  0x27   : > { %v271_v19 = vld [vmem:[#allocation2 + $0x50] sm:$0xff]  ;;  %v272_v20 = vld [vmem:[#allocation2 + $0x58] sm:$0xff]  ;;  %v612_v21 = vld [vmem:[#allocation2 + $0x2] sm:$0xff] }
  0x28   : > { %2317 = vmatmul.mubr.msk.f32.gmra.mrb[6].mxu1 %vm242_vm0, %v282_v49  ;;  %2418 = vmatmul.mubr.msk.f32.vlgmr.msra.gmra.mrb[0].mxu0 %vm242_vm0, %v1177_v50  ;;  %v613_v22 = vld [vmem:[#allocation2 + $0xa] sm:$0xff]  ;;  %v614_v23 = vld [vmem:[#allocation2 + $0x12] sm:$0xff]  ;;  %v615_v24 = vld [vmem:[#allocation2 + $0x1a] sm:$0xff] }
  0x29   : > { %2528 = vmatpush3.bf16.msra.mxu0 %v2525_v37  ;;  %2319 = vmatprep.mubr.msk.f32.mxu1 %vm242_vm0, %v283_v51  ;;  %v616_v25 = vld [vmem:[#allocation2 + $0x22] sm:$0xff]  ;;  %v617_v26 = vld [vmem:[#allocation2 + $0x2a] sm:$0xff]  ;;  %v618_v28 = vld [vmem:[#allocation2 + $0x32] sm:$0xff] }
  0x2a   : > { %2420 = vmatprep.mubr.msk.f32.mxu0 %vm242_vm0, %v1178_v53  ;;  %2530 = vmatprep.subr.bf16.mxu0 %v2529_v52  ;;  %v1375_v27 = vld [vmem:[#allocation2 + $0x6c] sm:$0xff]  ;;  %v1552_v29 = vld [vmem:[#allocation2 + $0x15] sm:$0xff]  ;;  %v1553_v31 = vld [vmem:[#allocation2 + $0x1d] sm:$0xff] }
  0x2b   : > { %v619_v30 = vld [vmem:[#allocation2 + $0x3a] sm:$0xff]  ;;  %v620_v32 = vld [vmem:[#allocation2 + $0x42] sm:$0xff]  ;;  %v621_v34 = vld [vmem:[#allocation2 + $0x4a] sm:$0xff] }
  0x2c   : > { %2320 = vmatmul.mubr.msk.f32.gmra.mrb[8].mxu1 %vm242_vm0, %v284_v54  ;;  %2421 = vmatmul.mubr.msk.f32.gmra.mrb[2].mxu0 %vm242_vm0, %v1179_v55  ;;  %v1554_v33 = vld [vmem:[#allocation2 + $0x25] sm:$0xff]  ;;  %v1555_v35 = vld [vmem:[#allocation2 + $0x2d] sm:$0xff]  ;;  %v1556_v37 = vld [vmem:[#allocation2 + $0x35] sm:$0xff] }
  0x2d   : > { %2322 = vmatprep.mubr.msk.f32.mxu1 %vm242_vm0, %v285_v56  ;;  %2423 = vmatprep.mubr.msk.f32.mxu0 %vm242_vm0, %v1180_v57  ;;  %v622_v36 = vld [vmem:[#allocation2 + $0x52] sm:$0xff]  ;;  %v1557_v39 = vld [vmem:[#allocation2 + $0x3d] sm:$0xff]  ;;  %v1558_v40 = vld [vmem:[#allocation2 + $0x45] sm:$0xff] }
  0x2e   : > { %v1559_v41 = vld [vmem:[#allocation2 + $0x4d] sm:$0xff]  ;;  %v1560_v42 = vld [vmem:[#allocation2 + $0x55] sm:$0xff]  ;;  %v1561_v43 = vld [vmem:[#allocation2 + $0x5d] sm:$0xff] }
  0x2f   : > { %v1562_v44 = vld [vmem:[#allocation2 + $0x65] sm:$0xff]  ;;  %v1563_v45 = vld [vmem:[#allocation2 + $0x6d] sm:$0xff]  ;;  %v1740_v46 = vld [vmem:[#allocation2 + $0x16] sm:$0xff] }
  0x30   : > { %2323 = vmatmul.mubr.msk.f32.gmra.mrb[10].mxu1 %vm242_vm0, %v286_v58  ;;  %2424 = vmatmul.mubr.msk.f32.gmra.mrb[4].mxu0 %vm242_vm0, %v1181_v59  ;;  %v1742_v47 = vld [vmem:[#allocation2 + $0x26] sm:$0xff]  ;;  %v1743_v48 = vld [vmem:[#allocation2 + $0x2e] sm:$0xff]  ;;  %v1744_v49 = vld [vmem:[#allocation2 + $0x36] sm:$0xff] }
  0x31   : > { %2329 = vmatprep.mubr.msk.f32.mxu1 %vm242_vm0, %v261_v60  ;;  %2426 = vmatprep.mubr.msk.f32.mxu0 %vm242_vm0, %v1182_v61  ;;  %v1745_v51 = vld [vmem:[#allocation2 + $0x3e] sm:$0xff]  ;;  %v996_v56 = vld [vmem:[#allocation2 + $0x4b] sm:$0xff]  ;;  %v997_v58 = vld [vmem:[#allocation2 + $0x53] sm:$0xff] }
  0x32   : > { %v995_v54 = vld [vmem:[#allocation2 + $0x43] sm:$0xff]  ;;  %v998_v60 = vld [vmem:[#allocation2 + $0x5b] sm:$0xff]  ;;  %v1751_v63 = vld [vmem:[#allocation2 + $0x6e] sm:$0xff] }
  0x33   : > { %v999_v62 = vld [vmem:[#allocation2 + $0x63] sm:$0xff] }
  0x34   : > { %2330 = vmatmul.mubr.msk.f32.vlgmr.msra.gmra.mrb[0].mxu1 %vm242_vm0, %v262_v0  ;;  %2427 = vmatmul.mubr.msk.f32.gmra.mrb[6].mxu0 %vm242_vm0, %v1183_v1 }
  0x35   : > { %2512 = vmatpush3.bf16.msra.mxu1 %v2749_v38  ;;  %2332 = vmatprep.mubr.msk.f32.mxu1 %vm242_vm0, %v263_v2  ;;  %v623_v38 = vld [vmem:[#allocation2 + $0x5a] sm:$0xff] }
  0x36   : > { %2429 = vmatprep.mubr.msk.f32.mxu0 %vm242_vm0, %v1184_v4  ;;  %2514 = vmatprep.subr.bf16.mxu1 %v2513_v3 }
  0x38   : > { %2333 = vmatmul.mubr.msk.f32.gmra.mrb[2].mxu1 %vm242_vm0, %v264_v5  ;;  %2430 = vmatmul.mubr.msk.f32.gmra.mrb[8].mxu0 %vm242_vm0, %v1185_v6 }
  0x39   : > { %2335 = vmatprep.mubr.msk.f32.mxu1 %vm242_vm0, %v265_v8  ;;  %2432 = vmatprep.mubr.msk.f32.mxu0 %vm242_vm0, %v1186_v9 }
  0x3c   : > { %2336 = vmatmul.mubr.msk.f32.gmra.mrb[4].mxu1 %vm242_vm0, %v266_v10  ;;  %2433 = vmatmul.mubr.msk.f32.gmra.mrb[10].mxu0 %vm242_vm0, %v1187_v11 }
  0x3d   : > { %2338 = vmatprep.mubr.msk.f32.mxu1 %vm242_vm0, %v267_v12  ;;  %2439 = vmatprep.mubr.msk.f32.mxu0 %vm242_vm0, %v1177_v50  ;;  %v811_v50 = vld [vmem:[#allocation2 + $0x62] sm:$0xff] }
  0x40   : > { %2339 = vmatmul.mubr.msk.f32.gmra.mrb[6].mxu1 %vm242_vm0, %v268_v15  ;;  %2440 = vmatmul.mubr.msk.f32.vlgmr.msra.gmra.mrb[0].mxu0 %vm242_vm0, %v1178_v53  ;;  %v1746_v53 = vld [vmem:[#allocation2 + $0x46] sm:$0xff] }
  0x41   : > { %2532 = vmatpush3.bf16.msra.mxu0 %v2529_v52  ;;  %2341 = vmatprep.mubr.msk.f32.mxu1 %vm242_vm0, %v269_v16  ;;  %v994_v52 = vld [vmem:[#allocation2 + $0x3b] sm:$0xff] }
  0x42   : > { %2442 = vmatprep.mubr.msk.f32.mxu0 %vm242_vm0, %v1179_v55  ;;  %2534 = vmatprep.subr.bf16.mxu0 %v2533_v17  ;;  %v1747_v55 = vld [vmem:[#allocation2 + $0x4e] sm:$0xff] }
  0x44   : > { %2342 = vmatmul.mubr.msk.f32.gmra.mrb[8].mxu1 %vm242_vm0, %v270_v18  ;;  %2443 = vmatmul.mubr.msk.f32.gmra.mrb[2].mxu0 %vm242_vm0, %v1180_v57  ;;  %v1748_v57 = vld [vmem:[#allocation2 + $0x56] sm:$0xff] }
  0x45   : > { %2344 = vmatprep.mubr.msk.f32.mxu1 %vm242_vm0, %v271_v19  ;;  %2445 = vmatprep.mubr.msk.f32.mxu0 %vm242_vm0, %v1181_v59  ;;  %v1749_v59 = vld [vmem:[#allocation2 + $0x5e] sm:$0xff] }
  0x48   : > { %2345 = vmatmul.mubr.msk.f32.gmra.mrb[10].mxu1 %vm242_vm0, %v272_v20  ;;  %2446 = vmatmul.mubr.msk.f32.gmra.mrb[4].mxu0 %vm242_vm0, %v1182_v61  ;;  %v1750_v61 = vld [vmem:[#allocation2 + $0x66] sm:$0xff] }
  0x49   : > { %2351 = vmatprep.mubr.msk.f32.mxu1 %vm242_vm0, %v612_v21  ;;  %2448 = vmatprep.mubr.msk.f32.mxu0 %vm242_vm0, %v1183_v1 }
  0x4c   : > { %2352 = vmatmul.mubr.msk.f32.vlgmr.msra.gmra.mrb[0].mxu1 %vm242_vm0, %v613_v22  ;;  %2449 = vmatmul.mubr.msk.f32.gmra.mrb[6].mxu0 %vm242_vm0, %v1184_v4 }
  0x4d   : > { %2516 = vmatpush3.bf16.msra.mxu1 %v2513_v3  ;;  %2354 = vmatprep.mubr.msk.f32.mxu1 %vm242_vm0, %v614_v23 }
  0x4e   : > { %2451 = vmatprep.mubr.msk.f32.mxu0 %vm242_vm0, %v1185_v6  ;;  %2537 = vmatprep.subr.bf16.mxu1 %v2699_v7 }
  0x50   : > { %2355 = vmatmul.mubr.msk.f32.gmra.mrb[2].mxu1 %vm242_vm0, %v615_v24  ;;  %2452 = vmatmul.mubr.msk.f32.gmra.mrb[8].mxu0 %vm242_vm0, %v1186_v9 }
  0x51   : > { %2357 = vmatprep.mubr.msk.f32.mxu1 %vm242_vm0, %v616_v25  ;;  %2454 = vmatprep.mubr.msk.f32.mxu0 %vm242_vm0, %v1187_v11 }
  0x54   : > { %2358 = vmatmul.mubr.msk.f32.gmra.mrb[4].mxu1 %vm242_vm0, %v617_v26  ;;  %2455 = vmatmul.mubr.msk.f32.gmra.mrb[10].mxu0 %vm242_vm0, %v1375_v27 }
  0x55   : > { %2360 = vmatprep.mubr.msk.f32.mxu1 %vm242_vm0, %v618_v28  ;;  %2461 = vmatprep.mubr.msk.f32.mxu0 %vm242_vm0, %v1552_v29 }
  0x58   : > { %2361 = vmatmul.mubr.msk.f32.gmra.mrb[6].mxu1 %vm242_vm0, %v619_v30  ;;  %2462 = vmatmul.mubr.msk.f32.vlgmr.msra.gmra.mrb[0].mxu0 %vm242_vm0, %v1553_v31 }
  0x59   : > { %2536 = vmatpush3.bf16.msra.mxu0 %v2533_v17  ;;  %2363 = vmatprep.mubr.msk.f32.mxu1 %vm242_vm0, %v620_v32 }
  0x5a   : > { %2464 = vmatprep.mubr.msk.f32.mxu0 %vm242_vm0, %v1554_v33 }
  0x5c   : > { %2364 = vmatmul.mubr.msk.f32.gmra.mrb[8].mxu1 %vm242_vm0, %v621_v34  ;;  %2465 = vmatmul.mubr.msk.f32.gmra.mrb[2].mxu0 %vm242_vm0, %v1555_v35 }
  0x5d   : > { %2366 = vmatprep.mubr.msk.f32.mxu1 %vm242_vm0, %v622_v36  ;;  %2467 = vmatprep.mubr.msk.f32.mxu0 %vm242_vm0, %v1556_v37 }
  0x60   : > { %2367 = vmatmul.mubr.msk.f32.gmra.mrb[10].mxu1 %vm242_vm0, %v623_v38  ;;  %2468 = vmatmul.mubr.msk.f32.gmra.mrb[4].mxu0 %vm242_vm0, %v1557_v39 }
  0x61   : > { %2373 = vmatprep.mubr.msk.f32.mxu1 %vm242_vm0, %v613_v22  ;;  %2470 = vmatprep.mubr.msk.f32.mxu0 %vm242_vm0, %v1558_v40 }
  0x64   : > { %2374 = vmatmul.mubr.msk.f32.vlgmr.msra.gmra.mrb[0].mxu1 %vm242_vm0, %v614_v23  ;;  %2471 = vmatmul.mubr.msk.f32.gmra.mrb[6].mxu0 %vm242_vm0, %v1559_v41 }
  0x65   : > { %2538 = vmatpush3.bf16.msra.mxu1 %v2699_v7  ;;  %2376 = vmatprep.mubr.msk.f32.mxu1 %vm242_vm0, %v615_v24  ;;  %v1741_v7 = vld [vmem:[#allocation2 + $0x1e] sm:$0xff] }
  0x66   : > { %2473 = vmatprep.mubr.msk.f32.mxu0 %vm242_vm0, %v1560_v42 }
  0x68   : > { %2377 = vmatmul.mubr.msk.f32.gmra.mrb[2].mxu1 %vm242_vm0, %v616_v25  ;;  %2474 = vmatmul.mubr.msk.f32.gmra.mrb[8].mxu0 %vm242_vm0, %v1561_v43 }
  0x69   : > { %2379 = vmatprep.mubr.msk.f32.mxu1 %vm242_vm0, %v617_v26  ;;  %2476 = vmatprep.mubr.msk.f32.mxu0 %vm242_vm0, %v1562_v44 }
  0x6c   : > { %2380 = vmatmul.mubr.msk.f32.gmra.mrb[4].mxu1 %vm242_vm0, %v618_v28  ;;  %2477 = vmatmul.mubr.msk.f32.gmra.mrb[10].mxu0 %vm242_vm0, %v1563_v45 }
  0x6d   : > { %2382 = vmatprep.mubr.msk.f32.mxu1 %vm242_vm0, %v619_v30  ;;  %2483 = vmatprep.mubr.msk.f32.mxu0 %vm242_vm0, %v1740_v46 }
  0x70   : > { %2383 = vmatmul.mubr.msk.f32.gmra.mrb[6].mxu1 %vm242_vm0, %v620_v32  ;;  %2484 = vmatmul.mubr.msk.f32.vlgmr.msra.gmra.mrb[0].mxu0 %vm242_vm0, %v1741_v7 }
  0x71   : > { %2385 = vmatprep.mubr.msk.f32.mxu1 %vm242_vm0, %v621_v34  ;;  %2486 = vmatprep.mubr.msk.f32.mxu0 %vm242_vm0, %v1742_v47 }
  0x74   : > { %2386 = vmatmul.mubr.msk.f32.gmra.mrb[8].mxu1 %vm242_vm0, %v622_v36  ;;  %2487 = vmatmul.mubr.msk.f32.gmra.mrb[2].mxu0 %vm242_vm0, %v1743_v48 }
  0x75   : > { %2388 = vmatprep.mubr.msk.f32.mxu1 %vm242_vm0, %v623_v38  ;;  %2489 = vmatprep.mubr.msk.f32.mxu0 %vm242_vm0, %v1744_v49 }
  0x78   : > { %2389 = vmatmul.mubr.msk.f32.gmra.mrb[10].mxu1 %vm242_vm0, %v811_v50  ;;  %2490 = vmatmul.mubr.msk.f32.gmra.mrb[4].mxu0 %vm242_vm0, %v1745_v51 }
  0x79   : > { %2404 = vmatprep.mubr.msk.f32.mxu1 %vm242_vm0, %v994_v52  ;;  %2492 = vmatprep.mubr.msk.f32.mxu0 %vm242_vm0, %v1746_v53 }
  0x7c   : > { %2405 = vmatmul.mubr.msk.f32.vlgmr.msra.gmra.mrb[6].mxu1 %vm242_vm0, %v995_v54  ;;  %2493 = vmatmul.mubr.msk.f32.gmra.mrb[6].mxu0 %vm242_vm0, %v1747_v55 }
  0x7d   : > { %2407 = vmatprep.mubr.msk.f32.mxu1 %vm242_vm0, %v996_v56  ;;  %2495 = vmatprep.mubr.msk.f32.mxu0 %vm242_vm0, %v1748_v57 }
  0x80   : > { %2408 = vmatmul.mubr.msk.f32.gmra.mrb[8].mxu1 %vm242_vm0, %v997_v58  ;;  %2496 = vmatmul.mubr.msk.f32.gmra.mrb[8].mxu0 %vm242_vm0, %v1749_v59 }
  0x81   : > { %2410 = vmatprep.mubr.msk.f32.mxu1 %vm242_vm0, %v998_v60  ;;  %2498 = vmatprep.mubr.msk.f32.mxu0 %vm242_vm0, %v1750_v61 }
  0x84   : > { %2411 = vmatmul.mubr.msk.f32.gmra.mrb[10].mxu1 %vm242_vm0, %v999_v62  ;;  %2499 = vmatmul.mubr.msk.f32.gmra.mrb[10].mxu0 %vm242_vm0, %v1751_v63 }
 0x137   : > { %v2375_v0 = vpop.f32.mrb[0].mxu1 }
 0x138   : > { %v917_v1 = vpop.f32.mrb[1].mxu1 }
 0x13b   : > { %v2378_v2 = vpop.f32.mrb[2].mxu1 }
 0x13c   : > { %v927_v3 = vpop.f32.mrb[3].mxu1 }
 0x13f   : > { %v2381_v4 = vpop.f32.mrb[4].mxu1 }
 0x140   : > { %v937_v5 = vpop.f32.mrb[5].mxu1 }
 0x143   : > { %v2485_v6 = vpop.f32.mrb[0].mxu0 }
 0x144   : > { %v2539_v8 = vadd.f32 %v2485_v6, %v2375_v0  ;;  %v1857_v9 = vpop.f32.mrb[1].mxu0 }
 0x145   : > { %v2540_v10 = vadd.f32 %v1857_v9, %v917_v1 }
 0x146   : > { %v1929_v11 = vmul.f32 0.2, %v2539_v8 }
 0x147   : > { %v1928_v12 = vmul.f32 0.2, %v2540_v10  ;;  %v2488_v13 = vpop.f32.mrb[2].mxu0 }
 0x148   : > { %v1941_v14 = vmax.f32 %v2539_v8, %v1929_v11  ;;  %v2541_v15 = vadd.f32 %v2488_v13, %v2378_v2  ;;  %v1867_v16 = vpop.f32.mrb[3].mxu0 }
 0x149   : > { %v1940_v17 = vmax.f32 %v2540_v10, %v1928_v12  ;;  %v2542_v18 = vadd.f32 %v1867_v16, %v927_v3 }
 0x14a   : > { %1954 = vst.msk [vmem:[%s2885_s14 + $0x8] sm:$0xff] %vm1952_vm1, %v1941_v14  ;;  %v1931_v19 = vmul.f32 0.2, %v2541_v15 }
 0x14b   : > { %1953 = vst.msk [vmem:[%s2885_s14] sm:$0xff] %vm1952_vm1, %v1940_v17  ;;  %v1930_v20 = vmul.f32 0.2, %v2542_v18  ;;  %v2491_v21 = vpop.f32.mrb[4].mxu0 }
 0x14c   : > { %v1943_v22 = vmax.f32 %v2541_v15, %v1931_v19  ;;  %v2543_v23 = vadd.f32 %v2491_v21, %v2381_v4  ;;  %v1877_v24 = vpop.f32.mrb[5].mxu0 }
 0x14d   : > { %v1942_v25 = vmax.f32 %v2542_v18, %v1930_v20  ;;  %v2544_v26 = vadd.f32 %v1877_v24, %v937_v5 }
 0x14e   : > { %1956 = vst.msk [vmem:[%s2885_s14 + $0x18] sm:$0xff] %vm1952_vm1, %v1943_v22  ;;  %v1933_v27 = vmul.f32 0.2, %v2543_v23 }
 0x14f   : > { %1955 = vst.msk [vmem:[%s2885_s14 + $0x10] sm:$0xff] %vm1952_vm1, %v1942_v25  ;;  %v1932_v28 = vmul.f32 0.2, %v2544_v26  ;;  %v2406_v29 = vpop.f32.mrb[6].mxu1  ;;  %v2494_v30 = vpop.f32.mrb[6].mxu0 }
 0x150   : > { %v1945_v31 = vmax.f32 %v2543_v23, %v1933_v27  ;;  %v2545_v32 = vadd.f32 %v2494_v30, %v2406_v29  ;;  %v1135_v33 = vpop.f32.mrb[7].mxu1  ;;  %v1887_v34 = vpop.f32.mrb[7].mxu0 }
 0x151   : > { %v1944_v35 = vmax.f32 %v2544_v26, %v1932_v28  ;;  %v2546_v36 = vadd.f32 %v1887_v34, %v1135_v33 }
 0x152   : > { %1958 = vst.msk [vmem:[%s2885_s14 + $0x28] sm:$0xff] %vm1952_vm1, %v1945_v31  ;;  %v1935_v37 = vmul.f32 0.2, %v2545_v32 }
 0x153   : > { %1957 = vst.msk [vmem:[%s2885_s14 + $0x20] sm:$0xff] %vm1952_vm1, %v1944_v35  ;;  %v1934_v38 = vmul.f32 0.2, %v2546_v36  ;;  %v2409_v39 = vpop.f32.mrb[8].mxu1  ;;  %v2497_v40 = vpop.f32.mrb[8].mxu0 }
 0x154   : > { %v1947_v41 = vmax.f32 %v2545_v32, %v1935_v37  ;;  %v2547_v42 = vadd.f32 %v2497_v40, %v2409_v39  ;;  %v1145_v43 = vpop.f32.mrb[9].mxu1  ;;  %v1897_v44 = vpop.f32.mrb[9].mxu0 }
 0x155   : > { %v1946_v45 = vmax.f32 %v2546_v36, %v1934_v38  ;;  %v2548_v46 = vadd.f32 %v1897_v44, %v1145_v43 }
 0x156   : > { %1960 = vst.msk [vmem:[%s2885_s14 + $0x38] sm:$0xff] %vm1952_vm1, %v1947_v41  ;;  %v1937_v7 = vmul.f32 0.2, %v2547_v42 }
 0x157   : > { %1959 = vst.msk [vmem:[%s2885_s14 + $0x30] sm:$0xff] %vm1952_vm1, %v1946_v45  ;;  %v1936_v47 = vmul.f32 0.2, %v2548_v46  ;;  %v2412_v48 = vpop.f32.mrb[10].mxu1  ;;  %v2500_v49 = vpop.f32.mrb[10].mxu0 }
 0x158   : > { %v1949_v50 = vmax.f32 %v2547_v42, %v1937_v7  ;;  %v2549_v51 = vadd.f32 %v2500_v49, %v2412_v48  ;;  %v1155_v52 = vpop.f32.mrb[11].mxu1  ;;  %v1907_v53 = vpop.f32.mrb[11].mxu0 }
 0x159   : > { %v1948_v54 = vmax.f32 %v2548_v46, %v1936_v47  ;;  %v2550_v55 = vadd.f32 %v1907_v53, %v1155_v52 }
 0x15a   : > { %1962 = vst.msk [vmem:[%s2885_s14 + $0x48] sm:$0xff] %vm1952_vm1, %v1949_v50  ;;  %v1939_v56 = vmul.f32 0.2, %v2549_v51 }
 0x15b   : > { %1961 = vst.msk [vmem:[%s2885_s14 + $0x40] sm:$0xff] %vm1952_vm1, %v1948_v54  ;;  %v1938_v57 = vmul.f32 0.2, %v2550_v55 }
 0x15c   : > { %v1951_v58 = vmax.f32 %v2549_v51, %v1939_v56 }
 0x15d   : > { %v1950_v59 = vmax.f32 %v2550_v55, %v1938_v57 }
 0x15e   : > { %1964 = vst.msk [vmem:[%s2885_s14 + $0x58] sm:$0xff] %vm1952_vm1, %v1951_v58 }
 0x15f   : > { %1963 = vst.msk [vmem:[%s2885_s14 + $0x50] sm:$0xff] %vm1952_vm1, %v1950_v59 }
 0x160 PF: > { %s13_s12 = sadd.s32 1, %s2649_s12  }
 0x161   : > { %p10_p6 = scmp.ge.s32.totalorder %s13_s12, 5  }
 0x163   :  { %12 = sbr.rel (!%p10_p6) target bundleno = 1 (0x1), region = 73 }

// kernel: tile.13
= control target key start
LH: loop header
LB: loop body
LE: loop exit
PB: predicated region body
PF: predicated region fallthrough
CT: control target
= control target key end

     0   :  { %s22_s0 = inlined_call_operand.vmem [shape: f32[64], index: 0, kind: input, shape index: {}]   ;;  %s23_s1 = inlined_call_operand.vmem [shape: f32[4,64], index: 1, kind: output, shape index: {}]  }
   0x1   :  { %v4_v0 = vld [vmem:[%s22_s0] ss:$0 sm:$0xff] }
   0x2   :  { %5 = vst [vmem:[%s23_s1] sm:$0xf] %v4_v0 }

// kernel: tile.18
= control target key start
LH: loop header
LB: loop body
LE: loop exit
PB: predicated region body
PF: predicated region fallthrough
CT: control target
= control target key end

     0   :  { %s6_s8 = smov 3  ;;  %vm8_vm0 = vcmask 523264   ;;  %s30_s9 = smov 64   ;;  %vm15_vm1 = vcmask 1048064   ;;  %s50_s0 = inlined_call_operand.vmem [shape: f32[4,64], index: 0, kind: input, shape index: {}]   ;;  %s51_s1 = inlined_call_operand.vmem [shape: f32[1,256], index: 1, kind: output, shape index: {}]  }
   0x1   :  { %v4_v0 = vld [vmem:[%s50_s0] sm:$0xf]  ;;  %s11_s0 = smov 3 }
   0x2   :  { %5 = vst [vmem:[#allocation1] sm:$0xf] %v4_v0 }
   0x9   :  { %v12_v1 = vld [vmem:[#allocation1 + $0x1] ss:$2 sm:%s11_s0]   ;;  %v7_v2 = vld [vmem:[#allocation1] ss:$2 sm:%s6_s8]  }
   0xa   :  { %13 = vrot.lane.b32.xlu0 %v12_v1, %s30_s9  ;;  %9 = vst.msk [vmem:[#allocation0] ss:$8 sm:$0x3] %vm8_vm0, %v7_v2  }
  0x7c   :  { %v14_v3 = vpop.permute.xlu0 %13  }
  0x7d   :  { %16 = vst.msk [vmem:[#allocation0] ss:$8 sm:$0x3] %vm15_vm1, %v14_v3  }
  0x84   :  { %v20_v4 = vld [vmem:[#allocation0] sm:$0x1]  ;;  %v24_v5 = vld [vmem:[#allocation0 + $0x8] sm:$0x1] }
  0x85   :  { %22 = vst [vmem:[%s51_s1] sm:$0x1] %v20_v4  ;;  %28 = vst [vmem:[%s51_s1 + $0x1] sm:$0x1] %v24_v5 }

// kernel: discriminator_forward.5
= control target key start
LH: loop header
LB: loop body
LE: loop exit
PB: predicated region body
PF: predicated region fallthrough
CT: control target
= control target key end

     0   :  { %s3098_s18 = smov 0   ;;  %s3510_s0 = inlined_call_operand.vmem [shape: f32[312,32], index: 0, kind: input, shape index: {}, may-alias: {0,1}]   ;;  %s3511_s1 = inlined_call_operand.vmem [shape: f32[312,32], index: 1, kind: input, shape index: {}, may-alias: {0,1}]   ;;  %s3512_s2 = inlined_call_operand.vmem [shape: f32[9,32,64], index: 2, kind: input, shape index: {}]   ;;  %s3513_s3 = inlined_call_operand.vmem [shape: f32[312,1], index: 3, kind: input, shape index: {}]   ;;  %s3514_s4 = inlined_call_operand.vmem [shape: f32[288,64], index: 4, kind: output, shape index: {0}]   ;;  %s3515_s5 = inlined_call_operand.vmem [shape: f32[24,64], index: 5, kind: output, shape index: {1}]  }
   0x1 LB: > { %s3104_s19 = sadd.s32 4294967295, %s3065_s18   ;;  %p2342_p0 = scmp.ge.s32.totalorder %s3065_s18, 1  ;;  %s3065_s18 = sphi %s3098_s18, %s16_s18  }
   0x2   : > { %p237_p1 = scmp.lt.s32.totalorder %s3065_s18, 4 }
   0x4   : > { %p238_p2 = pnand %p2342_p0, %p237_p1 }
   0x5   : > { %v2350_v0 = vld [vmem:[%s3512_s2 + $0x20] sm:$0xff] (!%p238_p2)  ;;  %v2351_v1 = vld [vmem:[%s3512_s2 + $0x28] sm:$0xff] (!%p238_p2)  ;;  %s3118_s26 = smul.u32 (!%p238_p2), 12, %s3104_s19  ;;  %s303_s27 = sadd.s32 (!%p238_p2), 1, %s3104_s19  ;;  %v2352_v5 = vld [vmem:[%s3512_s2 + $0x30] sm:$0xff] (!%p238_p2)  ;;  %v3067_v12 = vmov (!%p238_p2), 0  }
   0x6   : > { %241 = sbr.rel (%p238_p2) target bundleno = 369 (0x171), region = 36  ;;  %v2410_v2 = vld [vmem:[%s3512_s2 + $0x80] sm:$0xff] (!%p238_p2)  ;;  %v2876_v3 = vpack.c.bf16 (!%p238_p2), %v2351_v1, %v2350_v0  ;;  %v2411_v4 = vld [vmem:[%s3512_s2 + $0x88] sm:$0xff] (!%p238_p2)  ;;  %v2353_v6 = vld [vmem:[%s3512_s2 + $0x38] sm:$0xff] (!%p238_p2)  ;;  %3057 = vset.pattern.permute.xlu0 (!%p238_p2), %v3067_v12  ;;  %3058 = vset.pattern.permute.xlu1 (!%p238_p2), %v3067_v12  ;;  %vm349_vm0 = vcmask (!%p238_p2), 261120   ;;  %vm2137_vm1 = vcmask (!%p238_p2), 523264  }
   0x7   : > { %s2345_s9 = smul.u32 (!%p238_p2), 12, %s303_s27  ;;  %v3130_v7 = vpack.c.bf16 (!%p238_p2), %v2411_v4, %v2410_v2  ;;  %v2880_v8 = vpack.c.bf16 (!%p238_p2), %v2353_v6, %v2352_v5  ;;  %v2412_v9 = vld [vmem:[%s3512_s2 + $0x90] sm:$0xff] (!%p238_p2)  ;;  %v2413_v10 = vld [vmem:[%s3512_s2 + $0x98] sm:$0xff] (!%p238_p2)  ;;  %p294_p3 = scmp.lt.s32.totalorder (!%p238_p2), %s3118_s26, 38  ;;  %v380_v11 = vld [vmem:[%s3512_s2] sm:$0xff] (!%p238_p2)  ;;  %vm2222_vm2 = vcmask (!%p238_p2), 516096  }
   0x8   : > { %2877 = vmatprep.subr.bf16.mxu1 (!%p238_p2), %v2876_v3  ;;  %v3142_v13 = vpack.c.bf16 (!%p238_p2), %v2413_v10, %v2412_v9  ;;  %v381_v14 = vld [vmem:[%s3512_s2 + $0x8] sm:$0xff] (!%p238_p2)  ;;  %v2426_v15 = vld [vmem:[%s3512_s2 + $0xa0] sm:$0xff] (!%p238_p2)  ;;  %v2428_v33 = vld [vmem:[%s3512_s2 + $0xb0] sm:$0xff] (!%p238_p2)  ;;  %p328_p5 = scmp.lt.s32.totalorder (!%p238_p2), %s3118_s26, 35  ;;  %p333_p6 = scmp.lt.s32.totalorder (!%p238_p2), %s3104_s19, 2 }
   0x9   : > { %v2427_v16 = vld [vmem:[%s3512_s2 + $0xa8] sm:$0xff] (!%p238_p2)  ;;  %p306_p4 = scmp.lt.s32.totalorder (!%p238_p2), %s2345_s9, 38  ;;  %2909 = vmatprep.subr.bf16.mxu0 (!%p238_p2), %v3130_v7  ;;  %2879 = vmatpush3.bf16.msra.mxu1 (!%p238_p2), %v2876_v3  ;;  %v2884_v17 = vpack.c.bf16 (!%p238_p2), %v381_v14, %v380_v11  ;;  %v2429_v34 = vld [vmem:[%s3512_s2 + $0xb8] sm:$0xff] (!%p238_p2)  ;;  %v382_v35 = vld [vmem:[%s3512_s2 + $0x10] sm:$0xff] (!%p238_p2) }
   0xa   : > { %2911 = vmatpush3.bf16.msra.mxu0 (!%p238_p2), %v3130_v7  ;;  %2881 = vmatprep.subr.bf16.mxu1 (!%p238_p2), %v2880_v8  ;;  %v2916_v18 = vpack.c.bf16 (!%p238_p2), %v2427_v16, %v2426_v15  ;;  %v383_v36 = vld [vmem:[%s3512_s2 + $0x18] sm:$0xff] (!%p238_p2)  ;;  %v2442_v38 = vld [vmem:[%s3512_s2 + $0xc0] sm:$0xff] (!%p238_p2)  ;;  %v2443_v39 = vld [vmem:[%s3512_s2 + $0xc8] sm:$0xff] (!%p238_p2)  ;;  %v2920_v46 = vpack.c.bf16 (!%p238_p2), %v2429_v34, %v2428_v33 }
   0xb   : > { %2913 = vmatprep.subr.bf16.mxu0 (!%p238_p2), %v3142_v13  ;;  %v2888_v47 = vpack.c.bf16 (!%p238_p2), %v383_v36, %v382_v35  ;;  %v2924_v51 = vpack.c.bf16 (!%p238_p2), %v2443_v39, %v2442_v38  ;;  %v2378_v53 = vld [vmem:[%s3512_s2 + $0x40] sm:$0xff] (!%p238_p2)  ;;  %v2379_v54 = vld [vmem:[%s3512_s2 + $0x48] sm:$0xff] (!%p238_p2)  ;;  %v2444_v60 = vld [vmem:[%s3512_s2 + $0xd0] sm:$0xff] (!%p238_p2) }
   0xc   : > { %v2892_v59 = vpack.c.bf16 (!%p238_p2), %v2379_v54, %v2378_v53  ;;  %v2445_v61 = vld [vmem:[%s3512_s2 + $0xd8] sm:$0xff] (!%p238_p2)  ;;  %v2458_v3 = vld [vmem:[%s3512_s2 + $0xe0] sm:$0xff] (!%p238_p2)  ;;  %v2459_v4 = vld [vmem:[%s3512_s2 + $0xe8] sm:$0xff] (!%p238_p2) }
   0xd   : > { %s3155_s24 = scalar_select %p294_p3, %s3118_s26, 38  ;;  %2883 = vmatpush3.bf16.msra.mxu1 %v2880_v8  ;;  %v2928_v1 = vpack.c.bf16 %v2445_v61, %v2444_v60  ;;  %v3248_v10 = vpack.c.bf16 %v2459_v4, %v2458_v3  ;;  %v2380_v16 = vld [vmem:[%s3512_s2 + $0x50] sm:$0xff]  ;;  %v2461_v36 = vld [vmem:[%s3512_s2 + $0xf8] sm:$0xff] }
   0xe   : > { %s3517_s9 = smov (!%p306_p4, %s2345_s9), 38  ;;  %2915 = vmatpush3.bf16.msra.mxu0 %v3142_v13  ;;  %2885 = vmatprep.subr.bf16.mxu1 %v2884_v17  ;;  %v2460_v35 = vld [vmem:[%s3512_s2 + $0xf0] sm:$0xff]  ;;  %v2397_v53 = vld [vmem:[%s3512_s2 + $0x78] sm:$0xff]  ;;  %s3519_s26 = smov (!%p328_p5, %s3118_s26), 35 }
   0xf   : > { %s2343_s25 = sshll.u32 %s3155_s24, 3  ;;  %s2346_s30 = sshll.u32 %s3517_s9, 3  ;;  %2917 = vmatprep.subr.bf16.mxu0 %v2916_v18  ;;  %v2476_v4 = vld [vmem:[%s3512_s2 + $0x110] sm:$0xff] }
  0x10   : > { %s297_s29 = scalar_lea.vmem %s3510_s0, %s2343_s25  ;;  %s309_s8 = scalar_lea.vmem %s3511_s1, %s2346_s30 }
  0x11   : > { %v337_v19 = vld [vmem:[%s297_s29] sm:$0xff]  ;;  %v338_v20 = vld [vmem:[%s297_s29 + $0x8] sm:$0xff]  ;;  %v339_v21 = vld [vmem:[%s297_s29 + $0x10] sm:$0xff]  ;;  %s3291_s28 = scalar_lea.vmem %s3513_s3, %s2343_s25  ;;  %s2348_s20 = sshll.u32 %s3519_s26, 3 }
  0x12   : > { %350 = vst.msk [vmem:[#allocation2] sm:$0xff] %vm349_vm0, %v337_v19  ;;  %351 = vst.msk [vmem:[#allocation2 + $0x8] sm:$0xff] %vm349_vm0, %v338_v20  ;;  %v340_v22 = vld [vmem:[%s297_s29 + $0x18] sm:$0xff]  ;;  %v341_v23 = vld [vmem:[%s297_s29 + $0x20] sm:$0xff]  ;;  %s3452_s23 = scalar_lea.vmem %s3514_s4, %s2348_s20  ;;  %s3521_s19 = smov (!%p333_p6, %s3104_s19), 2 }
  0x13   : > { %352 = vst.msk [vmem:[#allocation2 + $0x10] sm:$0xff] %vm349_vm0, %v339_v21  ;;  %v342_v24 = vld [vmem:[%s297_s29 + $0x28] sm:$0xff]  ;;  %353 = vst.msk [vmem:[#allocation2 + $0x18] sm:$0xff] %vm349_vm0, %v340_v22  ;;  %v343_v25 = vld [vmem:[%s297_s29 + $0x30] sm:$0xff]  ;;  %s2349_s26 = sshll.u32 %s3521_s19, 3 }
  0x14   : > { %354 = vst.msk [vmem:[#allocation2 + $0x20] sm:$0xff] %vm349_vm0, %v341_v23  ;;  %355 = vst.msk [vmem:[#allocation2 + $0x28] sm:$0xff] %vm349_vm0, %v342_v24  ;;  %v344_v26 = vld [vmem:[%s297_s29 + $0x38] sm:$0xff]  ;;  %v345_v27 = vld [vmem:[%s297_s29 + $0x40] sm:$0xff]  ;;  %s336_s24 = scalar_lea.vmem %s3515_s5, %s2349_s26 }
  0x15   : > { %356 = vst.msk [vmem:[#allocation2 + $0x30] sm:$0xff] %vm349_vm0, %v343_v25  ;;  %357 = vst.msk [vmem:[#allocation2 + $0x38] sm:$0xff] %vm349_vm0, %v344_v26  ;;  %v346_v28 = vld [vmem:[%s297_s29 + $0x48] sm:$0xff]  ;;  %v347_v29 = vld [vmem:[%s297_s29 + $0x50] sm:$0xff] }
  0x16   : > { %358 = vst.msk [vmem:[#allocation2 + $0x40] sm:$0xff] %vm349_vm0, %v345_v27  ;;  %v348_v30 = vld [vmem:[%s297_s29 + $0x58] sm:$0xff]  ;;  %359 = vst.msk [vmem:[#allocation2 + $0x48] sm:$0xff] %vm349_vm0, %v346_v28  ;;  %v362_v31 = vld [vmem:[%s309_s8] sm:$0xff] }
  0x17   : > { %360 = vst.msk [vmem:[#allocation2 + $0x50] sm:$0xff] %vm349_vm0, %v347_v29  ;;  %361 = vst.msk [vmem:[#allocation2 + $0x58] sm:$0xff] %vm349_vm0, %v348_v30  ;;  %v363_v32 = vld [vmem:[%s309_s8 + $0x8] sm:$0xff]  ;;  %v364_v37 = vld [vmem:[%s309_s8 + $0x10] sm:$0xff] }
  0x18   : > { %365 = vst.msk [vmem:[#allocation2 + $0x60] sm:$0xff] %vm349_vm0, %v362_v31  ;;  %366 = vst.msk [vmem:[#allocation2 + $0x68] sm:$0xff] %vm349_vm0, %v363_v32  ;;  %v2394_v23 = vld [vmem:[%s3512_s2 + $0x60] sm:$0xff]  ;;  %v2395_v24 = vld [vmem:[%s3512_s2 + $0x68] sm:$0xff] }
  0x19   : > { %367 = vst.msk [vmem:[#allocation2 + $0x70] sm:$0xff] %vm349_vm0, %v364_v37  ;;  %v384_v40 = vld [vmem:[#allocation2 + $0x1] sm:$0xff]  ;;  %v3300_v29 = vpack.c.bf16 %v2395_v24, %v2394_v23  ;;  %v2055_v31 = vld [vmem:[%s3291_s28 + $0x10] sm:$0xff]  ;;  %v2056_v38 = vld [vmem:[%s3291_s28 + $0x18] sm:$0xff] }
  0x1a   : > { %v1103_v41 = vld [vmem:[#allocation2 + $0xb] sm:$0xff]  ;;  %2650 = vmatprep.mubr.msk.f32.mxu1 %vm349_vm0, %v384_v40  ;;  %v1104_v43 = vld [vmem:[#allocation2 + $0x13] sm:$0xff]  ;;  %v368_v14 = vld [vmem:[#allocation2] sm:$0xff]  ;;  %2077 = vperm.xlu1 %3058, %v2055_v31  }
  0x1b   : > { %v385_v42 = vld [vmem:[#allocation2 + $0x9] sm:$0xff]  ;;  %2754 = vmatprep.mubr.msk.f32.mxu0 %vm349_vm0, %v1103_v41  ;;  %v386_v44 = vld [vmem:[#allocation2 + $0x11] sm:$0xff]  ;;  %v1105_v45 = vld [vmem:[#allocation2 + $0x1b] sm:$0xff]  ;;  %v2936_v41 = vpack.c.bf16 %v2461_v36, %v2460_v35 }
  0x1c   : > { %2651 = vmatmul.mubr.msk.f32.vlgmr.msra.gmra.mrb[0].mxu1 %vm349_vm0, %v385_v42  ;;  %2755 = vmatmul.mubr.msk.f32.vlgmr.msra.gmra.mrb[0].mxu0 %vm349_vm0, %v1104_v43  ;;  %v387_v48 = vld [vmem:[#allocation2 + $0x19] sm:$0xff]  ;;  %v1106_v49 = vld [vmem:[#allocation2 + $0x23] sm:$0xff]  ;;  %v1107_v52 = vld [vmem:[#allocation2 + $0x2b] sm:$0xff] }
  0x1d   : > { %2887 = vmatpush3.bf16.msra.mxu1 %v2884_v17  ;;  %2919 = vmatpush3.bf16.msra.mxu0 %v2916_v18  ;;  %v388_v50 = vld [vmem:[#allocation2 + $0x21] sm:$0xff]  ;;  %v389_v55 = vld [vmem:[#allocation2 + $0x29] sm:$0xff]  ;;  %v1108_v56 = vld [vmem:[#allocation2 + $0x33] sm:$0xff] }
  0x1e   : > { %2653 = vmatprep.mubr.msk.f32.mxu1 %vm349_vm0, %v386_v44  ;;  %2757 = vmatprep.mubr.msk.f32.mxu0 %vm349_vm0, %v1105_v45  ;;  %v390_v57 = vld [vmem:[#allocation2 + $0x31] sm:$0xff]  ;;  %v391_v62 = vld [vmem:[#allocation2 + $0x39] sm:$0xff]  ;;  %v392_v0 = vld [vmem:[#allocation2 + $0x41] sm:$0xff] }
  0x1f   : > { %2921 = vmatprep.subr.bf16.mxu0 %v2920_v46  ;;  %2889 = vmatprep.subr.bf16.mxu1 %v2888_v47  ;;  %v1293_v58 = vld [vmem:[#allocation2 + $0xc] sm:$0xff]  ;;  %v3228_v63 = vld [vmem:[#allocation2 + $0x14] sm:$0xff]  ;;  %v3230_v2 = vld [vmem:[#allocation2 + $0x1c] sm:$0xff] }
  0x20   : > { %2654 = vmatmul.mubr.msk.f32.gmra.mrb[2].mxu1 %vm349_vm0, %v387_v48  ;;  %2758 = vmatmul.mubr.msk.f32.gmra.mrb[2].mxu0 %vm349_vm0, %v1106_v49  ;;  %v393_v5 = vld [vmem:[#allocation2 + $0x49] sm:$0xff]  ;;  %v394_v8 = vld [vmem:[#allocation2 + $0x51] sm:$0xff]  ;;  %v395_v11 = vld [vmem:[#allocation2 + $0x59] sm:$0xff] }
  0x21   : > { %2923 = vmatpush3.bf16.msra.mxu0 %v2920_v46  ;;  %2656 = vmatprep.mubr.msk.f32.mxu1 %vm349_vm0, %v388_v50  ;;  %v3242_v6 = vld [vmem:[#allocation2 + $0x24] sm:$0xff]  ;;  %v3246_v9 = vld [vmem:[#allocation2 + $0x2c] sm:$0xff]  ;;  %v3256_v12 = vld [vmem:[#allocation2 + $0x34] sm:$0xff] }
  0x22   : > { %2760 = vmatprep.mubr.msk.f32.mxu0 %vm349_vm0, %v1107_v52  ;;  %2925 = vmatprep.subr.bf16.mxu0 %v2924_v51  ;;  %v3258_v15 = vld [vmem:[#allocation2 + $0x3c] sm:$0xff]  ;;  %v369_v18 = vld [vmem:[#allocation2 + $0x8] sm:$0xff]  ;;  %v370_v20 = vld [vmem:[#allocation2 + $0x10] sm:$0xff] }
  0x23   : > { %2891 = vmatpush3.bf16.msra.mxu1 %v2888_v47  ;;  %v2381_v17 = vld [vmem:[%s3512_s2 + $0x58] sm:$0xff]  ;;  %v3273_v19 = vld [vmem:[#allocation2 + $0x44] sm:$0xff]  ;;  %v3275_v22 = vld [vmem:[#allocation2 + $0x4c] sm:$0xff]  ;;  %2082 = vperm.xlu1 %3058, %v2056_v38  }
  0x24   : > { %2657 = vmatmul.mubr.msk.f32.gmra.mrb[4].mxu1 %vm349_vm0, %v389_v55  ;;  %2761 = vmatmul.mubr.msk.f32.gmra.mrb[4].mxu0 %vm349_vm0, %v1108_v56  ;;  %v2896_v21 = vpack.c.bf16 %v2381_v17, %v2380_v16  ;;  %v371_v25 = vld [vmem:[#allocation2 + $0x18] sm:$0xff]  ;;  %v372_v27 = vld [vmem:[#allocation2 + $0x20] sm:$0xff]  ;;  %v373_v32 = vld [vmem:[#allocation2 + $0x28] sm:$0xff] }
  0x25   : > { %2659 = vmatprep.mubr.msk.f32.mxu1 %vm349_vm0, %v390_v57  ;;  %2780 = vmatprep.mubr.msk.f32.mxu0 %vm349_vm0, %v1293_v58  ;;  %v3294_v26 = vld [vmem:[#allocation2 + $0x54] sm:$0xff]  ;;  %v3298_v28 = vld [vmem:[#allocation2 + $0x5c] sm:$0xff]  ;;  %v3310_v33 = vld [vmem:[#allocation2 + $0x64] sm:$0xff] }
  0x26   : > { %2893 = vmatprep.subr.bf16.mxu1 %v2892_v59  ;;  %v2053_v30 = vld [vmem:[%s3291_s28] sm:$0xff]  ;;  %v374_v34 = vld [vmem:[#allocation2 + $0x30] sm:$0xff]  ;;  %v2054_v37 = vld [vmem:[%s3291_s28 + $0x8] sm:$0xff] }
  0x27   : > { %2067 = vperm.xlu0 %3057, %v2053_v30   ;;  %v375_v39 = vld [vmem:[#allocation2 + $0x38] sm:$0xff]  ;;  %v376_v40 = vld [vmem:[#allocation2 + $0x40] sm:$0xff]  ;;  %v2475_v43 = vld [vmem:[%s3512_s2 + $0x108] sm:$0xff] }
  0x28   : > { %2660 = vmatmul.mubr.msk.f32.gmra.mrb[6].mxu1 %vm349_vm0, %v391_v62  ;;  %2781 = vmatmul.mubr.msk.f32.vlgmr.msra.gmra.mrb[0].mxu0 %vm349_vm0, %v3228_v63  ;;  %v2474_v42 = vld [vmem:[%s3512_s2 + $0x100] sm:$0xff]  ;;  %v2058_v45 = vld [vmem:[%s3291_s28 + $0x28] sm:$0xff]  ;;  %v378_v47 = vld [vmem:[#allocation2 + $0x50] sm:$0xff] }
  0x29   : > { %2927 = vmatpush3.bf16.msra.mxu0 %v2924_v51  ;;  %2662 = vmatprep.mubr.msk.f32.mxu1 %vm349_vm0, %v392_v0  ;;  %v2057_v44 = vld [vmem:[%s3291_s28 + $0x20] sm:$0xff]  ;;  %v377_v46 = vld [vmem:[#allocation2 + $0x48] sm:$0xff]  ;;  %v3342_v48 = vpack.c.bf16 %v2475_v43, %v2474_v42  ;;  %v2059_v49 = vld [vmem:[%s3291_s28 + $0x30] sm:$0xff] }
  0x2a   : > { %2783 = vmatprep.mubr.msk.f32.mxu0 %vm349_vm0, %v3230_v2  ;;  %2929 = vmatprep.subr.bf16.mxu0 %v2928_v1  ;;  %v379_v50 = vld [vmem:[#allocation2 + $0x58] sm:$0xff]  ;;  %v723_v51 = vld [vmem:[#allocation2 + $0x2] sm:$0xff]  ;;  %v2396_v52 = vld [vmem:[%s3512_s2 + $0x70] sm:$0xff] }
  0x2b   : > { %2072 = vperm.xlu0 %3057, %v2054_v37   ;;  %2092 = vperm.xlu1 %3058, %v2058_v45   ;;  %v2060_v54 = vld [vmem:[%s3291_s28 + $0x38] sm:$0xff]  ;;  %v2061_v55 = vld [vmem:[%s3291_s28 + $0x40] sm:$0xff]  ;;  %v724_v56 = vld [vmem:[#allocation2 + $0xa] sm:$0xff]  ;;  %v2904_v58 = vpack.c.bf16 %v2397_v53, %v2396_v52 }
  0x2c   : > { %2663 = vmatmul.mubr.msk.f32.gmra.mrb[8].mxu1 %vm349_vm0, %v393_v5  ;;  %2784 = vmatmul.mubr.msk.f32.gmra.mrb[2].mxu0 %vm349_vm0, %v3242_v6  ;;  %v3366_v57 = vld [vmem:[#allocation2 + $0x12] sm:$0xff]  ;;  %v726_v61 = vld [vmem:[#allocation2 + $0x1a] sm:$0xff]  ;;  %v727_v62 = vld [vmem:[#allocation2 + $0x22] sm:$0xff] }
  0x2d   : > { %2665 = vmatprep.mubr.msk.f32.mxu1 %vm349_vm0, %v394_v8  ;;  %2786 = vmatprep.mubr.msk.f32.mxu0 %vm349_vm0, %v3246_v9  ;;  %v2063_v60 = vld [vmem:[%s3291_s28 + $0x50] sm:$0xff]  ;;  %v2477_v5 = vld [vmem:[%s3512_s2 + $0x118] sm:$0xff]  ;;  %v1683_v23 = vld [vmem:[#allocation2 + $0x65] sm:$0xff] }
  0x2e   : > { %2931 = vmatpush3.bf16.msra.mxu0 %v2928_v1  ;;  %v728_v0 = vld [vmem:[#allocation2 + $0x2a] sm:$0xff]  ;;  %v1673_v3 = vld [vmem:[#allocation2 + $0x15] sm:$0xff]  ;;  %v1674_v8 = vld [vmem:[#allocation2 + $0x1d] sm:$0xff] }
  0x2f   : > { %2933 = vmatprep.subr.bf16.mxu0 %v3248_v10  ;;  %2087 = vperm.xlu0 %3057, %v2057_v44   ;;  %v1494_v1 = vld [vmem:[#allocation2 + $0x6c] sm:$0xff]  ;;  %v1677_v16 = vld [vmem:[#allocation2 + $0x35] sm:$0xff]  ;;  %v1872_v37 = vld [vmem:[#allocation2 + $0x5e] sm:$0xff] }
  0x30   : > { %2666 = vmatmul.mubr.msk.f32.gmra.mrb[10].mxu1 %vm349_vm0, %v395_v11  ;;  %2787 = vmatmul.mubr.msk.f32.gmra.mrb[4].mxu0 %vm349_vm0, %v3256_v12  ;;  %v1675_v11 = vld [vmem:[#allocation2 + $0x25] sm:$0xff]  ;;  %v734_v17 = vld [vmem:[#allocation2 + $0x5a] sm:$0xff]  ;;  %v1684_v24 = vld [vmem:[#allocation2 + $0x6d] sm:$0xff] }
  0x31   : > { %2676 = vmatprep.mubr.msk.f32.mxu1 %vm349_vm0, %v368_v14  ;;  %2789 = vmatprep.mubr.msk.f32.mxu0 %vm349_vm0, %v3258_v15  ;;  %v1676_v14 = vld [vmem:[#allocation2 + $0x2d] sm:$0xff]  ;;  %v1109_v30 = vld [vmem:[#allocation2 + $0x3b] sm:$0xff] }
  0x32   : > { %2102 = vperm.xlu1 %3058, %v2060_v54   ;;  %v1869_v31 = vld [vmem:[#allocation2 + $0x46] sm:$0xff]  ;;  %v1871_v35 = vld [vmem:[#allocation2 + $0x56] sm:$0xff] }
  0x33   : > { %2097 = vperm.xlu0 %3057, %v2059_v49   ;;  %v1112_v36 = vld [vmem:[#allocation2 + $0x53] sm:$0xff]  ;;  %v1113_v38 = vld [vmem:[#allocation2 + $0x5b] sm:$0xff] }
  0x34   : > { %2677 = vmatmul.mubr.msk.f32.vlgmr.msra.gmra.mrb[0].mxu1 %vm349_vm0, %v369_v18  ;;  %2790 = vmatmul.mubr.msk.f32.gmra.mrb[6].mxu0 %vm349_vm0, %v3273_v19  ;;  %v1678_v18 = vld [vmem:[#allocation2 + $0x3d] sm:$0xff] }
  0x35   : > { %2895 = vmatpush3.bf16.msra.mxu1 %v2892_v59  ;;  %2679 = vmatprep.mubr.msk.f32.mxu1 %vm349_vm0, %v370_v20  ;;  %v2062_v59 = vld [vmem:[%s3291_s28 + $0x48] sm:$0xff] }
  0x36   : > { %2792 = vmatprep.mubr.msk.f32.mxu0 %vm349_vm0, %v3275_v22  ;;  %2897 = vmatprep.subr.bf16.mxu1 %v2896_v21  ;;  %v1680_v20 = vld [vmem:[#allocation2 + $0x4d] sm:$0xff] }
  0x37   : > { %2107 = vperm.xlu0 %3057, %v2061_v55   ;;  %2112 = vperm.xlu1 %3058, %v2062_v59  }
  0x38   : > { %2680 = vmatmul.mubr.msk.f32.gmra.mrb[2].mxu1 %vm349_vm0, %v371_v25  ;;  %2793 = vmatmul.mubr.msk.f32.gmra.mrb[8].mxu0 %vm349_vm0, %v3294_v26  ;;  %v1863_v25 = vld [vmem:[#allocation2 + $0x16] sm:$0xff] }
  0x39   : > { %2682 = vmatprep.mubr.msk.f32.mxu1 %vm349_vm0, %v372_v27  ;;  %2795 = vmatprep.mubr.msk.f32.mxu0 %vm349_vm0, %v3298_v28  ;;  %v1866_v27 = vld [vmem:[#allocation2 + $0x2e] sm:$0xff] }
  0x3a   : > { %2899 = vmatpush3.bf16.msra.mxu1 %v2896_v21  ;;  %v1681_v21 = vld [vmem:[#allocation2 + $0x55] sm:$0xff] }
  0x3b   : > { %2901 = vmatprep.subr.bf16.mxu1 %v3300_v29  ;;  %2117 = vperm.xlu0 %3057, %v2063_v60  }
  0x3c   : > { %2683 = vmatmul.mubr.msk.f32.gmra.mrb[4].mxu1 %vm349_vm0, %v373_v32  ;;  %2796 = vmatmul.mubr.msk.f32.gmra.mrb[10].mxu0 %vm349_vm0, %v3310_v33  ;;  %v1110_v32 = vld [vmem:[#allocation2 + $0x43] sm:$0xff] }
  0x3d   : > { %2685 = vmatprep.mubr.msk.f32.mxu1 %vm349_vm0, %v374_v34  ;;  %2806 = vmatprep.mubr.msk.f32.mxu0 %vm349_vm0, %v3228_v63  ;;  %v2064_v63 = vld [vmem:[%s3291_s28 + $0x58] sm:$0xff]  ;;  %v1111_v34 = vld [vmem:[#allocation2 + $0x4b] sm:$0xff] }
  0x3e   : > { %2122 = vperm.xlu1 %3058, %v2064_v63  }
  0x40   : > { %2686 = vmatmul.mubr.msk.f32.gmra.mrb[6].mxu1 %vm349_vm0, %v375_v39  ;;  %2807 = vmatmul.mubr.msk.f32.vlgmr.msra.gmra.mrb[0].mxu0 %vm349_vm0, %v3230_v2  ;;  %v729_v2 = vld [vmem:[#allocation2 + $0x32] sm:$0xff]  ;;  %v1873_v39 = vld [vmem:[#allocation2 + $0x66] sm:$0xff] }
  0x41   : > { %2935 = vmatpush3.bf16.msra.mxu0 %v3248_v10  ;;  %2688 = vmatprep.mubr.msk.f32.mxu1 %vm349_vm0, %v376_v40  ;;  %v2944_v10 = vpack.c.bf16 %v2477_v5, %v2476_v4  ;;  %v1114_v40 = vld [vmem:[#allocation2 + $0x63] sm:$0xff] }
  0x42   : > { %2809 = vmatprep.mubr.msk.f32.mxu0 %vm349_vm0, %v3242_v6  ;;  %2937 = vmatprep.subr.bf16.mxu0 %v2936_v41  ;;  %v730_v6 = vld [vmem:[#allocation2 + $0x3a] sm:$0xff] }
  0x44   : > { %2689 = vmatmul.mubr.msk.f32.gmra.mrb[8].mxu1 %vm349_vm0, %v377_v46  ;;  %2810 = vmatmul.mubr.msk.f32.gmra.mrb[2].mxu0 %vm349_vm0, %v3246_v9  ;;  %v731_v9 = vld [vmem:[#allocation2 + $0x42] sm:$0xff] }
  0x45   : > { %2691 = vmatprep.mubr.msk.f32.mxu1 %vm349_vm0, %v378_v47  ;;  %2812 = vmatprep.mubr.msk.f32.mxu0 %vm349_vm0, %v3256_v12  ;;  %v732_v12 = vld [vmem:[#allocation2 + $0x4a] sm:$0xff] }
  0x46   : > { %2939 = vmatpush3.bf16.msra.mxu0 %v2936_v41  ;;  %v1874_v41 = vld [vmem:[#allocation2 + $0x6e] sm:$0xff] }
  0x47   : > { %2941 = vmatprep.subr.bf16.mxu0 %v3342_v48 }
  0x48   : > { %2692 = vmatmul.mubr.msk.f32.gmra.mrb[10].mxu1 %vm349_vm0, %v379_v50  ;;  %2813 = vmatmul.mubr.msk.f32.gmra.mrb[4].mxu0 %vm349_vm0, %v3258_v15  ;;  %v733_v15 = vld [vmem:[#allocation2 + $0x52] sm:$0xff] }
  0x49   : > { %2702 = vmatprep.mubr.msk.f32.mxu1 %vm349_vm0, %v723_v51  ;;  %2815 = vmatprep.mubr.msk.f32.mxu0 %vm349_vm0, %v3273_v19  ;;  %v1679_v19 = vld [vmem:[#allocation2 + $0x45] sm:$0xff] }
  0x4c   : > { %2703 = vmatmul.mubr.msk.f32.vlgmr.msra.gmra.mrb[0].mxu1 %vm349_vm0, %v724_v56  ;;  %2816 = vmatmul.mubr.msk.f32.gmra.mrb[6].mxu0 %vm349_vm0, %v3275_v22  ;;  %v1682_v22 = vld [vmem:[#allocation2 + $0x5d] sm:$0xff] }
  0x4d   : > { %2903 = vmatpush3.bf16.msra.mxu1 %v3300_v29  ;;  %2705 = vmatprep.mubr.msk.f32.mxu1 %vm349_vm0, %v3366_v57  ;;  %v1868_v29 = vld [vmem:[#allocation2 + $0x3e] sm:$0xff] }
  0x4e   : > { %2818 = vmatprep.mubr.msk.f32.mxu0 %vm349_vm0, %v3294_v26  ;;  %2905 = vmatprep.subr.bf16.mxu1 %v2904_v58  ;;  %v1865_v26 = vld [vmem:[#allocation2 + $0x26] sm:$0xff] }
  0x50   : > { %2706 = vmatmul.mubr.msk.f32.gmra.mrb[2].mxu1 %vm349_vm0, %v726_v61  ;;  %2819 = vmatmul.mubr.msk.f32.gmra.mrb[8].mxu0 %vm349_vm0, %v3298_v28  ;;  %v924_v28 = vld [vmem:[#allocation2 + $0x62] sm:$0xff] }
  0x51   : > { %2708 = vmatprep.mubr.msk.f32.mxu1 %vm349_vm0, %v727_v62  ;;  %2821 = vmatprep.mubr.msk.f32.mxu0 %vm349_vm0, %v3310_v33  ;;  %v1870_v33 = vld [vmem:[#allocation2 + $0x4e] sm:$0xff] }
  0x52   : > { %2907 = vmatpush3.bf16.msra.mxu1 %v2904_v58 }
  0x53   : > { %2948 = vmatprep.subr.bf16.mxu1 %v3130_v7 }
  0x54   : > { %2709 = vmatmul.mubr.msk.f32.gmra.mrb[4].mxu1 %vm349_vm0, %v728_v0  ;;  %2822 = vmatmul.mubr.msk.f32.gmra.mrb[10].mxu0 %vm349_vm0, %v1494_v1 }
  0x55   : > { %2711 = vmatprep.mubr.msk.f32.mxu1 %vm349_vm0, %v729_v2  ;;  %2832 = vmatprep.mubr.msk.f32.mxu0 %vm349_vm0, %v1673_v3 }
  0x58   : > { %2712 = vmatmul.mubr.msk.f32.gmra.mrb[6].mxu1 %vm349_vm0, %v730_v6  ;;  %2833 = vmatmul.mubr.msk.f32.vlgmr.msra.gmra.mrb[0].mxu0 %vm349_vm0, %v1674_v8 }
  0x59   : > { %2943 = vmatpush3.bf16.msra.mxu0 %v3342_v48  ;;  %2714 = vmatprep.mubr.msk.f32.mxu1 %vm349_vm0, %v731_v9 }
  0x5a   : > { %2835 = vmatprep.mubr.msk.f32.mxu0 %vm349_vm0, %v1675_v11  ;;  %2945 = vmatprep.subr.bf16.mxu0 %v2944_v10 }
  0x5c   : > { %2715 = vmatmul.mubr.msk.f32.gmra.mrb[8].mxu1 %vm349_vm0, %v732_v12  ;;  %2836 = vmatmul.mubr.msk.f32.gmra.mrb[2].mxu0 %vm349_vm0, %v1676_v14 }
  0x5d   : > { %2717 = vmatprep.mubr.msk.f32.mxu1 %vm349_vm0, %v733_v15  ;;  %2838 = vmatprep.mubr.msk.f32.mxu0 %vm349_vm0, %v1677_v16 }
  0x5e   : > { %2947 = vmatpush3.bf16.msra.mxu0 %v2944_v10 }
  0x60   : > { %2718 = vmatmul.mubr.msk.f32.gmra.mrb[10].mxu1 %vm349_vm0, %v734_v17  ;;  %2839 = vmatmul.mubr.msk.f32.gmra.mrb[4].mxu0 %vm349_vm0, %v1678_v18 }
  0x61   : > { %2728 = vmatprep.mubr.msk.f32.mxu1 %vm349_vm0, %v724_v56  ;;  %2841 = vmatprep.mubr.msk.f32.mxu0 %vm349_vm0, %v1679_v19 }
  0x64   : > { %2729 = vmatmul.mubr.msk.f32.vlgmr.msra.gmra.mrb[0].mxu1 %vm349_vm0, %v3366_v57  ;;  %2842 = vmatmul.mubr.msk.f32.gmra.mrb[6].mxu0 %vm349_vm0, %v1680_v20 }
  0x65   : > { %2950 = vmatpush3.bf16.msra.mxu1 %v3130_v7  ;;  %2731 = vmatprep.mubr.msk.f32.mxu1 %vm349_vm0, %v726_v61  ;;  %v1864_v7 = vld [vmem:[#allocation2 + $0x1e] sm:$0xff] }
  0x66   : > { %2844 = vmatprep.mubr.msk.f32.mxu0 %vm349_vm0, %v1681_v21  ;;  %2949 = vmatprep.subr.bf16.mxu1 %v3142_v13 }
  0x68   : > { %2732 = vmatmul.mubr.msk.f32.gmra.mrb[2].mxu1 %vm349_vm0, %v727_v62  ;;  %2845 = vmatmul.mubr.msk.f32.gmra.mrb[8].mxu0 %vm349_vm0, %v1682_v22 }
  0x69   : > { %2734 = vmatprep.mubr.msk.f32.mxu1 %vm349_vm0, %v728_v0  ;;  %2847 = vmatprep.mubr.msk.f32.mxu0 %vm349_vm0, %v1683_v23 }
  0x6a   : > { %2951 = vmatpush3.bf16.msra.mxu1 %v3142_v13  ;;  %v1867_v13 = vld [vmem:[#allocation2 + $0x36] sm:$0xff] }
  0x6c   : > { %2735 = vmatmul.mubr.msk.f32.gmra.mrb[4].mxu1 %vm349_vm0, %v729_v2  ;;  %2848 = vmatmul.mubr.msk.f32.gmra.mrb[10].mxu0 %vm349_vm0, %v1684_v24 }
  0x6d   : > { %2737 = vmatprep.mubr.msk.f32.mxu1 %vm349_vm0, %v730_v6  ;;  %2858 = vmatprep.mubr.msk.f32.mxu0 %vm349_vm0, %v1863_v25 }
  0x70   : > { %2738 = vmatmul.mubr.msk.f32.gmra.mrb[6].mxu1 %vm349_vm0, %v731_v9  ;;  %2859 = vmatmul.mubr.msk.f32.vlgmr.msra.gmra.mrb[0].mxu0 %vm349_vm0, %v1864_v7 }
  0x71   : > { %2740 = vmatprep.mubr.msk.f32.mxu1 %vm349_vm0, %v732_v12  ;;  %2861 = vmatprep.mubr.msk.f32.mxu0 %vm349_vm0, %v1865_v26 }
  0x74   : > { %2741 = vmatmul.mubr.msk.f32.gmra.mrb[8].mxu1 %vm349_vm0, %v733_v15  ;;  %2862 = vmatmul.mubr.msk.f32.gmra.mrb[2].mxu0 %vm349_vm0, %v1866_v27 }
  0x75   : > { %2743 = vmatprep.mubr.msk.f32.mxu1 %vm349_vm0, %v734_v17  ;;  %2864 = vmatprep.mubr.msk.f32.mxu0 %vm349_vm0, %v1867_v13 }
  0x78   : > { %2744 = vmatmul.mubr.msk.f32.gmra.mrb[10].mxu1 %vm349_vm0, %v924_v28  ;;  %2865 = vmatmul.mubr.msk.f32.gmra.mrb[4].mxu0 %vm349_vm0, %v1868_v29 }
  0x79   : > { %2763 = vmatprep.mubr.msk.f32.mxu1 %vm349_vm0, %v1109_v30  ;;  %2867 = vmatprep.mubr.msk.f32.mxu0 %vm349_vm0, %v1869_v31 }
  0x7c   : > { %2764 = vmatmul.mubr.msk.f32.vlgmr.msra.gmra.mrb[6].mxu1 %vm349_vm0, %v1110_v32  ;;  %2868 = vmatmul.mubr.msk.f32.gmra.mrb[6].mxu0 %vm349_vm0, %v1870_v33 }
  0x7d   : > { %2766 = vmatprep.mubr.msk.f32.mxu1 %vm349_vm0, %v1111_v34  ;;  %2870 = vmatprep.mubr.msk.f32.mxu0 %vm349_vm0, %v1871_v35 }
  0x80   : > { %2767 = vmatmul.mubr.msk.f32.gmra.mrb[8].mxu1 %vm349_vm0, %v1112_v36  ;;  %2871 = vmatmul.mubr.msk.f32.gmra.mrb[8].mxu0 %vm349_vm0, %v1872_v37 }
  0x81   : > { %2769 = vmatprep.mubr.msk.f32.mxu1 %vm349_vm0, %v1113_v38  ;;  %2873 = vmatprep.mubr.msk.f32.mxu0 %vm349_vm0, %v1873_v39 }
  0x84   : > { %2770 = vmatmul.mubr.msk.f32.gmra.mrb[10].mxu1 %vm349_vm0, %v1114_v40  ;;  %2874 = vmatmul.mubr.msk.f32.gmra.mrb[10].mxu0 %vm349_vm0, %v1874_v41 }
  0x99   : > { %v2078_v45 = vpop.permute.xlu1 %2077 }
  0xa2   : > { %v2083_v50 = vpop.permute.xlu1 %2082 }
  0xa6   : > { %v2068_v44 = vpop.permute.xlu0 %2067 }
  0xaa   : > { %v2073_v48 = vpop.permute.xlu0 %2072  ;;  %v2093_v57 = vpop.permute.xlu1 %2092 }
  0xae   : > { %v2088_v55 = vpop.permute.xlu0 %2087 }
  0xb1   : > { %v2103_v12 = vpop.permute.xlu1 %2102 }
  0xb2   : > { %v2098_v8 = vpop.permute.xlu0 %2097 }
  0xb6   : > { %v2108_v36 = vpop.permute.xlu0 %2107  ;;  %v2113_v37 = vpop.permute.xlu1 %2112 }
 0x137   : > { %v2730_v42 = vpop.f32.mrb[0].mxu1 }
 0x138   : > { %v1032_v43 = vpop.f32.mrb[1].mxu1 }
 0x13b   : > { %v2733_v46 = vpop.f32.mrb[2].mxu1 }
 0x13c   : > { %v1042_v47 = vpop.f32.mrb[3].mxu1 }
 0x13f   : > { %v2736_v49 = vpop.f32.mrb[4].mxu1 }
 0x140   : > { %v1052_v51 = vpop.f32.mrb[5].mxu1 }
 0x143   : > { %v2860_v52 = vpop.f32.mrb[0].mxu0 }
 0x144   : > { %v2952_v53 = vadd.f32 %v2860_v52, %v2730_v42  ;;  %v1982_v54 = vpop.f32.mrb[1].mxu0 }
 0x145   : > { %v2953_v56 = vadd.f32 %v1982_v54, %v1032_v43 }
 0x146   : > { %v2126_v58 = vmul.f32 %v2952_v53, %v2073_v48  ;;  %2211 = vst.msk [vmem:[%s3452_s23 + $0x8] sm:$0xff] %vm2137_vm1, %v2952_v53 }
 0x147   : > { %v2125_v59 = vmul.f32 %v2953_v56, %v2068_v44  ;;  %2210 = vst.msk [vmem:[%s3452_s23] sm:$0xff] %vm2137_vm1, %v2953_v56  ;;  %v2863_v60 = vpop.f32.mrb[2].mxu0 }
 0x148   : > { %v2139_v61 = vsel %vm2137_vm1, %v2126_v58, 0.0  ;;  %v2169_v62 = vmul.f32 %v2952_v53, %v2126_v58  ;;  %v2954_v63 = vadd.f32 %v2863_v60, %v2733_v46  ;;  %v1992_v0 = vpop.f32.mrb[3].mxu0 }
 0x149   : > { %v2138_v1 = vsel %vm2137_vm1, %v2125_v59, 0.0  ;;  %v2168_v2 = vmul.f32 %v2953_v56, %v2125_v59  ;;  %v2955_v3 = vadd.f32 %v1992_v0, %v1042_v47 }
 0x14a   : > { %v2181_v4 = vsel %vm2137_vm1, %v2169_v62, 0.0  ;;  %v2140_v5 = vadd.f32 %v2139_v61, %v2138_v1  ;;  %v2128_v6 = vmul.f32 %v2954_v63, %v2083_v50  ;;  %2213 = vst.msk [vmem:[%s3452_s23 + $0x18] sm:$0xff] %vm2137_vm1, %v2954_v63 }
 0x14b   : > { %v2180_v9 = vsel %vm2137_vm1, %v2168_v2, 0.0  ;;  %v2127_v10 = vmul.f32 %v2955_v3, %v2078_v45  ;;  %2212 = vst.msk [vmem:[%s3452_s23 + $0x10] sm:$0xff] %vm2137_vm1, %v2955_v3  ;;  %v2866_v11 = vpop.f32.mrb[4].mxu0 }
 0x14c   : > { %v2182_v14 = vadd.f32 %v2181_v4, %v2180_v9  ;;  %v2171_v15 = vmul.f32 %v2954_v63, %v2128_v6  ;;  %v2956_v16 = vadd.f32 %v2866_v11, %v2736_v49  ;;  %v2002_v17 = vpop.f32.mrb[5].mxu0  ;;  %v2143_v23 = vsel %vm2137_vm1, %v2128_v6, 0.0  ;;  %v2123_v9 = vpop.permute.xlu1 %2122 }
 0x14d   : > { %v2141_v18 = vsel %vm2137_vm1, %v2127_v10, 0.0  ;;  %v2170_v19 = vmul.f32 %v2955_v3, %v2127_v10  ;;  %v2957_v20 = vadd.f32 %v2002_v17, %v1052_v51 }
 0x14e   : > { %v2142_v21 = vadd.f32 %v2141_v18, %v2140_v5  ;;  %v2130_v22 = vmul.f32 %v2956_v16, %v2093_v57  ;;  %2215 = vst.msk [vmem:[%s3452_s23 + $0x28] sm:$0xff] %vm2137_vm1, %v2956_v16  ;;  %v2185_v27 = vsel %vm2137_vm1, %v2171_v15, 0.0 }
 0x14f   : > { %v2183_v24 = vsel %vm2137_vm1, %v2170_v19, 0.0  ;;  %v2129_v25 = vmul.f32 %v2957_v20, %v2088_v55  ;;  %2214 = vst.msk [vmem:[%s3452_s23 + $0x20] sm:$0xff] %vm2137_vm1, %v2957_v20  ;;  %v2765_v7 = vpop.f32.mrb[6].mxu1  ;;  %v2869_v26 = vpop.f32.mrb[6].mxu0 }
 0x150   : > { %v2184_v13 = vadd.f32 %v2183_v24, %v2182_v14  ;;  %v2173_v28 = vmul.f32 %v2956_v16, %v2130_v22  ;;  %v2144_v29 = vadd.f32 %v2143_v23, %v2142_v21  ;;  %v1252_v30 = vpop.f32.mrb[7].mxu1  ;;  %v2012_v31 = vpop.f32.mrb[7].mxu0  ;;  %v2958_v34 = vadd.f32 %v2869_v26, %v2765_v7 }
 0x151   : > { %v2145_v32 = vsel %vm2137_vm1, %v2129_v25, 0.0  ;;  %v2172_v33 = vmul.f32 %v2957_v20, %v2129_v25  ;;  %v2959_v35 = vadd.f32 %v2012_v31, %v1252_v30  ;;  %v2147_v40 = vsel %vm2137_vm1, %v2130_v22, 0.0 }
 0x152   : > { %v2146_v38 = vadd.f32 %v2145_v32, %v2144_v29  ;;  %v2186_v39 = vadd.f32 %v2185_v27, %v2184_v13  ;;  %v2132_v42 = vmul.f32 %v2958_v34, %v2103_v12  ;;  %2217 = vst.msk [vmem:[%s3452_s23 + $0x38] sm:$0xff] %vm2137_vm1, %v2958_v34  ;;  %v2189_v51 = vsel %vm2137_vm1, %v2173_v28, 0.0 }
 0x153   : > { %v2187_v41 = vsel %vm2137_vm1, %v2172_v33, 0.0  ;;  %v2131_v43 = vmul.f32 %v2959_v35, %v2098_v8  ;;  %2216 = vst.msk [vmem:[%s3452_s23 + $0x30] sm:$0xff] %vm2137_vm1, %v2959_v35  ;;  %v2768_v44 = vpop.f32.mrb[8].mxu1  ;;  %v2872_v45 = vpop.f32.mrb[8].mxu0 }
 0x154   : > { %v2188_v46 = vadd.f32 %v2187_v41, %v2186_v39  ;;  %v2148_v47 = vadd.f32 %v2147_v40, %v2146_v38  ;;  %v2960_v48 = vadd.f32 %v2872_v45, %v2768_v44  ;;  %v1262_v49 = vpop.f32.mrb[9].mxu1  ;;  %v2022_v50 = vpop.f32.mrb[9].mxu0  ;;  %v2175_v52 = vmul.f32 %v2958_v34, %v2132_v42 }
 0x155   : > { %v2149_v53 = vsel %vm2137_vm1, %v2131_v43, 0.0  ;;  %v2174_v54 = vmul.f32 %v2959_v35, %v2131_v43  ;;  %v2961_v58 = vadd.f32 %v2022_v50, %v1262_v49  ;;  %v2151_v62 = vsel %vm2137_vm1, %v2132_v42, 0.0  ;;  %v2118_v8 = vpop.permute.xlu0 %2117 }
 0x156   : > { %v2150_v55 = vadd.f32 %v2149_v53, %v2148_v47  ;;  %v2190_v56 = vadd.f32 %v2189_v51, %v2188_v46  ;;  %v2134_v57 = vmul.f32 %v2960_v48, %v2113_v37  ;;  %2219 = vst.msk [vmem:[%s3452_s23 + $0x48] sm:$0xff] %vm2137_vm1, %v2960_v48  ;;  %v2193_v3 = vsel %vm2137_vm1, %v2175_v52, 0.0 }
 0x157   : > { %v2191_v59 = vsel %vm2137_vm1, %v2174_v54, 0.0  ;;  %v2771_v60 = vpop.f32.mrb[10].mxu1  ;;  %v2875_v61 = vpop.f32.mrb[10].mxu0  ;;  %v2133_v0 = vmul.f32 %v2961_v58, %v2108_v36  ;;  %2218 = vst.msk [vmem:[%s3452_s23 + $0x40] sm:$0xff] %vm2137_vm1, %v2961_v58 }
 0x158   : > { %v2192_v63 = vadd.f32 %v2191_v59, %v2190_v56  ;;  %v1272_v1 = vpop.f32.mrb[11].mxu1  ;;  %v2032_v2 = vpop.f32.mrb[11].mxu0  ;;  %v2152_v4 = vadd.f32 %v2151_v62, %v2150_v55  ;;  %v2962_v5 = vadd.f32 %v2875_v61, %v2771_v60  ;;  %v2177_v10 = vmul.f32 %v2960_v48, %v2134_v57 }
 0x159   : > { %v2963_v6 = vadd.f32 %v2032_v2, %v1272_v1  ;;  %v2153_v11 = vsel %vm2137_vm1, %v2133_v0, 0.0  ;;  %v2176_v12 = vmul.f32 %v2961_v58, %v2133_v0  ;;  %v2155_v18 = vsel %vm2137_vm1, %v2134_v57, 0.0 }
 0x15a   : > { %v2194_v14 = vadd.f32 %v2193_v3, %v2192_v63  ;;  %v2154_v15 = vadd.f32 %v2153_v11, %v2152_v4  ;;  %v2136_v16 = vmul.f32 %v2962_v5, %v2123_v9  ;;  %2221 = vst.msk [vmem:[%s3452_s23 + $0x58] sm:$0xff] %vm2137_vm1, %v2962_v5  ;;  %v2197_v22 = vsel %vm2137_vm1, %v2177_v10, 0.0 }
 0x15b   : > { %v2135_v17 = vmul.f32 %v2963_v6, %v2118_v8  ;;  %2220 = vst.msk [vmem:[%s3452_s23 + $0x50] sm:$0xff] %vm2137_vm1, %v2963_v6  ;;  %v2195_v19 = vsel %vm2137_vm1, %v2176_v12, 0.0 }
 0x15c   : > { %v2196_v20 = vadd.f32 %v2195_v19, %v2194_v14  ;;  %v2156_v21 = vadd.f32 %v2155_v18, %v2154_v15  ;;  %v2179_v23 = vmul.f32 %v2962_v5, %v2136_v16  ;;  %v2159_v27 = vsel %vm2137_vm1, %v2136_v16, 0.0 }
 0x15d   : > { %v2157_v24 = vsel %vm2137_vm1, %v2135_v17, 0.0  ;;  %v2178_v25 = vmul.f32 %v2963_v6, %v2135_v17 }
 0x15e   : > { %v2158_v7 = vadd.f32 %v2157_v24, %v2156_v21  ;;  %v2198_v26 = vadd.f32 %v2197_v22, %v2196_v20  ;;  %v2201_v30 = vsel %vm2137_vm1, %v2179_v23, 0.0 }
 0x15f   : > { %v2199_v13 = vsel %vm2137_vm1, %v2178_v25, 0.0 }
 0x160   : > { %v2160_v28 = vadd.f32 %v2159_v27, %v2158_v7  ;;  %v2200_v29 = vadd.f32 %v2199_v13, %v2198_v26 }
 0x162   : > { %v2161_v31 = vrot.slane %v2160_v28, 4  ;;  %v2202_v32 = vadd.f32 %v2201_v30, %v2200_v29 }
 0x164   : > { %v2162_v33 = vadd.f32 %v2161_v31, %v2160_v28  ;;  %v2203_v34 = vrot.slane %v2202_v32, 4 }
 0x166   : > { %v2163_v35 = vrot.slane %v2162_v33, 2  ;;  %v2204_v36 = vadd.f32 %v2203_v34, %v2202_v32 }
 0x168   : > { %v2164_v37 = vadd.f32 %v2163_v35, %v2162_v33  ;;  %v2205_v38 = vrot.slane %v2204_v36, 2 }
 0x16a   : > { %v2165_v39 = vrot.slane %v2164_v37, 1  ;;  %v2206_v40 = vadd.f32 %v2205_v38, %v2204_v36 }
 0x16c   : > { %v2166_v41 = vadd.f32 %v2165_v39, %v2164_v37  ;;  %v2207_v42 = vrot.slane %v2206_v40, 1 }
 0x16e   : > { %v2208_v43 = vadd.f32 %v2207_v42, %v2206_v40  ;;  %2223 = vst.msk [vmem:[%s336_s24] sm:$0x1] %vm2222_vm2, %v2166_v41 }
 0x170   : > { %2224 = vst.msk [vmem:[%s336_s24 + $0x1] sm:$0x1] %vm2222_vm2, %v2208_v43 }
 0x171 PF: > { %s16_s18 = sadd.s32 1, %s3065_s18  }
 0x172   : > { %p13_p7 = scmp.ge.s32.totalorder %s16_s18, 5  }
 0x174   :  { %15 = sbr.rel (!%p13_p7) target bundleno = 1 (0x1), region = 92 }

// kernel: discriminator_forward.6
= control target key start
LH: loop header
LB: loop body
LE: loop exit
PB: predicated region body
PF: predicated region fallthrough
CT: control target
= control target key end

     0   :  { %s1742_s24 = smov 0   ;;  %s2348_s0 = inlined_call_operand.vmem [shape: f32[72,256], index: 0, kind: input, shape index: {}, may-alias: {0,1}]   ;;  %s2349_s1 = inlined_call_operand.vmem [shape: f32[72,256], index: 1, kind: input, shape index: {}, may-alias: {0,1}]   ;;  %s2350_s2 = inlined_call_operand.vmem [shape: f32[4,256,128], index: 2, kind: input, shape index: {}]   ;;  %s2351_s3 = inlined_call_operand.vmem [shape: f32[1,256], index: 3, kind: input, shape index: {}]   ;;  %s2352_s4 = inlined_call_operand.vmem [shape: f32[1,256], index: 4, kind: input, shape index: {}]   ;;  %s2353_s5 = inlined_call_operand.vmem [shape: f32[72,1], index: 5, kind: input, shape index: {}]   ;;  %s2354_s6 = inlined_call_operand.vmem [shape: f32[64,128], index: 6, kind: output, shape index: {0}]   ;;  %s2355_s7 = inlined_call_operand.vmem [shape: f32[16,128], index: 7, kind: output, shape index: {1}]  }
   0x1 LB: > { %s1748_s25 = sadd.s32 4294967295, %s1699_s24   ;;  %p1260_p0 = scmp.ge.s32.totalorder %s1699_s24, 1  ;;  %s1699_s24 = sphi %s1742_s24, %s18_s24  }
   0x2   : > { %p289_p1 = scmp.lt.s32.totalorder %s1699_s24, 3 }
   0x4   : > { %p290_p2 = pnand %p1260_p0, %p289_p1 }
   0x5   : > { %v1288_v0 = vld [vmem:[%s2350_s2 + $0x180] sm:$0xff] (!%p290_p2)  ;;  %v1289_v1 = vld [vmem:[%s2350_s2 + $0x188] sm:$0xff] (!%p290_p2)  ;;  %v1290_v11 = vld [vmem:[%s2350_s2 + $0x190] sm:$0xff] (!%p290_p2)  ;;  %v1701_v16 = vmov (!%p290_p2), 0   ;;  %s1807_s18 = sshll.u32 (!%p290_p2), %s1748_s25, 2  ;;  %v408_v48 = vlaneseq (!%p290_p2)  ;;  %vm574_vm0 = vcmask (!%p290_p2), 1046528  }
   0x6   : > { %293 = sbr.rel (%p290_p2) target bundleno = 330 (0x14a), region = 44  ;;  %v505_v2 = vld [vmem:[%s2350_s2 + $0x80] sm:$0xff] (!%p290_p2)  ;;  %v1554_v3 = vpack.c.bf16 (!%p290_p2), %v1289_v1, %v1288_v0  ;;  %v506_v4 = vld [vmem:[%s2350_s2 + $0x88] sm:$0xff] (!%p290_p2)  ;;  %v1291_v13 = vld [vmem:[%s2350_s2 + $0x198] sm:$0xff] (!%p290_p2)  ;;  %1691 = vset.pattern.permute.xlu0 (!%p290_p2), %v1701_v16  ;;  %1692 = vset.pattern.permute.xlu1 (!%p290_p2), %v1701_v16  ;;  %p353_p3 = scmp.lt.s32.totalorder (!%p290_p2), %s1807_s18, 8  ;;  %vm969_vm1 = vcmask (!%p290_p2), 1041408  }
   0x7   : > { %v1272_v5 = vld [vmem:[%s2350_s2 + $0x100] sm:$0xff] (!%p290_p2)  ;;  %v1273_v6 = vld [vmem:[%s2350_s2 + $0x108] sm:$0xff] (!%p290_p2)  ;;  %v1586_v7 = vpack.c.bf16 (!%p290_p2), %v506_v4, %v505_v2  ;;  %v507_v14 = vld [vmem:[%s2350_s2 + $0x90] sm:$0xff] (!%p290_p2)  ;;  %v1558_v17 = vpack.c.bf16 (!%p290_p2), %v1291_v13, %v1290_v11  ;;  %v409_v62 = vshrl.u32 (!%p290_p2), %v408_v48, 7  ;;  %s1376_s11 = sadd.s32 (!%p290_p2), 4, %s1807_s18  ;;  %vm812_vm2 = vcmask (!%p290_p2), 1042432  }
   0x8   : > { %v1556_v8 = vpack.c.bf16 (!%p290_p2), %v1273_v6, %v1272_v5  ;;  %v489_v9 = vld [vmem:[%s2350_s2] sm:$0xff] (!%p290_p2)  ;;  %v490_v10 = vld [vmem:[%s2350_s2 + $0x8] sm:$0xff] (!%p290_p2)  ;;  %1555 = vmatprep.subr.bf16.mxu0 (!%p290_p2), %v1554_v3  ;;  %v508_v15 = vld [vmem:[%s2350_s2 + $0x98] sm:$0xff] (!%p290_p2)  ;;  %p2008_p4 = scmp.lt.s32.totalorder (!%p290_p2), %s1376_s11, 8  ;;  %p388_p5 = scmp.lt.s32.totalorder (!%p290_p2), %s1807_s18, 7 }
   0x9   : > { %v1588_v12 = vpack.c.bf16 (!%p290_p2), %v490_v10, %v489_v9  ;;  %1587 = vmatprep.subr.bf16.mxu1 (!%p290_p2), %v1586_v7  ;;  %v1590_v18 = vpack.c.bf16 (!%p290_p2), %v508_v15, %v507_v14  ;;  %v1274_v19 = vld [vmem:[%s2350_s2 + $0x110] sm:$0xff] (!%p290_p2)  ;;  %v1275_v20 = vld [vmem:[%s2350_s2 + $0x118] sm:$0xff] (!%p290_p2)  ;;  %v1292_v24 = vld [vmem:[%s2350_s2 + $0x1a0] sm:$0xff] (!%p290_p2)  ;;  %v410_v13 = vsub.s32 (!%p290_p2), 0, %v409_v62  ;;  %p393_p6 = scmp.lt.s32.totalorder (!%p290_p2), %s1748_s25, 1 }
   0xa   : > { %1557 = vmatpush3.bf16.msra.mxu0 (!%p290_p2), %v1556_v8  ;;  %v491_v21 = vld [vmem:[%s2350_s2 + $0x10] sm:$0xff] (!%p290_p2)  ;;  %v1560_v22 = vpack.c.bf16 (!%p290_p2), %v1275_v20, %v1274_v19  ;;  %v492_v23 = vld [vmem:[%s2350_s2 + $0x18] sm:$0xff] (!%p290_p2)  ;;  %v1293_v25 = vld [vmem:[%s2350_s2 + $0x1a8] sm:$0xff] (!%p290_p2) }
   0xb   : > { %1589 = vmatpush3.bf16.msra.mxu1 (!%p290_p2), %v1588_v12  ;;  %1559 = vmatprep.subr.bf16.mxu0 (!%p290_p2), %v1558_v17  ;;  %v1592_v26 = vpack.c.bf16 (!%p290_p2), %v492_v23, %v491_v21  ;;  %v1562_v27 = vpack.c.bf16 (!%p290_p2), %v1293_v25, %v1292_v24  ;;  %v509_v28 = vld [vmem:[%s2350_s2 + $0xa0] sm:$0xff] (!%p290_p2)  ;;  %v510_v29 = vld [vmem:[%s2350_s2 + $0xa8] sm:$0xff] (!%p290_p2)  ;;  %v1294_v36 = vld [vmem:[%s2350_s2 + $0x1b0] sm:$0xff] (!%p290_p2)  ;;  %v414_v12 = vsub.s32 (!%p290_p2), 1, %v409_v62 }
   0xc   : > { %1591 = vmatprep.subr.bf16.mxu1 (!%p290_p2), %v1590_v18  ;;  %v1276_v30 = vld [vmem:[%s2350_s2 + $0x120] sm:$0xff] (!%p290_p2)  ;;  %v1594_v31 = vpack.c.bf16 (!%p290_p2), %v510_v29, %v509_v28  ;;  %v1277_v32 = vld [vmem:[%s2350_s2 + $0x128] sm:$0xff] (!%p290_p2)  ;;  %v1295_v37 = vld [vmem:[%s2350_s2 + $0x1b8] sm:$0xff] (!%p290_p2) }
   0xd   : > { %v493_v33 = vld [vmem:[%s2350_s2 + $0x20] sm:$0xff]  ;;  %v494_v34 = vld [vmem:[%s2350_s2 + $0x28] sm:$0xff]  ;;  %v1564_v35 = vpack.c.bf16 %v1277_v32, %v1276_v30  ;;  %v511_v38 = vld [vmem:[%s2350_s2 + $0xb0] sm:$0xff]  ;;  %v1566_v40 = vpack.c.bf16 %v1295_v37, %v1294_v36  ;;  %s1867_s14 = scalar_select %p353_p3, %s1807_s18, 8 }
   0xe   : > { %1561 = vmatpush3.bf16.msra.mxu0 %v1560_v22  ;;  %v1596_v39 = vpack.c.bf16 %v494_v34, %v493_v33  ;;  %v512_v41 = vld [vmem:[%s2350_s2 + $0xb8] sm:$0xff]  ;;  %v1278_v42 = vld [vmem:[%s2350_s2 + $0x130] sm:$0xff]  ;;  %v1296_v47 = vld [vmem:[%s2350_s2 + $0x1c0] sm:$0xff]  ;;  %s2358_s11 = smov (!%p2008_p4, %s1376_s11), 8  ;;  %s2360_s18 = smov (!%p388_p5, %s1807_s18), 7 }
   0xf   : > { %1593 = vmatpush3.bf16.msra.mxu1 %v1592_v26  ;;  %1563 = vmatprep.subr.bf16.mxu0 %v1562_v27  ;;  %v1279_v43 = vld [vmem:[%s2350_s2 + $0x138] sm:$0xff]  ;;  %v1598_v44 = vpack.c.bf16 %v512_v41, %v511_v38  ;;  %v495_v45 = vld [vmem:[%s2350_s2 + $0x30] sm:$0xff]  ;;  %v1297_v49 = vld [vmem:[%s2350_s2 + $0x1c8] sm:$0xff]  ;;  %s1374_s13 = sshll.u32 %s1867_s14, 4  ;;  %s1377_s10 = sshll.u32 %s2358_s11, 4 }
  0x10   : > { %1595 = vmatprep.subr.bf16.mxu1 %v1594_v31  ;;  %v496_v46 = vld [vmem:[%s2350_s2 + $0x38] sm:$0xff]  ;;  %v513_v50 = vld [vmem:[%s2350_s2 + $0xc0] sm:$0xff]  ;;  %v514_v51 = vld [vmem:[%s2350_s2 + $0xc8] sm:$0xff]  ;;  %v1568_v52 = vpack.c.bf16 %v1279_v43, %v1278_v42  ;;  %v1570_v54 = vpack.c.bf16 %v1297_v49, %v1296_v47  ;;  %s1927_s17 = scalar_lea.vmem %s2348_s0, %s1374_s13  ;;  %s370_s27 = scalar_lea.vmem %s2349_s1, %s1377_s10 }
  0x11   : > { %v1600_v53 = vpack.c.bf16 %v496_v46, %v495_v45  ;;  %v1280_v55 = vld [vmem:[%s2350_s2 + $0x140] sm:$0xff]  ;;  %v1281_v56 = vld [vmem:[%s2350_s2 + $0x148] sm:$0xff]  ;;  %v1602_v58 = vpack.c.bf16 %v514_v51, %v513_v50  ;;  %v1298_v60 = vld [vmem:[%s2350_s2 + $0x1d0] sm:$0xff]  ;;  %s1268_s28 = sshll.u32 %s1867_s14, 3  ;;  %s2362_s25 = smov (!%p393_p6, %s1748_s25), 1 }
  0x12   : > { %1565 = vmatpush3.bf16.msra.mxu0 %v1564_v35  ;;  %v497_v57 = vld [vmem:[%s2350_s2 + $0x40] sm:$0xff]  ;;  %v498_v59 = vld [vmem:[%s2350_s2 + $0x48] sm:$0xff]  ;;  %v1299_v61 = vld [vmem:[%s2350_s2 + $0x1d8] sm:$0xff]  ;;  %v1572_v1 = vpack.c.bf16 %v1281_v56, %v1280_v55  ;;  %s2208_s13 = scalar_lea.vmem %s2353_s5, %s1268_s28  ;;  %s1270_s28 = sshll.u32 %s2360_s18, 3 }
  0x13   : > { %1597 = vmatpush3.bf16.msra.mxu1 %v1596_v39  ;;  %1567 = vmatprep.subr.bf16.mxu0 %v1566_v40  ;;  %v515_v63 = vld [vmem:[%s2350_s2 + $0xd0] sm:$0xff]  ;;  %v516_v0 = vld [vmem:[%s2350_s2 + $0xd8] sm:$0xff]  ;;  %v1604_v3 = vpack.c.bf16 %v498_v59, %v497_v57  ;;  %v1574_v4 = vpack.c.bf16 %v1299_v61, %v1298_v60  ;;  %v1300_v9 = vld [vmem:[%s2350_s2 + $0x1e0] sm:$0xff]  ;;  %s2334_s15 = scalar_lea.vmem %s2354_s6, %s1270_s28  ;;  %s1271_s18 = sshll.u32 %s2362_s25, 3 }
  0x14   : > { %1599 = vmatprep.subr.bf16.mxu1 %v1598_v44  ;;  %v1282_v2 = vld [vmem:[%s2350_s2 + $0x150] sm:$0xff]  ;;  %v1283_v5 = vld [vmem:[%s2350_s2 + $0x158] sm:$0xff]  ;;  %v1606_v8 = vpack.c.bf16 %v516_v0, %v515_v63  ;;  %v1301_v10 = vld [vmem:[%s2350_s2 + $0x1e8] sm:$0xff]  ;;  %s396_s11 = scalar_lea.vmem %s2355_s7, %s1271_s18 }
  0x15   : > { %v499_v6 = vld [vmem:[%s2350_s2 + $0x50] sm:$0xff]  ;;  %v500_v7 = vld [vmem:[%s2350_s2 + $0x58] sm:$0xff]  ;;  %v517_v11 = vld [vmem:[%s2350_s2 + $0xe0] sm:$0xff]  ;;  %v1576_v17 = vpack.c.bf16 %v1283_v5, %v1282_v2  ;;  %v1578_v24 = vpack.c.bf16 %v1301_v10, %v1300_v9 }
  0x16   : > { %1569 = vmatpush3.bf16.msra.mxu0 %v1568_v52  ;;  %v518_v14 = vld [vmem:[%s2350_s2 + $0xe8] sm:$0xff]  ;;  %v1284_v15 = vld [vmem:[%s2350_s2 + $0x160] sm:$0xff]  ;;  %v1302_v20 = vld [vmem:[%s2350_s2 + $0x1f0] sm:$0xff]  ;;  %v1608_v23 = vpack.c.bf16 %v500_v7, %v499_v6 }
  0x17   : > { %1601 = vmatpush3.bf16.msra.mxu1 %v1600_v53  ;;  %1571 = vmatprep.subr.bf16.mxu0 %v1570_v54  ;;  %v1285_v16 = vld [vmem:[%s2350_s2 + $0x168] sm:$0xff]  ;;  %v501_v18 = vld [vmem:[%s2350_s2 + $0x60] sm:$0xff]  ;;  %v1303_v21 = vld [vmem:[%s2350_s2 + $0x1f8] sm:$0xff]  ;;  %v1610_v28 = vpack.c.bf16 %v518_v14, %v517_v11 }
  0x18   : > { %1603 = vmatprep.subr.bf16.mxu1 %v1602_v58  ;;  %v502_v19 = vld [vmem:[%s2350_s2 + $0x68] sm:$0xff]  ;;  %v519_v22 = vld [vmem:[%s2350_s2 + $0xf0] sm:$0xff]  ;;  %v520_v25 = vld [vmem:[%s2350_s2 + $0xf8] sm:$0xff]  ;;  %v1580_v35 = vpack.c.bf16 %v1285_v16, %v1284_v15  ;;  %v1582_v43 = vpack.c.bf16 %v1303_v21, %v1302_v20 }
  0x19   : > { %v397_v26 = vld [vmem:[%s2351_s3] sm:$0x3]  ;;  %v400_v29 = vld [vmem:[%s1927_s17 + $0x8] sm:$0xff]  ;;  %v402_v30 = vld [vmem:[%s1927_s17 + $0x18] sm:$0xff]  ;;  %v1612_v42 = vpack.c.bf16 %v502_v19, %v501_v18  ;;  %v1614_v44 = vpack.c.bf16 %v520_v25, %v519_v22 }
  0x1a   : > { %1573 = vmatpush3.bf16.msra.mxu0 %v1572_v1  ;;  %v398_v27 = vld [vmem:[%s2352_s4] sm:$0x3]  ;;  %v1955_v31 = vrot.slane %v397_v26, %v414_v12  ;;  %v1960_v34 = vrot.slane %v397_v26, %v410_v13  ;;  %v401_v36 = vld [vmem:[%s1927_s17 + $0x10] sm:$0xff]  ;;  %v1287_v46 = vld [vmem:[%s2350_s2 + $0x178] sm:$0xff] }
  0x1b   : > { %1605 = vmatpush3.bf16.msra.mxu1 %v1604_v3  ;;  %1575 = vmatprep.subr.bf16.mxu0 %v1574_v4  ;;  %v1957_v32 = vrot.slane %v398_v27, %v414_v12  ;;  %v399_v33 = vld [vmem:[%s1927_s17] sm:$0xff]  ;;  %v1963_v37 = vrot.slane %v398_v27, %v410_v13  ;;  %v1286_v45 = vld [vmem:[%s2350_s2 + $0x170] sm:$0xff]  ;;  %v504_v48 = vld [vmem:[%s2350_s2 + $0x78] sm:$0xff] }
  0x1c   : > { %1607 = vmatprep.subr.bf16.mxu1 %v1606_v8  ;;  %v419_v38 = vmul.f32 %v1955_v31, %v400_v29  ;;  %v421_v39 = vmul.f32 %v1955_v31, %v402_v30  ;;  %v418_v40 = vmul.f32 %v1960_v34, %v399_v33  ;;  %v420_v41 = vmul.f32 %v1960_v34, %v401_v36  ;;  %v503_v47 = vld [vmem:[%s2350_s2 + $0x70] sm:$0xff]  ;;  %v1320_v53 = vld [vmem:[%s2350_s2 + $0x280] sm:$0xff]  ;;  %v1321_v54 = vld [vmem:[%s2350_s2 + $0x288] sm:$0xff] }
  0x1d   : > { %v1352_v55 = vld [vmem:[%s2350_s2 + $0x380] sm:$0xff]  ;;  %v1353_v56 = vld [vmem:[%s2350_s2 + $0x388] sm:$0xff]  ;;  %v1584_v57 = vpack.c.bf16 %v1287_v46, %v1286_v45  ;;  %v1616_v61 = vpack.c.bf16 %v504_v48, %v503_v47  ;;  %v1618_v63 = vpack.c.bf16 %v1321_v54, %v1320_v53  ;;  %v1354_v7 = vld [vmem:[%s2350_s2 + $0x390] sm:$0xff] }
  0x1e   : > { %1577 = vmatpush3.bf16.msra.mxu0 %v1576_v17  ;;  %v438_v49 = vadd.f32 %v1957_v32, %v419_v38  ;;  %v440_v50 = vadd.f32 %v1957_v32, %v421_v39  ;;  %v437_v51 = vadd.f32 %v1963_v37, %v418_v40  ;;  %v439_v52 = vadd.f32 %v1963_v37, %v420_v41  ;;  %v1336_v4 = vld [vmem:[%s2350_s2 + $0x300] sm:$0xff]  ;;  %v1337_v5 = vld [vmem:[%s2350_s2 + $0x308] sm:$0xff]  ;;  %v1355_v8 = vld [vmem:[%s2350_s2 + $0x398] sm:$0xff] }
  0x1f   : > { %1609 = vmatpush3.bf16.msra.mxu1 %v1608_v23  ;;  %1579 = vmatprep.subr.bf16.mxu0 %v1578_v24  ;;  %v1650_v3 = vpack.c.bf16 %v1353_v56, %v1352_v55  ;;  %v1652_v9 = vpack.c.bf16 %v1337_v5, %v1336_v4  ;;  %v1654_v10 = vpack.c.bf16 %v1355_v8, %v1354_v7  ;;  %v1338_v11 = vld [vmem:[%s2350_s2 + $0x310] sm:$0xff]  ;;  %v1339_v12 = vld [vmem:[%s2350_s2 + $0x318] sm:$0xff]  ;;  %v2035_v13 = vld [vmem:[%s2350_s2 + $0x200] sm:$0xff] }
  0x20   : > { %1611 = vmatprep.subr.bf16.mxu1 %v1610_v28  ;;  %v446_v58 = vmul.f32 0.2, %v438_v49  ;;  %v448_v59 = vmul.f32 0.2, %v440_v50  ;;  %v445_v60 = vmul.f32 0.2, %v437_v51  ;;  %v1656_v19 = vpack.c.bf16 %v1339_v12, %v1338_v11 }
  0x21   : > { %v447_v62 = vmul.f32 0.2, %v439_v52  ;;  %v1356_v14 = vld [vmem:[%s2350_s2 + $0x3a0] sm:$0xff]  ;;  %v1357_v15 = vld [vmem:[%s2350_s2 + $0x3a8] sm:$0xff]  ;;  %v2049_v17 = vld [vmem:[%s2350_s2 + $0x290] sm:$0xff] }
  0x22   : > { %1581 = vmatpush3.bf16.msra.mxu0 %v1580_v35  ;;  %v454_v0 = vmax.f32 %v438_v49, %v446_v58  ;;  %v1998_v1 = vmax.f32 %v440_v50, %v448_v59  ;;  %v453_v2 = vmax.f32 %v437_v51, %v445_v60  ;;  %v1305_v16 = vld [vmem:[%s2350_s2 + $0x208] sm:$0xff]  ;;  %v2054_v18 = vld [vmem:[%s2350_s2 + $0x298] sm:$0xff]  ;;  %v1340_v20 = vld [vmem:[%s2350_s2 + $0x320] sm:$0xff]  ;;  %v1658_v25 = vpack.c.bf16 %v1357_v15, %v1356_v14 }
  0x23   : > { %1613 = vmatpush3.bf16.msra.mxu1 %v1612_v42  ;;  %1583 = vmatprep.subr.bf16.mxu0 %v1582_v43  ;;  %v2012_v6 = vmax.f32 %v439_v52, %v447_v62  ;;  %v1341_v21 = vld [vmem:[%s2350_s2 + $0x328] sm:$0xff]  ;;  %v1358_v26 = vld [vmem:[%s2350_s2 + $0x3b0] sm:$0xff]  ;;  %v1359_v27 = vld [vmem:[%s2350_s2 + $0x3b8] sm:$0xff]  ;;  %v1620_v39 = vpack.c.bf16 %v1305_v16, %v2035_v13  ;;  %v1622_v43 = vpack.c.bf16 %v2054_v18, %v2049_v17 }
  0x24   : > { %1615 = vmatprep.subr.bf16.mxu1 %v1614_v44  ;;  %462 = vst [vmem:[#allocation2 + $0x8] sm:$0xff] %v454_v0  ;;  %750 = vmatprep.mubr.f32.mxu1 %v454_v0  ;;  %461 = vst [vmem:[#allocation2] sm:$0xff] %v453_v2  ;;  %v404_v22 = vld [vmem:[%s1927_s17 + $0x28] sm:$0xff]  ;;  %v579_v23 = vrot.slane %v1998_v1, 1  ;;  %v403_v29 = vld [vmem:[%s1927_s17 + $0x20] sm:$0xff]  ;;  %v1660_v46 = vpack.c.bf16 %v1341_v21, %v1340_v20  ;;  %v1662_v47 = vpack.c.bf16 %v1359_v27, %v1358_v26 }
  0x25   : > { %v576_v24 = vrot.slane %v2012_v6, 1  ;;  %v423_v28 = vmul.f32 %v1955_v31, %v404_v22  ;;  %v422_v35 = vmul.f32 %v1960_v34, %v403_v29  ;;  %v2080_v40 = vld [vmem:[%s2350_s2 + $0x210] sm:$0xff]  ;;  %v2085_v41 = vld [vmem:[%s2350_s2 + $0x218] sm:$0xff]  ;;  %v2094_v44 = vld [vmem:[%s2350_s2 + $0x2a0] sm:$0xff] }
  0x26   : > { %1585 = vmatpush3.bf16.msra.mxu0 %v1584_v57  ;;  %v2099_v45 = vld [vmem:[%s2350_s2 + $0x2a8] sm:$0xff]  ;;  %v406_v49 = vld [vmem:[%s1927_s17 + $0x38] sm:$0xff]  ;;  %v1342_v52 = vld [vmem:[%s2350_s2 + $0x330] sm:$0xff] }
  0x27   : > { %1617 = vmatpush3.bf16.msra.mxu1 %v1616_v61  ;;  %1619 = vmatprep.subr.bf16.mxu0 %v1618_v63  ;;  %v442_v42 = vadd.f32 %v1957_v32, %v423_v28  ;;  %v441_v48 = vadd.f32 %v1963_v37, %v422_v35  ;;  %v1343_v53 = vld [vmem:[%s2350_s2 + $0x338] sm:$0xff]  ;;  %v425_v55 = vmul.f32 %v1955_v31, %v406_v49  ;;  %v405_v56 = vld [vmem:[%s1927_s17 + $0x30] sm:$0xff]  ;;  %v1360_v57 = vld [vmem:[%s2350_s2 + $0x3c0] sm:$0xff]  ;;  %v974_v35 = vrot.slane %v1998_v1, 6 }
  0x28   : > { %1651 = vmatprep.subr.bf16.mxu1 %v1650_v3  ;;  %v1361_v58 = vld [vmem:[%s2350_s2 + $0x3c8] sm:$0xff]  ;;  %v424_v60 = vmul.f32 %v1960_v34, %v405_v56  ;;  %v1624_v61 = vpack.c.bf16 %v2085_v41, %v2080_v40  ;;  %v1626_v62 = vpack.c.bf16 %v2099_v45, %v2094_v44  ;;  %v2134_v63 = vld [vmem:[%s2350_s2 + $0x220] sm:$0xff]  ;;  %v1664_v5 = vpack.c.bf16 %v1343_v53, %v1342_v52  ;;  %v1326_v12 = vld [vmem:[%s2350_s2 + $0x2b0] sm:$0xff] }
  0x29   : > { %v450_v54 = vmul.f32 0.2, %v442_v42  ;;  %v449_v59 = vmul.f32 0.2, %v441_v48  ;;  %v2139_v0 = vld [vmem:[%s2350_s2 + $0x228] sm:$0xff]  ;;  %v444_v3 = vadd.f32 %v1957_v32, %v425_v55  ;;  %v1344_v7 = vld [vmem:[%s2350_s2 + $0x340] sm:$0xff]  ;;  %v1666_v13 = vpack.c.bf16 %v1361_v58, %v1360_v57 }
  0x2a   : > { %751 = vmatmul.mubr.f32.vlgmr.msra.gmra.mrb[0].mxu1 %v453_v2  ;;  %v470_v4 = vld [vmem:[%s370_s27 + $0x8] sm:$0xff]  ;;  %v469_v11 = vld [vmem:[%s370_s27] sm:$0xff]  ;;  %v1628_v17 = vpack.c.bf16 %v2139_v0, %v2134_v63  ;;  %v1327_v18 = vld [vmem:[%s2350_s2 + $0x2b8] sm:$0xff] }
  0x2b   : > { %1653 = vmatpush3.bf16.msra.mxu1 %v1652_v9  ;;  %755 = vmatprep.mubr.f32.mxu1 %v1998_v1  ;;  %v522_v30 = vld [vmem:[#allocation2 + $0x8] sm:$0xfe]  ;;  %v521_v33 = vld [vmem:[#allocation2] sm:$0xfe]  ;;  %v2141_v2 = vmax.f32 %v442_v42, %v450_v54  ;;  %v2150_v9 = vmax.f32 %v441_v48, %v449_v59  ;;  %v452_v15 = vmul.f32 0.2, %v444_v3  ;;  %v472_v16 = vmul.f32 %v470_v4, %v1955_v31 }
  0x2c   : > { %1655 = vmatprep.subr.bf16.mxu1 %v1654_v10  ;;  %v578_v36 = vrot.slane %v522_v30, 1  ;;  %v575_v38 = vrot.slane %v521_v33, 1  ;;  %v1345_v8 = vld [vmem:[%s2350_s2 + $0x348] sm:$0xff]  ;;  %v443_v10 = vadd.f32 %v1963_v37, %v424_v60  ;;  %v1362_v20 = vld [vmem:[%s2350_s2 + $0x3d0] sm:$0xff]  ;;  %v1363_v21 = vld [vmem:[%s2350_s2 + $0x3d8] sm:$0xff]  ;;  %v471_v22 = vmul.f32 %v469_v11, %v1960_v34 }
  0x2d   : > { %v583_v14 = vrot.slane %v2141_v2, 1  ;;  %v1668_v26 = vpack.c.bf16 %v1345_v8, %v1344_v7  ;;  %v2176_v27 = vmax.f32 %v444_v3, %v452_v15  ;;  %v474_v28 = vadd.f32 %v472_v16, %v1957_v32  ;;  %v1310_v29 = vld [vmem:[%s2350_s2 + $0x230] sm:$0xff]  ;;  %v1311_v34 = vld [vmem:[%s2350_s2 + $0x238] sm:$0xff]  ;;  %v929_v32 = vld [vmem:[#allocation2 + $0x8] sm:$0xc0] }
  0x2e   : > { %756 = vmatmul.mubr.f32.gmra.mrb[2].mxu1 %v2012_v6  ;;  %v580_v50 = vsel %vm574_vm0, %v578_v36, %v579_v23  ;;  %v577_v51 = vsel %vm574_vm0, %v575_v38, %v576_v24  ;;  %v451_v31 = vmul.f32 0.2, %v443_v10  ;;  %v473_v33 = vadd.f32 %v471_v22, %v1963_v37  ;;  %v1328_v38 = vld [vmem:[%s2350_s2 + $0x2c0] sm:$0xff]  ;;  %v1347_v37 = vld [vmem:[%s2350_s2 + $0x358] sm:$0xff]  ;;  %v1329_v42 = vld [vmem:[%s2350_s2 + $0x2c8] sm:$0xff] }
  0x2f   : > { %1657 = vmatpush3.bf16.msra.mxu1 %v1656_v19  ;;  %665 = vmatprep.mubr.f32.mxu0 %v580_v50  ;;  %v581_v19 = vrot.slane %v2150_v9, 1  ;;  %v1630_v36 = vpack.c.bf16 %v1327_v18, %v1326_v12  ;;  %v587_v40 = vrot.slane %v2176_v27, 1  ;;  %v476_v41 = vmul.f32 0.2, %v474_v28  ;;  %v1364_v44 = vld [vmem:[%s2350_s2 + $0x3e0] sm:$0xff]  ;;  %v1365_v45 = vld [vmem:[%s2350_s2 + $0x3e8] sm:$0xff] }
  0x30   : > { %1659 = vmatprep.subr.bf16.mxu1 %v1658_v25  ;;  %666 = vmatmul.mubr.f32.vlgmr.msra.gmra.mrb[0].mxu0 %v577_v51  ;;  %v584_v25 = vsel %vm574_vm0, %v579_v23, %v583_v14  ;;  %v2189_v30 = vmax.f32 %v443_v10, %v451_v31  ;;  %v973_v50 = vrot.slane %v929_v32, 6  ;;  %v1312_v51 = vld [vmem:[%s2350_s2 + $0x240] sm:$0xff]  ;;  %v1313_v52 = vld [vmem:[%s2350_s2 + $0x248] sm:$0xff]  ;;  %v1634_v57 = vpack.c.bf16 %v1329_v42, %v1328_v38  ;;  %v1330_v58 = vld [vmem:[%s2350_s2 + $0x2d0] sm:$0xff] }
  0x31   : > { %1621 = vmatpush3.bf16.msra.mxu0 %v1620_v39  ;;  %760 = vmatprep.mubr.f32.mxu1 %v2141_v2  ;;  %v582_v23 = vsel %vm574_vm0, %v576_v24, %v581_v19  ;;  %v1670_v39 = vpack.c.bf16 %v1363_v21, %v1362_v20  ;;  %v1346_v24 = vld [vmem:[%s2350_s2 + $0x350] sm:$0xff]  ;;  %v588_v48 = vsel %vm574_vm0, %v583_v14, %v587_v40  ;;  %v1085_v56 = vld [vmem:[%s2208_s13] sm:$0xff]  ;;  %v1331_v63 = vld [vmem:[%s2350_s2 + $0x2d8] sm:$0xff]  ;;  %v817_v20 = vrot.slane %v1998_v1, 5 }
  0x32   : > { %1623 = vmatprep.subr.bf16.mxu0 %v1622_v43  ;;  %761 = vmatmul.mubr.f32.gmra.mrb[4].mxu1 %v2150_v9  ;;  %v585_v43 = vrot.slane %v2189_v30, 1  ;;  %v478_v49 = vmax.f32 %v474_v28, %v476_v41  ;;  %v1672_v53 = vpack.c.bf16 %v1347_v37, %v1346_v24  ;;  %v1674_v59 = vpack.c.bf16 %v1365_v45, %v1364_v44  ;;  %v1348_v60 = vld [vmem:[%s2350_s2 + $0x360] sm:$0xff]  ;;  %v1366_v0 = vld [vmem:[%s2350_s2 + $0x3f0] sm:$0xff]  ;;  %v1367_v3 = vld [vmem:[%s2350_s2 + $0x3f8] sm:$0xff] }
  0x33   : > { %1661 = vmatpush3.bf16.msra.mxu1 %v1660_v46  ;;  %670 = vmatprep.mubr.f32.mxu0 %v584_v25  ;;  %v475_v46 = vmul.f32 0.2, %v473_v33  ;;  %v1087_v4 = vld [vmem:[%s2208_s13 + $0x10] sm:$0xff]  ;;  %v772_v8 = vld [vmem:[#allocation2 + $0x8] sm:$0xe0]  ;;  %v1638_v11 = vpack.c.bf16 %v1331_v63, %v1330_v58  ;;  %v1678_v14 = vpack.c.bf16 %v1367_v3, %v1366_v0  ;;  %v1332_v15 = vld [vmem:[%s2350_s2 + $0x2e0] sm:$0xff] }
  0x34   : > { %1663 = vmatprep.subr.bf16.mxu1 %v1662_v47  ;;  %765 = vmatprep.mubr.f32.mxu1 %v2176_v27  ;;  %v1632_v47 = vpack.c.bf16 %v1311_v34, %v1310_v29  ;;  %v586_v54 = vsel %vm574_vm0, %v581_v19, %v585_v43  ;;  %480 = vst [vmem:[#allocation2 + $0x48] sm:$0xff] %v478_v49  ;;  %v1086_v10 = vld [vmem:[%s2208_s13 + $0x8] sm:$0xff]  ;;  %v1314_v12 = vld [vmem:[%s2350_s2 + $0x250] sm:$0xff]  ;;  %v1351_v18 = vld [vmem:[%s2350_s2 + $0x378] sm:$0xff]  ;;  %v816_v19 = vrot.slane %v772_v8, 5  ;;  %v971_v24 = vrot.slane %v2012_v6, 6 }
  0x35   : > { %1625 = vmatpush3.bf16.msra.mxu0 %v1624_v61  ;;  %v477_v55 = vmax.f32 %v473_v33, %v475_v46  ;;  %v1349_v61 = vld [vmem:[%s2350_s2 + $0x368] sm:$0xff]  ;;  %1091 = vperm.xlu0 %1691, %v1085_v56   ;;  %v928_v21 = vld [vmem:[#allocation2] sm:$0xc0]  ;;  %v1088_v31 = vld [vmem:[%s2208_s13 + $0x18] sm:$0xff]  ;;  %v978_v42 = vrot.slane %v2141_v2, 6  ;;  %v821_v56 = vrot.slane %v2141_v2, 5 }
  0x36   : > { %1627 = vmatprep.subr.bf16.mxu0 %v1626_v62  ;;  %671 = vmatmul.mubr.f32.gmra.mrb[2].mxu0 %v582_v23  ;;  %v975_v62 = vsel %vm969_vm1, %v973_v50, %v974_v35  ;;  %v1676_v7 = vpack.c.bf16 %v1349_v61, %v1348_v60  ;;  %v1333_v16 = vld [vmem:[%s2350_s2 + $0x2e8] sm:$0xff]  ;;  %v1316_v28 = vld [vmem:[%s2350_s2 + $0x260] sm:$0xff]  ;;  %v1334_v32 = vld [vmem:[%s2350_s2 + $0x2f0] sm:$0xff]  ;;  %v818_v41 = vsel %vm812_vm2, %v816_v19, %v817_v20  ;;  %v976_v50 = vrot.slane %v2150_v9, 6 }
  0x37   : > { %1665 = vmatpush3.bf16.msra.mxu1 %v1664_v5  ;;  %675 = vmatprep.mubr.f32.mxu0 %v588_v48  ;;  %479 = vst [vmem:[#allocation2 + $0x40] sm:$0xff] %v477_v55  ;;  %v1636_v5 = vpack.c.bf16 %v1313_v52, %v1312_v51  ;;  %v1317_v29 = vld [vmem:[%s2350_s2 + $0x268] sm:$0xff]  ;;  %v771_v48 = vld [vmem:[#allocation2] sm:$0xe0]  ;;  %v982_v51 = vrot.slane %v2176_v27, 6  ;;  %v980_v58 = vrot.slane %v2189_v30, 6 }
  0x38   : > { %1667 = vmatprep.subr.bf16.mxu1 %v1666_v13  ;;  %766 = vmatmul.mubr.f32.gmra.mrb[6].mxu1 %v2189_v30  ;;  %v1315_v13 = vld [vmem:[%s2350_s2 + $0x258] sm:$0xff]  ;;  %v1644_v44 = vpack.c.bf16 %v1317_v29, %v1316_v28  ;;  %v819_v61 = vrot.slane %v2150_v9, 5 }
  0x39   : > { %1629 = vmatpush3.bf16.msra.mxu0 %v1628_v17  ;;  %1060 = vmatprep.mubr.f32.mxu1 %v975_v62  ;;  %v1350_v17 = vld [vmem:[%s2350_s2 + $0x370] sm:$0xff]  ;;  %v1640_v22 = vpack.c.bf16 %v1315_v13, %v1314_v12  ;;  %v983_v1 = vsel %vm969_vm1, %v978_v42, %v982_v51  ;;  %v825_v62 = vrot.slane %v2176_v27, 5  ;;  %v981_v2 = vsel %vm969_vm1, %v976_v50, %v980_v58 }
  0x3a   : > { %1631 = vmatprep.subr.bf16.mxu0 %v1630_v36  ;;  %676 = vmatmul.mubr.f32.gmra.mrb[4].mxu0 %v586_v54  ;;  %v1335_v36 = vld [vmem:[%s2350_s2 + $0x2f8] sm:$0xff]  ;;  %v1680_v38 = vpack.c.bf16 %v1351_v18, %v1350_v17  ;;  %v814_v54 = vrot.slane %v2012_v6, 5  ;;  %v822_v6 = vsel %vm812_vm2, %v817_v20, %v821_v56 }
  0x3b   : > { %1669 = vmatpush3.bf16.msra.mxu1 %v1668_v26  ;;  %1101 = vperm.xlu1 %1692, %v1087_v4   ;;  %v530_v25 = vld [vmem:[#allocation2 + $0x48] sm:$0x1]  ;;  %v1642_v26 = vpack.c.bf16 %v1333_v16, %v1332_v15  ;;  %v1646_v46 = vpack.c.bf16 %v1335_v36, %v1334_v32  ;;  %v826_v9 = vsel %vm812_vm2, %v821_v56, %v825_v62 }
  0x3c   : > { %1671 = vmatprep.subr.bf16.mxu1 %v1670_v39  ;;  %1096 = vperm.xlu0 %1691, %v1086_v10   ;;  %v591_v34 = vrot.slane %v530_v25, 1  ;;  %v970_v39 = vrot.slane %v928_v21, 6  ;;  %v931_v55 = vld [vmem:[#allocation2 + $0x48] sm:$0x3f]  ;;  %v820_v4 = vsel %vm812_vm2, %v814_v54, %v819_v61 }
  0x3d   : > { %1633 = vmatpush3.bf16.msra.mxu0 %v1632_v47  ;;  %v1318_v47 = vld [vmem:[%s2350_s2 + $0x270] sm:$0xff]  ;;  %v774_v63 = vld [vmem:[#allocation2 + $0x48] sm:$0x1f] }
  0x3e   : > { %1635 = vmatprep.subr.bf16.mxu0 %v1634_v57  ;;  %v529_v23 = vld [vmem:[#allocation2 + $0x40] sm:$0x1]  ;;  %v592_v37 = vsel %vm574_vm0, %v587_v40, %v591_v34  ;;  %v1319_v40 = vld [vmem:[%s2350_s2 + $0x278] sm:$0xff]  ;;  %v972_v49 = vsel %vm969_vm1, %v970_v39, %v971_v24  ;;  %v977_v57 = vsel %vm969_vm1, %v971_v24, %v976_v50 }
  0x3f   : > { %1673 = vmatpush3.bf16.msra.mxu1 %v1672_v53  ;;  %v589_v33 = vrot.slane %v529_v23, 1  ;;  %1106 = vperm.xlu1 %1692, %v1088_v31   ;;  %v1648_v52 = vpack.c.bf16 %v1319_v40, %v1318_v47  ;;  %v813_v53 = vrot.slane %v771_v48, 5  ;;  %v773_v8 = vld [vmem:[#allocation2 + $0x40] sm:$0x1f] }
  0x40   : > { %1675 = vmatprep.subr.bf16.mxu1 %v1674_v59  ;;  %680 = vmatprep.mubr.f32.mxu0 %v592_v37  ;;  %v930_v59 = vld [vmem:[#allocation2 + $0x40] sm:$0x3f] }
  0x41   : > { %1637 = vmatpush3.bf16.msra.mxu0 %v1636_v5  ;;  %v590_v45 = vsel %vm574_vm0, %v585_v43, %v589_v33  ;;  %v979_v43 = vsel %vm969_vm1, %v974_v35, %v978_v42  ;;  %v986_v35 = vrot.slane %v931_v55, 6  ;;  %v815_v60 = vsel %vm812_vm2, %v813_v53, %v814_v54 }
  0x42   : > { %1639 = vmatprep.subr.bf16.mxu0 %v1638_v11  ;;  %681 = vmatmul.mubr.f32.gmra.mrb[6].mxu0 %v590_v45  ;;  %v984_v0 = vrot.slane %v930_v59, 6  ;;  %v823_v5 = vrot.slane %v2189_v30, 5  ;;  %v827_v11 = vrot.slane %v773_v8, 5 }
  0x43   : > { %1677 = vmatpush3.bf16.msra.mxu1 %v1676_v7  ;;  %903 = vmatprep.mubr.f32.mxu0 %v818_v41  ;;  %v987_v3 = vsel %vm969_vm1, %v982_v51, %v986_v35  ;;  %v829_v7 = vrot.slane %v774_v63, 5 }
  0x44   : > { %1679 = vmatprep.subr.bf16.mxu1 %v1678_v14  ;;  %v985_v27 = vsel %vm969_vm1, %v980_v58, %v984_v0  ;;  %v824_v10 = vsel %vm812_vm2, %v819_v61, %v823_v5  ;;  %v828_v30 = vsel %vm812_vm2, %v823_v5, %v827_v11 }
  0x45   : > { %1641 = vmatpush3.bf16.msra.mxu0 %v1640_v22  ;;  %v830_v12 = vsel %vm812_vm2, %v825_v62, %v829_v7 }
  0x46   : > { %1643 = vmatprep.subr.bf16.mxu0 %v1642_v26 }
  0x47   : > { %1681 = vmatpush3.bf16.msra.mxu1 %v1680_v38 }
  0x49   : > { %1645 = vmatpush3.bf16.msra.mxu0 %v1644_v44 }
  0x4a   : > { %1647 = vmatprep.subr.bf16.mxu0 %v1646_v46  ;;  %1061 = vmatmul.mubr.f32.vlgmr.msra.gmra.mrb[8].mxu1 %v972_v49 }
  0x4b   : > { %1065 = vmatprep.mubr.f32.mxu1 %v979_v43 }
  0x4d   : > { %1649 = vmatpush3.bf16.msra.mxu0 %v1648_v52 }
  0x4e   : > { %1066 = vmatmul.mubr.f32.gmra.mrb[10].mxu1 %v977_v57 }
  0x4f   : > { %1070 = vmatprep.mubr.f32.mxu1 %v983_v1 }
  0x50   : > { %904 = vmatmul.mubr.f32.vlgmr.msra.gmra.mrb[8].mxu0 %v815_v60 }
  0x51   : > { %908 = vmatprep.mubr.f32.mxu0 %v822_v6 }
  0x52   : > { %1071 = vmatmul.mubr.f32.gmra.mrb[12].mxu1 %v981_v2 }
  0x53   : > { %1075 = vmatprep.mubr.f32.mxu1 %v987_v3 }
  0x54   : > { %909 = vmatmul.mubr.f32.gmra.mrb[10].mxu0 %v820_v4 }
  0x55   : > { %913 = vmatprep.mubr.f32.mxu0 %v826_v9 }
  0x56   : > { %1076 = vmatmul.mubr.f32.gmra.mrb[14].mxu1 %v985_v27 }
  0x58   : > { %914 = vmatmul.mubr.f32.gmra.mrb[12].mxu0 %v824_v10 }
  0x59   : > { %918 = vmatprep.mubr.f32.mxu0 %v830_v12 }
  0x5c   : > { %919 = vmatmul.mubr.f32.gmra.mrb[14].mxu0 %v828_v30 }
  0xb4   : > { %v1092_v54 = vpop.permute.xlu0 %1091 }
  0xba   : > { %v1102_v10 = vpop.permute.xlu1 %1101 }
  0xbb   : > { %v1097_v3 = vpop.permute.xlu0 %1096 }
  0xfd   : > { %v1454_v13 = vpop.f32.mrb[0].mxu1 }
  0xfe   : > { %v1455_v14 = vpop.f32.mrb[1].mxu1 }
  0xff   : > { %v1456_v15 = vadd.f32 %v1455_v14, %v1454_v13 }
 0x101   : > { %v1457_v16 = vpop.f32.mrb[2].mxu1 }
 0x102   : > { %v1458_v17 = vpop.f32.mrb[3].mxu1 }
 0x103   : > { %v1459_v18 = vadd.f32 %v1458_v17, %v1457_v16  ;;  %v1410_v19 = vpop.f32.mrb[0].mxu0 }
 0x104   : > { %v1411_v20 = vpop.f32.mrb[1].mxu0 }
 0x105   : > { %v1412_v21 = vadd.f32 %v1411_v20, %v1410_v19  ;;  %v1460_v22 = vpop.f32.mrb[4].mxu1 }
 0x106   : > { %v1461_v25 = vpop.f32.mrb[5].mxu1 }
 0x107   : > { %v753_v31 = vadd.f32 %v1456_v15, %v1412_v21  ;;  %v1462_v26 = vadd.f32 %v1461_v25, %v1460_v22  ;;  %v1107_v21 = vpop.permute.xlu1 %1106 }
 0x109   : > { %v1413_v28 = vpop.f32.mrb[2].mxu0 }
 0x10a   : > { %v1414_v34 = vpop.f32.mrb[3].mxu0 }
 0x10b   : > { %v1463_v29 = vpop.f32.mrb[6].mxu1  ;;  %v1415_v33 = vadd.f32 %v1414_v34, %v1413_v28 }
 0x10c   : > { %v1464_v23 = vpop.f32.mrb[7].mxu1 }
 0x10d   : > { %v1465_v32 = vadd.f32 %v1464_v23, %v1463_v29  ;;  %v758_v36 = vadd.f32 %v1459_v18, %v1415_v33  ;;  %v1416_v38 = vpop.f32.mrb[4].mxu0 }
 0x10e   : > { %v1417_v39 = vpop.f32.mrb[5].mxu0 }
 0x10f   : > { %v1418_v24 = vadd.f32 %v1417_v39, %v1416_v38 }
 0x111   : > { %v763_v37 = vadd.f32 %v1462_v26, %v1418_v24 }
 0x115   : > { %v1419_v41 = vpop.f32.mrb[6].mxu0 }
 0x116   : > { %v1420_v42 = vpop.f32.mrb[7].mxu0 }
 0x117   : > { %v1421_v44 = vadd.f32 %v1420_v42, %v1419_v41 }
 0x119   : > { %v768_v45 = vadd.f32 %v1465_v32, %v1421_v44 }
 0x11d   : > { %v1542_v46 = vpop.f32.mrb[8].mxu1 }
 0x11e   : > { %v1543_v47 = vpop.f32.mrb[9].mxu1 }
 0x11f   : > { %v1544_v40 = vadd.f32 %v1543_v47, %v1542_v46 }
 0x121   : > { %v1545_v48 = vpop.f32.mrb[10].mxu1 }
 0x122   : > { %v1546_v49 = vpop.f32.mrb[11].mxu1 }
 0x123   : > { %v1498_v50 = vpop.f32.mrb[8].mxu0  ;;  %v1547_v43 = vadd.f32 %v1546_v49, %v1545_v48 }
 0x124   : > { %v1499_v51 = vpop.f32.mrb[9].mxu0 }
 0x125   : > { %v1500_v52 = vadd.f32 %v1499_v51, %v1498_v50  ;;  %v1548_v53 = vpop.f32.mrb[12].mxu1 }
 0x126   : > { %v1549_v55 = vpop.f32.mrb[13].mxu1 }
 0x127   : > { %v924_v56 = vadd.f32 %v1500_v52, %v753_v31  ;;  %v1501_v57 = vpop.f32.mrb[10].mxu0  ;;  %v1550_v58 = vadd.f32 %v1549_v55, %v1548_v53 }
 0x128   : > { %v1502_v1 = vpop.f32.mrb[11].mxu0 }
 0x129   : > { %v1081_v35 = vadd.f32 %v1544_v40, %v924_v56  ;;  %v1503_v59 = vadd.f32 %v1502_v1, %v1501_v57  ;;  %v1551_v60 = vpop.f32.mrb[14].mxu1 }
 0x12a   : > { %v1552_v61 = vpop.f32.mrb[15].mxu1 }
 0x12b   : > { %1137 = vst [vmem:[%s2334_s15] sm:$0xff] %v1081_v35  ;;  %v925_v6 = vadd.f32 %v1503_v59, %v758_v36  ;;  %v1504_v62 = vpop.f32.mrb[12].mxu0  ;;  %v1553_v2 = vadd.f32 %v1552_v61, %v1551_v60  ;;  %v1109_v63 = vmul.f32 %v1092_v54, %v1081_v35 }
 0x12c   : > { %v1505_v0 = vpop.f32.mrb[13].mxu0 }
 0x12d   : > { %v1082_v4 = vadd.f32 %v1547_v43, %v925_v6  ;;  %v1506_v5 = vadd.f32 %v1505_v0, %v1504_v62  ;;  %v1123_v27 = vmul.f32 %v1109_v63, %v1081_v35 }
 0x12f   : > { %1138 = vst [vmem:[%s2334_s15 + $0x8] sm:$0xff] %v1082_v4  ;;  %v926_v9 = vadd.f32 %v1506_v5, %v763_v37  ;;  %v1110_v7 = vmul.f32 %v1097_v3, %v1082_v4  ;;  %v1507_v8 = vpop.f32.mrb[14].mxu0 }
 0x130   : > { %v1508_v11 = vpop.f32.mrb[15].mxu0 }
 0x131   : > { %v1083_v12 = vadd.f32 %v1550_v58, %v926_v9  ;;  %v1113_v30 = vadd.f32 %v1110_v7, %v1109_v63  ;;  %v1124_v13 = vmul.f32 %v1110_v7, %v1082_v4  ;;  %v1509_v14 = vadd.f32 %v1508_v11, %v1507_v8 }
 0x133   : > { %1139 = vst [vmem:[%s2334_s15 + $0x10] sm:$0xff] %v1083_v12  ;;  %v1111_v15 = vmul.f32 %v1102_v10, %v1083_v12  ;;  %v1127_v16 = vadd.f32 %v1124_v13, %v1123_v27  ;;  %v927_v17 = vadd.f32 %v1509_v14, %v768_v45 }
 0x135   : > { %v1125_v18 = vmul.f32 %v1111_v15, %v1083_v12  ;;  %v1084_v19 = vadd.f32 %v1553_v2, %v927_v17  ;;  %v1114_v20 = vadd.f32 %v1113_v30, %v1111_v15 }
 0x137   : > { %1140 = vst [vmem:[%s2334_s15 + $0x18] sm:$0xff] %v1084_v19  ;;  %v1112_v31 = vmul.f32 %v1107_v21, %v1084_v19  ;;  %v1128_v22 = vadd.f32 %v1127_v16, %v1125_v18 }
 0x139   : > { %v1115_v25 = vadd.f32 %v1114_v20, %v1112_v31  ;;  %v1126_v26 = vmul.f32 %v1112_v31, %v1084_v19 }
 0x13b   : > { %v1116_v28 = vrot.slane %v1115_v25, 4  ;;  %v1129_v29 = vadd.f32 %v1128_v22, %v1126_v26 }
 0x13d   : > { %v1117_v34 = vadd.f32 %v1116_v28, %v1115_v25  ;;  %v1130_v23 = vrot.slane %v1129_v29, 4 }
 0x13f   : > { %v1118_v33 = vrot.slane %v1117_v34, 2  ;;  %v1131_v32 = vadd.f32 %v1130_v23, %v1129_v29 }
 0x141   : > { %v1119_v36 = vadd.f32 %v1118_v33, %v1117_v34  ;;  %v1132_v38 = vrot.slane %v1131_v32, 2 }
 0x143   : > { %v1120_v39 = vrot.slane %v1119_v36, 1  ;;  %v1133_v24 = vadd.f32 %v1132_v38, %v1131_v32 }
 0x145   : > { %v1121_v37 = vadd.f32 %v1120_v39, %v1119_v36  ;;  %v1134_v41 = vrot.slane %v1133_v24, 1 }
 0x147   : > { %v1135_v42 = vadd.f32 %v1134_v41, %v1133_v24  ;;  %1141 = vst [vmem:[%s396_s11] sm:$0x1] %v1121_v37 }
 0x149   : > { %1142 = vst [vmem:[%s396_s11 + $0x1] sm:$0x1] %v1135_v42 }
 0x14a PF: > { %s18_s24 = sadd.s32 1, %s1699_s24  }
 0x14b   : > { %p15_p7 = scmp.ge.s32.totalorder %s18_s24, 4  }
 0x14d   :  { %17 = sbr.rel (!%p15_p7) target bundleno = 1 (0x1), region = 95 }

// kernel: discriminator_forward.7
= control target key start
LH: loop header
LB: loop body
LE: loop exit
PB: predicated region body
PF: predicated region fallthrough
CT: control target
= control target key end

     0   :  { %s3609_s18 = smov 0   ;;  %s4453_s0 = inlined_call_operand.vmem [shape: f32[48,128], index: 0, kind: input, shape index: {}, may-alias: {0,1}]   ;;  %s4454_s1 = inlined_call_operand.vmem [shape: f32[48,128], index: 1, kind: input, shape index: {}, may-alias: {0,1}]   ;;  %s4455_s2 = inlined_call_operand.vmem [shape: f32[16,128,128], index: 2, kind: input, shape index: {}]   ;;  %s4456_s3 = inlined_call_operand.vmem [shape: f32[1,128], index: 3, kind: input, shape index: {}]   ;;  %s4457_s4 = inlined_call_operand.vmem [shape: f32[1,128], index: 4, kind: input, shape index: {}]   ;;  %s4458_s5 = inlined_call_operand.vmem [shape: f32[32,128], index: 5, kind: output, shape index: {}]  }
   0x1 LB: > { %s1908_s19 = sadd.s32 4294967295, %s3577_s18   ;;  %p1912_p0 = scmp.ge.s32.totalorder %s3577_s18, 1  ;;  %s3577_s18 = sphi %s3609_s18, %s15_s18  }
   0x2   : > { %p203_p1 = scmp.lt.s32.totalorder %s3577_s18, 3 }
   0x4   : > { %p204_p2 = pnand %p1912_p0, %p203_p1 }
   0x5   : > { %v1921_v0 = vld [vmem:[%s4455_s2 + $0x80] sm:$0xff] (!%p204_p2)  ;;  %v1922_v1 = vld [vmem:[%s4455_s2 + $0x88] sm:$0xff] (!%p204_p2)  ;;  %s3626_s26 = sshll.u32 (!%p204_p2), %s1908_s19, 1  ;;  %v1923_v5 = vld [vmem:[%s4455_s2 + $0x90] sm:$0xff] (!%p204_p2) }
   0x6   : > { %207 = sbr.rel (%p204_p2) target bundleno = 510 (0x1fe), region = 40  ;;  %v2033_v2 = vld [vmem:[%s4455_s2 + $0x400] sm:$0xff] (!%p204_p2)  ;;  %v3013_v3 = vpack.c.bf16 (!%p204_p2), %v1922_v1, %v1921_v0  ;;  %v2034_v4 = vld [vmem:[%s4455_s2 + $0x408] sm:$0xff] (!%p204_p2)  ;;  %v1924_v6 = vld [vmem:[%s4455_s2 + $0x98] sm:$0xff] (!%p204_p2)  ;;  %p238_p3 = scmp.lt.s32.totalorder (!%p204_p2), %s3626_s26, 5 }
   0x7   : > { %s2164_s8 = sadd.s32 (!%p204_p2), 2, %s3626_s26  ;;  %v3269_v7 = vpack.c.bf16 (!%p204_p2), %v2034_v4, %v2033_v2  ;;  %v3017_v8 = vpack.c.bf16 (!%p204_p2), %v1924_v6, %v1923_v5  ;;  %v2035_v9 = vld [vmem:[%s4455_s2 + $0x410] sm:$0xff] (!%p204_p2)  ;;  %v2036_v10 = vld [vmem:[%s4455_s2 + $0x418] sm:$0xff] (!%p204_p2)  ;;  %v1925_v11 = vld [vmem:[%s4455_s2 + $0xa0] sm:$0xff] (!%p204_p2)  ;;  %p252_p5 = scmp.lt.s32.totalorder (!%p204_p2), %s3626_s26, 3 }
   0x8   : > { %p245_p4 = scmp.lt.s32.totalorder (!%p204_p2), %s2164_s8, 5  ;;  %3014 = vmatprep.subr.bf16.mxu1 (!%p204_p2), %v3013_v3  ;;  %v3273_v12 = vpack.c.bf16 (!%p204_p2), %v2036_v10, %v2035_v9  ;;  %v1926_v13 = vld [vmem:[%s4455_s2 + $0xa8] sm:$0xff] (!%p204_p2)  ;;  %v2037_v14 = vld [vmem:[%s4455_s2 + $0x420] sm:$0xff] (!%p204_p2)  ;;  %v1927_v18 = vld [vmem:[%s4455_s2 + $0xb0] sm:$0xff] (!%p204_p2) }
   0x9   : > { %v2038_v15 = vld [vmem:[%s4455_s2 + $0x428] sm:$0xff] (!%p204_p2)  ;;  %3270 = vmatprep.subr.bf16.mxu0 (!%p204_p2), %v3269_v7  ;;  %3016 = vmatpush3.bf16.msra.mxu1 (!%p204_p2), %v3013_v3  ;;  %v3021_v16 = vpack.c.bf16 (!%p204_p2), %v1926_v13, %v1925_v11  ;;  %v1928_v19 = vld [vmem:[%s4455_s2 + $0xb8] sm:$0xff] (!%p204_p2)  ;;  %v2039_v20 = vld [vmem:[%s4455_s2 + $0x430] sm:$0xff] (!%p204_p2) }
   0xa   : > { %3272 = vmatpush3.bf16.msra.mxu0 (!%p204_p2), %v3269_v7  ;;  %3018 = vmatprep.subr.bf16.mxu1 (!%p204_p2), %v3017_v8  ;;  %v3277_v17 = vpack.c.bf16 (!%p204_p2), %v2038_v15, %v2037_v14  ;;  %v2040_v21 = vld [vmem:[%s4455_s2 + $0x438] sm:$0xff] (!%p204_p2)  ;;  %v3025_v22 = vpack.c.bf16 (!%p204_p2), %v1928_v19, %v1927_v18  ;;  %v1929_v23 = vld [vmem:[%s4455_s2 + $0xc0] sm:$0xff] (!%p204_p2)  ;;  %v1930_v24 = vld [vmem:[%s4455_s2 + $0xc8] sm:$0xff] (!%p204_p2) }
   0xb   : > { %3274 = vmatprep.subr.bf16.mxu0 (!%p204_p2), %v3273_v12  ;;  %v3281_v25 = vpack.c.bf16 (!%p204_p2), %v2040_v21, %v2039_v20  ;;  %v2041_v26 = vld [vmem:[%s4455_s2 + $0x440] sm:$0xff] (!%p204_p2)  ;;  %v2042_v27 = vld [vmem:[%s4455_s2 + $0x448] sm:$0xff] (!%p204_p2)  ;;  %v3029_v34 = vpack.c.bf16 (!%p204_p2), %v1930_v24, %v1929_v23  ;;  %v1931_v37 = vld [vmem:[%s4455_s2 + $0xd0] sm:$0xff] (!%p204_p2) }
   0xc   : > { %v1919_v28 = vld [vmem:[%s4456_s3] ss:$0 sm:$0xff] (!%p204_p2)  ;;  %v3285_v36 = vpack.c.bf16 (!%p204_p2), %v2042_v27, %v2041_v26  ;;  %v1932_v38 = vld [vmem:[%s4455_s2 + $0xd8] sm:$0xff] (!%p204_p2)  ;;  %v2043_v42 = vld [vmem:[%s4455_s2 + $0x450] sm:$0xff] (!%p204_p2) }
   0xd   : > { %s239_s22 = scalar_select %p238_p3, %s3626_s26, 5  ;;  %3020 = vmatpush3.bf16.msra.mxu1 %v3017_v8  ;;  %v3696_v29 = vld [vmem:[%s4457_s4] ss:$0 sm:$0xff]  ;;  %v2044_v43 = vld [vmem:[%s4455_s2 + $0x458] sm:$0xff]  ;;  %v3033_v47 = vpack.c.bf16 %v1932_v38, %v1931_v37  ;;  %v1934_v50 = vld [vmem:[%s4455_s2 + $0xe8] sm:$0xff] }
   0xe   : > { %s4460_s8 = smov (!%p245_p4, %s2164_s8), 5  ;;  %3276 = vmatpush3.bf16.msra.mxu0 %v3273_v12  ;;  %3022 = vmatprep.subr.bf16.mxu1 %v3021_v16  ;;  %v3289_v48 = vpack.c.bf16 %v2044_v43, %v2043_v42  ;;  %v1933_v49 = vld [vmem:[%s4455_s2 + $0xe0] sm:$0xff]  ;;  %v2046_v55 = vld [vmem:[%s4455_s2 + $0x468] sm:$0xff]  ;;  %v1935_v59 = vld [vmem:[%s4455_s2 + $0xf0] sm:$0xff]  ;;  %s4462_s26 = smov (!%p252_p5, %s3626_s26), 3 }
   0xf   : > { %s1914_s23 = sshll.u32 %s239_s22, 3  ;;  %s1916_s9 = sshll.u32 %s4460_s8, 3  ;;  %3278 = vmatprep.subr.bf16.mxu0 %v3277_v17  ;;  %v2045_v54 = vld [vmem:[%s4455_s2 + $0x460] sm:$0xff]  ;;  %v3037_v57 = vpack.c.bf16 %v1934_v50, %v1933_v49  ;;  %v1936_v60 = vld [vmem:[%s4455_s2 + $0xf8] sm:$0xff]  ;;  %v2047_v61 = vld [vmem:[%s4455_s2 + $0x470] sm:$0xff] }
  0x10   : > { %s241_s12 = scalar_lea.vmem %s4453_s0, %s1914_s23  ;;  %s3691_s25 = scalar_lea.vmem %s4454_s1, %s1916_s9  ;;  %v3293_v58 = vpack.c.bf16 %v2046_v55, %v2045_v54  ;;  %v2048_v62 = vld [vmem:[%s4455_s2 + $0x478] sm:$0xff]  ;;  %v3041_v0 = vpack.c.bf16 %v1936_v60, %v1935_v59  ;;  %v297_v3 = vld [vmem:[%s4455_s2] sm:$0xff]  ;;  %v298_v4 = vld [vmem:[%s4455_s2 + $0x8] sm:$0xff] }
  0x11   : > { %v259_v30 = vld [vmem:[%s241_s12] sm:$0xff]  ;;  %v260_v31 = vld [vmem:[%s241_s12 + $0x8] sm:$0xff]  ;;  %3024 = vmatpush3.bf16.msra.mxu1 %v3021_v16  ;;  %v3297_v2 = vpack.c.bf16 %v2048_v62, %v2047_v61  ;;  %v3045_v9 = vpack.c.bf16 %v298_v4, %v297_v3  ;;  %v299_v12 = vld [vmem:[%s4455_s2 + $0x10] sm:$0xff]  ;;  %s1918_s17 = sshll.u32 %s4462_s26, 3 }
  0x12   : > { %v267_v32 = vmul.f32 %v1919_v28, %v259_v30  ;;  %v268_v33 = vmul.f32 %v1919_v28, %v260_v31  ;;  %3280 = vmatpush3.bf16.msra.mxu0 %v3277_v17  ;;  %3026 = vmatprep.subr.bf16.mxu1 %v3025_v22  ;;  %v283_v35 = vld [vmem:[%s3691_s25] sm:$0xff]  ;;  %v284_v63 = vld [vmem:[%s3691_s25 + $0x8] sm:$0xff]  ;;  %v300_v13 = vld [vmem:[%s4455_s2 + $0x18] sm:$0xff]  ;;  %s255_s20 = scalar_lea.vmem %s4458_s5, %s1918_s17 }
  0x13   : > { %3282 = vmatprep.subr.bf16.mxu0 %v3281_v25  ;;  %v285_v41 = vmul.f32 %v1919_v28, %v283_v35  ;;  %v286_v1 = vmul.f32 %v1919_v28, %v284_v63  ;;  %v2049_v6 = vld [vmem:[%s4455_s2 + $0x480] sm:$0xff]  ;;  %v2050_v7 = vld [vmem:[%s4455_s2 + $0x488] sm:$0xff]  ;;  %v2051_v14 = vld [vmem:[%s4455_s2 + $0x490] sm:$0xff]  ;;  %v3049_v18 = vpack.c.bf16 %v300_v13, %v299_v12 }
  0x14   : > { %v275_v39 = vadd.f32 %v3696_v29, %v267_v32  ;;  %v276_v40 = vadd.f32 %v3696_v29, %v268_v33  ;;  %v3301_v11 = vpack.c.bf16 %v2050_v7, %v2049_v6  ;;  %v2052_v15 = vld [vmem:[%s4455_s2 + $0x498] sm:$0xff]  ;;  %v301_v20 = vld [vmem:[%s4455_s2 + $0x20] sm:$0xff]  ;;  %v302_v21 = vld [vmem:[%s4455_s2 + $0x28] sm:$0xff] }
  0x15   : > { %3028 = vmatpush3.bf16.msra.mxu1 %v3025_v22  ;;  %v287_v46 = vadd.f32 %v3696_v29, %v285_v41  ;;  %v288_v8 = vadd.f32 %v3696_v29, %v286_v1  ;;  %v3305_v19 = vpack.c.bf16 %v2052_v15, %v2051_v14  ;;  %v2053_v22 = vld [vmem:[%s4455_s2 + $0x4a0] sm:$0xff]  ;;  %v2054_v23 = vld [vmem:[%s4455_s2 + $0x4a8] sm:$0xff]  ;;  %v3053_v24 = vpack.c.bf16 %v302_v21, %v301_v20  ;;  %v303_v26 = vld [vmem:[%s4455_s2 + $0x30] sm:$0xff] }
  0x16   : > { %v277_v44 = vmul.f32 0.2, %v275_v39  ;;  %v278_v45 = vmul.f32 0.2, %v276_v40  ;;  %3284 = vmatpush3.bf16.msra.mxu0 %v3281_v25  ;;  %3030 = vmatprep.subr.bf16.mxu1 %v3029_v34  ;;  %v3309_v25 = vpack.c.bf16 %v2054_v23, %v2053_v22  ;;  %v304_v27 = vld [vmem:[%s4455_s2 + $0x38] sm:$0xff]  ;;  %v2055_v28 = vld [vmem:[%s4455_s2 + $0x4b0] sm:$0xff] }
  0x17   : > { %3286 = vmatprep.subr.bf16.mxu0 %v3285_v36  ;;  %v289_v53 = vmul.f32 0.2, %v287_v46  ;;  %v290_v10 = vmul.f32 0.2, %v288_v8  ;;  %v2056_v29 = vld [vmem:[%s4455_s2 + $0x4b8] sm:$0xff]  ;;  %v3057_v30 = vpack.c.bf16 %v304_v27, %v303_v26  ;;  %v305_v32 = vld [vmem:[%s4455_s2 + $0x40] sm:$0xff] }
  0x18   : > { %v3720_v51 = vmax.f32 %v275_v39, %v277_v44  ;;  %v3722_v52 = vmax.f32 %v276_v40, %v278_v45  ;;  %v3313_v31 = vpack.c.bf16 %v2056_v29, %v2055_v28  ;;  %v306_v33 = vld [vmem:[%s4455_s2 + $0x48] sm:$0xff]  ;;  %v307_v38 = vld [vmem:[%s4455_s2 + $0x50] sm:$0xff]  ;;  %v308_v39 = vld [vmem:[%s4455_s2 + $0x58] sm:$0xff] }
  0x19   : > { %3032 = vmatpush3.bf16.msra.mxu1 %v3029_v34  ;;  %v291_v56 = vmax.f32 %v287_v46, %v289_v53  ;;  %v292_v16 = vmax.f32 %v288_v8, %v290_v10  ;;  %v2057_v34 = vld [vmem:[%s4455_s2 + $0x4c0] sm:$0xff]  ;;  %v2058_v35 = vld [vmem:[%s4455_s2 + $0x4c8] sm:$0xff]  ;;  %v2059_v40 = vld [vmem:[%s4455_s2 + $0x4d0] sm:$0xff]  ;;  %v3065_v42 = vpack.c.bf16 %v308_v39, %v307_v38 }
  0x1a   : > { %281 = vst [vmem:[#allocation2] sm:$0xff] %v3720_v51  ;;  %282 = vst [vmem:[#allocation2 + $0x8] sm:$0xff] %v3722_v52  ;;  %2765 = vmatprep.mubr.f32.mxu0 %v3722_v52  ;;  %3288 = vmatpush3.bf16.msra.mxu0 %v3285_v36  ;;  %v3061_v36 = vpack.c.bf16 %v306_v33, %v305_v32  ;;  %v3317_v37 = vpack.c.bf16 %v2058_v35, %v2057_v34  ;;  %v2060_v41 = vld [vmem:[%s4455_s2 + $0x4d8] sm:$0xff]  ;;  %v309_v44 = vld [vmem:[%s4455_s2 + $0x60] sm:$0xff] }
  0x1b   : > { %3034 = vmatprep.subr.bf16.mxu1 %v3033_v47  ;;  %3290 = vmatprep.subr.bf16.mxu0 %v3289_v48  ;;  %293 = vst [vmem:[#allocation2 + $0x10] sm:$0xff] %v291_v56  ;;  %294 = vst [vmem:[#allocation2 + $0x18] sm:$0xff] %v292_v16  ;;  %v3321_v43 = vpack.c.bf16 %v2060_v41, %v2059_v40  ;;  %v310_v45 = vld [vmem:[%s4455_s2 + $0x68] sm:$0xff]  ;;  %v2061_v46 = vld [vmem:[%s4455_s2 + $0x4e0] sm:$0xff] }
  0x1c   : > { %v311_v50 = vld [vmem:[%s4455_s2 + $0x70] sm:$0xff]  ;;  %v2064_v54 = vld [vmem:[%s4455_s2 + $0x4f8] sm:$0xff]  ;;  %v2065_v59 = vld [vmem:[%s4455_s2 + $0x500] sm:$0xff] }
  0x1d   : > { %3036 = vmatpush3.bf16.msra.mxu1 %v3033_v47  ;;  %v2062_v47 = vld [vmem:[%s4455_s2 + $0x4e8] sm:$0xff]  ;;  %v2063_v53 = vld [vmem:[%s4455_s2 + $0x4f0] sm:$0xff]  ;;  %v1941_v6 = vld [vmem:[%s4455_s2 + $0x120] sm:$0xff] }
  0x1e   : > { %3292 = vmatpush3.bf16.msra.mxu0 %v3289_v48  ;;  %3038 = vmatprep.subr.bf16.mxu1 %v3037_v57  ;;  %v3069_v48 = vpack.c.bf16 %v310_v45, %v309_v44  ;;  %v3325_v49 = vpack.c.bf16 %v2062_v47, %v2061_v46  ;;  %v2066_v60 = vld [vmem:[%s4455_s2 + $0x508] sm:$0xff]  ;;  %v1939_v63 = vld [vmem:[%s4455_s2 + $0x110] sm:$0xff]  ;;  %v2069_v8 = vld [vmem:[%s4455_s2 + $0x520] sm:$0xff] }
  0x1f   : > { %3294 = vmatprep.subr.bf16.mxu0 %v3293_v58  ;;  %v3333_v62 = vpack.c.bf16 %v2066_v60, %v2065_v59  ;;  %v2067_v1 = vld [vmem:[%s4455_s2 + $0x510] sm:$0xff]  ;;  %v1942_v7 = vld [vmem:[%s4455_s2 + $0x128] sm:$0xff]  ;;  %v1944_v14 = vld [vmem:[%s4455_s2 + $0x138] sm:$0xff] }
  0x20   : > { %v3085_v12 = vpack.c.bf16 %v1942_v7, %v1941_v6  ;;  %v2071_v15 = vld [vmem:[%s4455_s2 + $0x530] sm:$0xff]  ;;  %v2072_v16 = vld [vmem:[%s4455_s2 + $0x538] sm:$0xff]  ;;  %v1946_v20 = vld [vmem:[%s4455_s2 + $0x148] sm:$0xff] }
  0x21   : > { %v313_v5 = vld [vmem:[#allocation2 + $0x1] sm:$0xff]  ;;  %3040 = vmatpush3.bf16.msra.mxu1 %v3037_v57  ;;  %v1948_v26 = vld [vmem:[%s4455_s2 + $0x158] sm:$0xff]  ;;  %v2075_v27 = vld [vmem:[%s4455_s2 + $0x550] sm:$0xff] }
  0x22   : > { %2485 = vmatprep.mubr.f32.mxu1 %v313_v5  ;;  %3296 = vmatpush3.bf16.msra.mxu0 %v3293_v58  ;;  %v314_v17 = vld [vmem:[#allocation2 + $0x9] sm:$0xff]  ;;  %v1937_v57 = vld [vmem:[%s4455_s2 + $0x100] sm:$0xff]  ;;  %v1155_v3 = vld [vmem:[#allocation2 + $0x11] sm:$0xff] }
  0x23   : > { %3042 = vmatprep.subr.bf16.mxu1 %v3041_v0  ;;  %3298 = vmatprep.subr.bf16.mxu0 %v3297_v2  ;;  %v1938_v58 = vld [vmem:[%s4455_s2 + $0x108] sm:$0xff]  ;;  %v2073_v21 = vld [vmem:[%s4455_s2 + $0x540] sm:$0xff]  ;;  %v2076_v28 = vld [vmem:[%s4455_s2 + $0x558] sm:$0xff] }
  0x24   : > { %v3077_v61 = vpack.c.bf16 %v1938_v58, %v1937_v57  ;;  %v482_v10 = vld [vmem:[#allocation2 + $0x2] sm:$0xff]  ;;  %v1952_v38 = vld [vmem:[%s4455_s2 + $0x178] sm:$0xff]  ;;  %v2079_v39 = vld [vmem:[%s4455_s2 + $0x570] sm:$0xff] }
  0x25   : > { %3044 = vmatpush3.bf16.msra.mxu1 %v3041_v0  ;;  %v1940_v0 = vld [vmem:[%s4455_s2 + $0x118] sm:$0xff]  ;;  %v2074_v22 = vld [vmem:[%s4455_s2 + $0x548] sm:$0xff]  ;;  %v2077_v33 = vld [vmem:[%s4455_s2 + $0x560] sm:$0xff] }
  0x26   : > { %3300 = vmatpush3.bf16.msra.mxu0 %v3297_v2  ;;  %3046 = vmatprep.subr.bf16.mxu1 %v3045_v9  ;;  %v2068_v2 = vld [vmem:[%s4455_s2 + $0x518] sm:$0xff]  ;;  %v3081_v4 = vpack.c.bf16 %v1940_v0, %v1939_v63  ;;  %v1950_v32 = vld [vmem:[%s4455_s2 + $0x168] sm:$0xff]  ;;  %v2081_v45 = vld [vmem:[%s4455_s2 + $0x580] sm:$0xff] }
  0x27   : > { %3302 = vmatprep.subr.bf16.mxu0 %v3301_v11  ;;  %v3337_v5 = vpack.c.bf16 %v2068_v2, %v2067_v1  ;;  %v2078_v34 = vld [vmem:[%s4455_s2 + $0x568] sm:$0xff]  ;;  %v2080_v40 = vld [vmem:[%s4455_s2 + $0x578] sm:$0xff]  ;;  %v1957_v57 = vld [vmem:[%s4455_s2 + $0x1a0] sm:$0xff] }
  0x28   : > { %2486 = vmatmul.mubr.f32.vlgmr.msra.gmra.mrb[0].mxu1 %v314_v17  ;;  %v1954_v44 = vld [vmem:[%s4455_s2 + $0x188] sm:$0xff]  ;;  %v2085_v59 = vld [vmem:[%s4455_s2 + $0x5a0] sm:$0xff]  ;;  %v1959_v1 = vld [vmem:[%s4455_s2 + $0x1b0] sm:$0xff] }
  0x29   : > { %3048 = vmatpush3.bf16.msra.mxu1 %v3045_v9  ;;  %2766 = vmatmul.mubr.f32.vlgmr.msra.gmra.mrb[0].mxu0 %v291_v56  ;;  %v3329_v56 = vpack.c.bf16 %v2064_v54, %v2063_v53  ;;  %v2070_v9 = vld [vmem:[%s4455_s2 + $0x528] sm:$0xff]  ;;  %v2084_v53 = vld [vmem:[%s4455_s2 + $0x598] sm:$0xff]  ;;  %v1961_v7 = vld [vmem:[%s4455_s2 + $0x1c0] sm:$0xff] }
  0x2a   : > { %3304 = vmatpush3.bf16.msra.mxu0 %v3301_v11  ;;  %3050 = vmatprep.subr.bf16.mxu1 %v3049_v18  ;;  %v3881_v11 = vld [vmem:[#allocation2 + $0xa] sm:$0xff]  ;;  %v3341_v13 = vpack.c.bf16 %v2070_v9, %v2069_v8  ;;  %v1251_v54 = vld [vmem:[#allocation2 + $0x12] sm:$0xff]  ;;  %v2089_v9 = vld [vmem:[%s4455_s2 + $0x5c0] sm:$0xff] }
  0x2b   : > { %3306 = vmatprep.subr.bf16.mxu0 %v3305_v19  ;;  %2520 = vmatprep.mubr.f32.mxu1 %v3720_v51  ;;  %v312_v51 = vld [vmem:[%s4455_s2 + $0x78] sm:$0xff]  ;;  %v2082_v46 = vld [vmem:[%s4455_s2 + $0x588] sm:$0xff] }
  0x2c   : > { %2800 = vmatprep.mubr.f32.mxu0 %v314_v17  ;;  %v3073_v55 = vpack.c.bf16 %v312_v51, %v311_v50  ;;  %v1956_v50 = vld [vmem:[%s4455_s2 + $0x198] sm:$0xff]  ;;  %v2083_v51 = vld [vmem:[%s4455_s2 + $0x590] sm:$0xff]  ;;  %v1958_v58 = vld [vmem:[%s4455_s2 + $0x1a8] sm:$0xff] }
  0x2d   : > { %3052 = vmatpush3.bf16.msra.mxu1 %v3049_v18  ;;  %v3345_v18 = vpack.c.bf16 %v2072_v16, %v2071_v15  ;;  %v2086_v60 = vld [vmem:[%s4455_s2 + $0x5a8] sm:$0xff]  ;;  %v3117_v63 = vpack.c.bf16 %v1958_v58, %v1957_v57  ;;  %v1960_v2 = vld [vmem:[%s4455_s2 + $0x1b8] sm:$0xff]  ;;  %v1977_v58 = vld [vmem:[%s4455_s2 + $0x240] sm:$0xff] }
  0x2e   : > { %3308 = vmatpush3.bf16.msra.mxu0 %v3305_v19  ;;  %3054 = vmatprep.subr.bf16.mxu1 %v3053_v24  ;;  %v1945_v19 = vld [vmem:[%s4455_s2 + $0x140] sm:$0xff]  ;;  %v3373_v0 = vpack.c.bf16 %v2086_v60, %v2085_v59  ;;  %v1962_v8 = vld [vmem:[%s4455_s2 + $0x1c8] sm:$0xff]  ;;  %v2092_v15 = vld [vmem:[%s4455_s2 + $0x5d8] sm:$0xff] }
  0x2f   : > { %3310 = vmatprep.subr.bf16.mxu0 %v3309_v25  ;;  %v3093_v23 = vpack.c.bf16 %v1946_v20, %v1945_v19  ;;  %v1966_v19 = vld [vmem:[%s4455_s2 + $0x1e8] sm:$0xff]  ;;  %v2093_v20 = vld [vmem:[%s4455_s2 + $0x5e0] sm:$0xff] }
  0x30   : > { %v1978_v59 = vld [vmem:[%s4455_s2 + $0x248] sm:$0xff]  ;;  %v2105_v60 = vld [vmem:[%s4455_s2 + $0x640] sm:$0xff] }
  0x31   : > { %3056 = vmatpush3.bf16.msra.mxu1 %v3053_v24  ;;  %v3349_v24 = vpack.c.bf16 %v2074_v22, %v2073_v21  ;;  %v2094_v21 = vld [vmem:[%s4455_s2 + $0x5e8] sm:$0xff] }
  0x32   : > { %3312 = vmatpush3.bf16.msra.mxu0 %v3309_v25  ;;  %3058 = vmatprep.subr.bf16.mxu1 %v3057_v30  ;;  %v1947_v25 = vld [vmem:[%s4455_s2 + $0x150] sm:$0xff] }
  0x33   : > { %3314 = vmatprep.subr.bf16.mxu0 %v3313_v31  ;;  %v3097_v29 = vpack.c.bf16 %v1948_v26, %v1947_v25  ;;  %v1968_v25 = vld [vmem:[%s4455_s2 + $0x1f8] sm:$0xff]  ;;  %v2095_v26 = vld [vmem:[%s4455_s2 + $0x5f0] sm:$0xff] }
  0x35   : > { %3060 = vmatpush3.bf16.msra.mxu1 %v3057_v30  ;;  %v3353_v30 = vpack.c.bf16 %v2076_v28, %v2075_v27  ;;  %v2096_v27 = vld [vmem:[%s4455_s2 + $0x5f8] sm:$0xff] }
  0x36   : > { %3316 = vmatpush3.bf16.msra.mxu0 %v3313_v31  ;;  %3062 = vmatprep.subr.bf16.mxu1 %v3061_v36  ;;  %v1949_v31 = vld [vmem:[%s4455_s2 + $0x160] sm:$0xff] }
  0x37   : > { %3318 = vmatprep.subr.bf16.mxu0 %v3317_v37  ;;  %v3101_v35 = vpack.c.bf16 %v1950_v32, %v1949_v31  ;;  %v1970_v31 = vld [vmem:[%s4455_s2 + $0x208] sm:$0xff]  ;;  %v2097_v32 = vld [vmem:[%s4455_s2 + $0x600] sm:$0xff] }
  0x39   : > { %3064 = vmatpush3.bf16.msra.mxu1 %v3061_v36  ;;  %v3357_v36 = vpack.c.bf16 %v2078_v34, %v2077_v33  ;;  %v2098_v33 = vld [vmem:[%s4455_s2 + $0x608] sm:$0xff] }
  0x3a   : > { %3320 = vmatpush3.bf16.msra.mxu0 %v3317_v37  ;;  %3066 = vmatprep.subr.bf16.mxu1 %v3065_v42  ;;  %v1951_v37 = vld [vmem:[%s4455_s2 + $0x170] sm:$0xff] }
  0x3b   : > { %3322 = vmatprep.subr.bf16.mxu0 %v3321_v43  ;;  %v3105_v41 = vpack.c.bf16 %v1952_v38, %v1951_v37  ;;  %v1972_v37 = vld [vmem:[%s4455_s2 + $0x218] sm:$0xff]  ;;  %v2099_v38 = vld [vmem:[%s4455_s2 + $0x610] sm:$0xff] }
  0x3d   : > { %3068 = vmatpush3.bf16.msra.mxu1 %v3065_v42  ;;  %v3361_v42 = vpack.c.bf16 %v2080_v40, %v2079_v39  ;;  %v2100_v39 = vld [vmem:[%s4455_s2 + $0x618] sm:$0xff] }
  0x3e   : > { %3324 = vmatpush3.bf16.msra.mxu0 %v3321_v43  ;;  %3070 = vmatprep.subr.bf16.mxu1 %v3069_v48  ;;  %v1953_v43 = vld [vmem:[%s4455_s2 + $0x180] sm:$0xff]  ;;  %v1347_v40 = vld [vmem:[#allocation2 + $0x13] sm:$0xff] }
  0x3f   : > { %3326 = vmatprep.subr.bf16.mxu0 %v3325_v49  ;;  %v3109_v47 = vpack.c.bf16 %v1954_v44, %v1953_v43  ;;  %v1973_v43 = vld [vmem:[%s4455_s2 + $0x220] sm:$0xff]  ;;  %v1974_v44 = vld [vmem:[%s4455_s2 + $0x228] sm:$0xff] }
  0x41   : > { %3072 = vmatpush3.bf16.msra.mxu1 %v3069_v48  ;;  %v3365_v48 = vpack.c.bf16 %v2082_v46, %v2081_v45  ;;  %v2101_v45 = vld [vmem:[%s4455_s2 + $0x620] sm:$0xff]  ;;  %v2102_v46 = vld [vmem:[%s4455_s2 + $0x628] sm:$0xff] }
  0x42   : > { %3328 = vmatpush3.bf16.msra.mxu0 %v3325_v49  ;;  %3074 = vmatprep.subr.bf16.mxu1 %v3073_v55  ;;  %v1955_v49 = vld [vmem:[%s4455_s2 + $0x190] sm:$0xff] }
  0x43   : > { %3330 = vmatprep.subr.bf16.mxu0 %v3329_v56 }
  0x45   : > { %3076 = vmatpush3.bf16.msra.mxu1 %v3073_v55  ;;  %v3113_v55 = vpack.c.bf16 %v1956_v50, %v1955_v49  ;;  %v3149_v49 = vpack.c.bf16 %v1974_v44, %v1973_v43  ;;  %v3405_v50 = vpack.c.bf16 %v2102_v46, %v2101_v45  ;;  %v1993_v44 = vld [vmem:[%s4455_s2 + $0x2c0] sm:$0xff]  ;;  %v1994_v45 = vld [vmem:[%s4455_s2 + $0x2c8] sm:$0xff] }
  0x46   : > { %3332 = vmatpush3.bf16.msra.mxu0 %v3329_v56  ;;  %3078 = vmatprep.subr.bf16.mxu1 %v3077_v61  ;;  %v3369_v56 = vpack.c.bf16 %v2084_v53, %v2083_v51  ;;  %v1975_v51 = vld [vmem:[%s4455_s2 + $0x230] sm:$0xff]  ;;  %v1976_v53 = vld [vmem:[%s4455_s2 + $0x238] sm:$0xff]  ;;  %v2121_v46 = vld [vmem:[%s4455_s2 + $0x6c0] sm:$0xff] }
  0x47   : > { %3334 = vmatprep.subr.bf16.mxu0 %v3333_v62 }
  0x48   : > { %2521 = vmatmul.mubr.f32.vlgmr.msra.gmra.mrb[0].mxu1 %v3722_v52  ;;  %v1943_v52 = vld [vmem:[%s4455_s2 + $0x130] sm:$0xff] }
  0x49   : > { %3080 = vmatpush3.bf16.msra.mxu1 %v3077_v61  ;;  %2801 = vmatmul.mubr.f32.vlgmr.msra.gmra.mrb[0].mxu0 %v1155_v3  ;;  %v3089_v17 = vpack.c.bf16 %v1944_v14, %v1943_v52  ;;  %v578_v61 = vld [vmem:[#allocation2 + $0x3] sm:$0xff]  ;;  %v2087_v3 = vld [vmem:[%s4455_s2 + $0x5b0] sm:$0xff]  ;;  %v1964_v52 = vld [vmem:[%s4455_s2 + $0x1d8] sm:$0xff] }
  0x4a   : > { %3336 = vmatpush3.bf16.msra.mxu0 %v3333_v62  ;;  %3082 = vmatprep.subr.bf16.mxu1 %v3081_v4  ;;  %v3981_v62 = vld [vmem:[#allocation2 + $0xb] sm:$0xff] }
  0x4b   : > { %3338 = vmatprep.subr.bf16.mxu0 %v3337_v5  ;;  %2555 = vmatprep.mubr.f32.mxu1 %v482_v10  ;;  %v2090_v10 = vld [vmem:[%s4455_s2 + $0x5c8] sm:$0xff]  ;;  %v2091_v14 = vld [vmem:[%s4455_s2 + $0x5d0] sm:$0xff] }
  0x4c   : > { %2835 = vmatprep.mubr.f32.mxu0 %v3881_v11 }
  0x4d   : > { %3084 = vmatpush3.bf16.msra.mxu1 %v3081_v4  ;;  %v2088_v4 = vld [vmem:[%s4455_s2 + $0x5b8] sm:$0xff] }
  0x4e   : > { %3340 = vmatpush3.bf16.msra.mxu0 %v3337_v5  ;;  %3086 = vmatprep.subr.bf16.mxu1 %v3085_v12  ;;  %v3121_v5 = vpack.c.bf16 %v1960_v2, %v1959_v1  ;;  %v3377_v6 = vpack.c.bf16 %v2088_v4, %v2087_v3  ;;  %v1980_v1 = vld [vmem:[%s4455_s2 + $0x258] sm:$0xff]  ;;  %v2107_v2 = vld [vmem:[%s4455_s2 + $0x650] sm:$0xff] }
  0x4f   : > { %3342 = vmatprep.subr.bf16.mxu0 %v3341_v13  ;;  %v2108_v3 = vld [vmem:[%s4455_s2 + $0x658] sm:$0xff] }
  0x51   : > { %3088 = vmatpush3.bf16.msra.mxu1 %v3085_v12  ;;  %v3381_v12 = vpack.c.bf16 %v2090_v10, %v2089_v9  ;;  %v2110_v9 = vld [vmem:[%s4455_s2 + $0x668] sm:$0xff] }
  0x52   : > { %3344 = vmatpush3.bf16.msra.mxu0 %v3341_v13  ;;  %3090 = vmatprep.subr.bf16.mxu1 %v3089_v17  ;;  %v1963_v13 = vld [vmem:[%s4455_s2 + $0x1d0] sm:$0xff] }
  0x53   : > { %3346 = vmatprep.subr.bf16.mxu0 %v3345_v18  ;;  %v3129_v16 = vpack.c.bf16 %v1964_v52, %v1963_v13  ;;  %v1984_v13 = vld [vmem:[%s4455_s2 + $0x278] sm:$0xff]  ;;  %v2111_v52 = vld [vmem:[%s4455_s2 + $0x670] sm:$0xff] }
  0x55   : > { %3092 = vmatpush3.bf16.msra.mxu1 %v3089_v17  ;;  %v3385_v17 = vpack.c.bf16 %v2092_v15, %v2091_v14  ;;  %v2112_v14 = vld [vmem:[%s4455_s2 + $0x678] sm:$0xff] }
  0x56   : > { %3348 = vmatpush3.bf16.msra.mxu0 %v3345_v18  ;;  %3094 = vmatprep.subr.bf16.mxu1 %v3093_v23  ;;  %v1965_v18 = vld [vmem:[%s4455_s2 + $0x1e0] sm:$0xff] }
  0x57   : > { %3350 = vmatprep.subr.bf16.mxu0 %v3349_v24  ;;  %v3133_v22 = vpack.c.bf16 %v1966_v19, %v1965_v18  ;;  %v1986_v18 = vld [vmem:[%s4455_s2 + $0x288] sm:$0xff]  ;;  %v2113_v19 = vld [vmem:[%s4455_s2 + $0x680] sm:$0xff] }
  0x59   : > { %3096 = vmatpush3.bf16.msra.mxu1 %v3093_v23  ;;  %v3389_v23 = vpack.c.bf16 %v2094_v21, %v2093_v20  ;;  %v2114_v20 = vld [vmem:[%s4455_s2 + $0x688] sm:$0xff] }
  0x5a   : > { %3352 = vmatpush3.bf16.msra.mxu0 %v3349_v24  ;;  %3098 = vmatprep.subr.bf16.mxu1 %v3097_v29  ;;  %v1967_v24 = vld [vmem:[%s4455_s2 + $0x1f0] sm:$0xff] }
  0x5b   : > { %3354 = vmatprep.subr.bf16.mxu0 %v3353_v30  ;;  %v3137_v28 = vpack.c.bf16 %v1968_v25, %v1967_v24  ;;  %v1988_v24 = vld [vmem:[%s4455_s2 + $0x298] sm:$0xff]  ;;  %v2115_v25 = vld [vmem:[%s4455_s2 + $0x690] sm:$0xff] }
  0x5d   : > { %3100 = vmatpush3.bf16.msra.mxu1 %v3097_v29  ;;  %v3393_v29 = vpack.c.bf16 %v2096_v27, %v2095_v26  ;;  %v2116_v26 = vld [vmem:[%s4455_s2 + $0x698] sm:$0xff] }
  0x5e   : > { %3356 = vmatpush3.bf16.msra.mxu0 %v3353_v30  ;;  %3102 = vmatprep.subr.bf16.mxu1 %v3101_v35  ;;  %v1969_v30 = vld [vmem:[%s4455_s2 + $0x200] sm:$0xff]  ;;  %v1443_v27 = vld [vmem:[#allocation2 + $0x14] sm:$0xff] }
  0x5f   : > { %3358 = vmatprep.subr.bf16.mxu0 %v3357_v36  ;;  %v3141_v34 = vpack.c.bf16 %v1970_v31, %v1969_v30  ;;  %v1989_v30 = vld [vmem:[%s4455_s2 + $0x2a0] sm:$0xff]  ;;  %v1990_v31 = vld [vmem:[%s4455_s2 + $0x2a8] sm:$0xff] }
  0x61   : > { %3104 = vmatpush3.bf16.msra.mxu1 %v3101_v35  ;;  %v3397_v35 = vpack.c.bf16 %v2098_v33, %v2097_v32  ;;  %v2117_v32 = vld [vmem:[%s4455_s2 + $0x6a0] sm:$0xff]  ;;  %v2118_v33 = vld [vmem:[%s4455_s2 + $0x6a8] sm:$0xff] }
  0x62   : > { %3360 = vmatpush3.bf16.msra.mxu0 %v3357_v36  ;;  %3106 = vmatprep.subr.bf16.mxu1 %v3105_v41  ;;  %v1971_v36 = vld [vmem:[%s4455_s2 + $0x210] sm:$0xff] }
  0x63   : > { %3362 = vmatprep.subr.bf16.mxu0 %v3361_v42 }
  0x65   : > { %3108 = vmatpush3.bf16.msra.mxu1 %v3105_v41  ;;  %v3145_v41 = vpack.c.bf16 %v1972_v37, %v1971_v36  ;;  %v3181_v36 = vpack.c.bf16 %v1990_v31, %v1989_v30  ;;  %v3437_v37 = vpack.c.bf16 %v2118_v33, %v2117_v32  ;;  %v2009_v31 = vld [vmem:[%s4455_s2 + $0x340] sm:$0xff]  ;;  %v2010_v32 = vld [vmem:[%s4455_s2 + $0x348] sm:$0xff] }
  0x66   : > { %3364 = vmatpush3.bf16.msra.mxu0 %v3361_v42  ;;  %3110 = vmatprep.subr.bf16.mxu1 %v3109_v47  ;;  %v3401_v42 = vpack.c.bf16 %v2100_v39, %v2099_v38  ;;  %v1991_v38 = vld [vmem:[%s4455_s2 + $0x2b0] sm:$0xff]  ;;  %v1992_v39 = vld [vmem:[%s4455_s2 + $0x2b8] sm:$0xff]  ;;  %v2137_v33 = vld [vmem:[%s4455_s2 + $0x740] sm:$0xff] }
  0x67   : > { %3366 = vmatprep.subr.bf16.mxu0 %v3365_v48 }
  0x68   : > { %2556 = vmatmul.mubr.f32.vlgmr.msra.gmra.mrb[0].mxu1 %v3881_v11  ;;  %v3125_v11 = vpack.c.bf16 %v1962_v8, %v1961_v7  ;;  %v1982_v7 = vld [vmem:[%s4455_s2 + $0x268] sm:$0xff]  ;;  %v2109_v8 = vld [vmem:[%s4455_s2 + $0x660] sm:$0xff] }
  0x69   : > { %3112 = vmatpush3.bf16.msra.mxu1 %v3109_v47  ;;  %2836 = vmatmul.mubr.f32.vlgmr.msra.gmra.mrb[0].mxu0 %v1251_v54  ;;  %v674_v47 = vld [vmem:[#allocation2 + $0x4] sm:$0xff]  ;;  %v2103_v54 = vld [vmem:[%s4455_s2 + $0x630] sm:$0xff] }
  0x6a   : > { %3368 = vmatpush3.bf16.msra.mxu0 %v3365_v48  ;;  %3114 = vmatprep.subr.bf16.mxu1 %v3113_v55  ;;  %v4081_v48 = vld [vmem:[#allocation2 + $0xc] sm:$0xff] }
  0x6b   : > { %3370 = vmatprep.subr.bf16.mxu0 %v3369_v56  ;;  %2590 = vmatprep.mubr.f32.mxu1 %v578_v61  ;;  %v2106_v61 = vld [vmem:[%s4455_s2 + $0x648] sm:$0xff] }
  0x6c   : > { %2870 = vmatprep.mubr.f32.mxu0 %v3981_v62 }
  0x6d   : > { %3116 = vmatpush3.bf16.msra.mxu1 %v3113_v55  ;;  %v2104_v55 = vld [vmem:[%s4455_s2 + $0x638] sm:$0xff] }
  0x6e   : > { %3372 = vmatpush3.bf16.msra.mxu0 %v3369_v56  ;;  %3118 = vmatprep.subr.bf16.mxu1 %v3117_v63  ;;  %v3153_v56 = vpack.c.bf16 %v1976_v53, %v1975_v51  ;;  %v3409_v57 = vpack.c.bf16 %v2104_v55, %v2103_v54  ;;  %v1996_v51 = vld [vmem:[%s4455_s2 + $0x2d8] sm:$0xff]  ;;  %v2123_v53 = vld [vmem:[%s4455_s2 + $0x6d0] sm:$0xff] }
  0x6f   : > { %3374 = vmatprep.subr.bf16.mxu0 %v3373_v0  ;;  %v2124_v54 = vld [vmem:[%s4455_s2 + $0x6d8] sm:$0xff] }
  0x71   : > { %3120 = vmatpush3.bf16.msra.mxu1 %v3117_v63  ;;  %v3413_v63 = vpack.c.bf16 %v2106_v61, %v2105_v60  ;;  %v2126_v60 = vld [vmem:[%s4455_s2 + $0x6e8] sm:$0xff] }
  0x72   : > { %3376 = vmatpush3.bf16.msra.mxu0 %v3373_v0  ;;  %3122 = vmatprep.subr.bf16.mxu1 %v3121_v5  ;;  %v1979_v0 = vld [vmem:[%s4455_s2 + $0x250] sm:$0xff] }
  0x73   : > { %3378 = vmatprep.subr.bf16.mxu0 %v3377_v6  ;;  %v3161_v4 = vpack.c.bf16 %v1980_v1, %v1979_v0  ;;  %v2000_v0 = vld [vmem:[%s4455_s2 + $0x2f8] sm:$0xff]  ;;  %v2127_v1 = vld [vmem:[%s4455_s2 + $0x6f0] sm:$0xff] }
  0x75   : > { %3124 = vmatpush3.bf16.msra.mxu1 %v3121_v5  ;;  %v3417_v5 = vpack.c.bf16 %v2108_v3, %v2107_v2  ;;  %v2128_v2 = vld [vmem:[%s4455_s2 + $0x6f8] sm:$0xff] }
  0x76   : > { %3380 = vmatpush3.bf16.msra.mxu0 %v3377_v6  ;;  %3126 = vmatprep.subr.bf16.mxu1 %v3125_v11  ;;  %v1981_v6 = vld [vmem:[%s4455_s2 + $0x260] sm:$0xff] }
  0x77   : > { %3382 = vmatprep.subr.bf16.mxu0 %v3381_v12  ;;  %v3165_v10 = vpack.c.bf16 %v1982_v7, %v1981_v6  ;;  %v2002_v6 = vld [vmem:[%s4455_s2 + $0x308] sm:$0xff]  ;;  %v2129_v7 = vld [vmem:[%s4455_s2 + $0x700] sm:$0xff] }
  0x79   : > { %3128 = vmatpush3.bf16.msra.mxu1 %v3125_v11  ;;  %v3421_v11 = vpack.c.bf16 %v2110_v9, %v2109_v8  ;;  %v2130_v8 = vld [vmem:[%s4455_s2 + $0x708] sm:$0xff] }
  0x7a   : > { %3384 = vmatpush3.bf16.msra.mxu0 %v3381_v12  ;;  %3130 = vmatprep.subr.bf16.mxu1 %v3129_v16  ;;  %v1983_v12 = vld [vmem:[%s4455_s2 + $0x270] sm:$0xff] }
  0x7b   : > { %3386 = vmatprep.subr.bf16.mxu0 %v3385_v17  ;;  %v3169_v15 = vpack.c.bf16 %v1984_v13, %v1983_v12  ;;  %v2004_v12 = vld [vmem:[%s4455_s2 + $0x318] sm:$0xff]  ;;  %v2131_v13 = vld [vmem:[%s4455_s2 + $0x710] sm:$0xff] }
  0x7d   : > { %3132 = vmatpush3.bf16.msra.mxu1 %v3129_v16  ;;  %v3425_v16 = vpack.c.bf16 %v2112_v14, %v2111_v52  ;;  %v2132_v52 = vld [vmem:[%s4455_s2 + $0x718] sm:$0xff] }
  0x7e   : > { %3388 = vmatpush3.bf16.msra.mxu0 %v3385_v17  ;;  %3134 = vmatprep.subr.bf16.mxu1 %v3133_v22  ;;  %v1985_v17 = vld [vmem:[%s4455_s2 + $0x280] sm:$0xff]  ;;  %v1539_v14 = vld [vmem:[#allocation2 + $0x15] sm:$0xff] }
  0x7f   : > { %3390 = vmatprep.subr.bf16.mxu0 %v3389_v23  ;;  %v3173_v21 = vpack.c.bf16 %v1986_v18, %v1985_v17  ;;  %v2005_v17 = vld [vmem:[%s4455_s2 + $0x320] sm:$0xff]  ;;  %v2006_v18 = vld [vmem:[%s4455_s2 + $0x328] sm:$0xff] }
  0x81   : > { %3136 = vmatpush3.bf16.msra.mxu1 %v3133_v22  ;;  %v3429_v22 = vpack.c.bf16 %v2114_v20, %v2113_v19  ;;  %v2133_v19 = vld [vmem:[%s4455_s2 + $0x720] sm:$0xff]  ;;  %v2134_v20 = vld [vmem:[%s4455_s2 + $0x728] sm:$0xff] }
  0x82   : > { %3392 = vmatpush3.bf16.msra.mxu0 %v3389_v23  ;;  %3138 = vmatprep.subr.bf16.mxu1 %v3137_v28  ;;  %v1987_v23 = vld [vmem:[%s4455_s2 + $0x290] sm:$0xff] }
  0x83   : > { %3394 = vmatprep.subr.bf16.mxu0 %v3393_v29 }
  0x85   : > { %3140 = vmatpush3.bf16.msra.mxu1 %v3137_v28  ;;  %v3177_v28 = vpack.c.bf16 %v1988_v24, %v1987_v23  ;;  %v3213_v23 = vpack.c.bf16 %v2006_v18, %v2005_v17  ;;  %v3469_v24 = vpack.c.bf16 %v2134_v20, %v2133_v19  ;;  %v2025_v18 = vld [vmem:[%s4455_s2 + $0x3c0] sm:$0xff]  ;;  %v2026_v19 = vld [vmem:[%s4455_s2 + $0x3c8] sm:$0xff] }
  0x86   : > { %3396 = vmatpush3.bf16.msra.mxu0 %v3393_v29  ;;  %3142 = vmatprep.subr.bf16.mxu1 %v3141_v34  ;;  %v3433_v29 = vpack.c.bf16 %v2116_v26, %v2115_v25  ;;  %v2007_v25 = vld [vmem:[%s4455_s2 + $0x330] sm:$0xff]  ;;  %v2008_v26 = vld [vmem:[%s4455_s2 + $0x338] sm:$0xff]  ;;  %v2153_v20 = vld [vmem:[%s4455_s2 + $0x7c0] sm:$0xff] }
  0x87   : > { %3398 = vmatprep.subr.bf16.mxu0 %v3397_v35 }
  0x88   : > { %2591 = vmatmul.mubr.f32.vlgmr.msra.gmra.mrb[0].mxu1 %v3981_v62  ;;  %v3157_v62 = vpack.c.bf16 %v1978_v59, %v1977_v58  ;;  %v1998_v58 = vld [vmem:[%s4455_s2 + $0x2e8] sm:$0xff]  ;;  %v2125_v59 = vld [vmem:[%s4455_s2 + $0x6e0] sm:$0xff] }
  0x89   : > { %3144 = vmatpush3.bf16.msra.mxu1 %v3141_v34  ;;  %2871 = vmatmul.mubr.f32.vlgmr.msra.gmra.mrb[0].mxu0 %v1347_v40  ;;  %v770_v34 = vld [vmem:[#allocation2 + $0x5] sm:$0xff]  ;;  %v2119_v40 = vld [vmem:[%s4455_s2 + $0x6b0] sm:$0xff] }
  0x8a   : > { %3400 = vmatpush3.bf16.msra.mxu0 %v3397_v35  ;;  %3146 = vmatprep.subr.bf16.mxu1 %v3145_v41  ;;  %v4181_v35 = vld [vmem:[#allocation2 + $0xd] sm:$0xff] }
  0x8b   : > { %3402 = vmatprep.subr.bf16.mxu0 %v3401_v42  ;;  %2625 = vmatprep.mubr.f32.mxu1 %v674_v47  ;;  %v2122_v47 = vld [vmem:[%s4455_s2 + $0x6c8] sm:$0xff] }
  0x8c   : > { %2905 = vmatprep.mubr.f32.mxu0 %v4081_v48 }
  0x8d   : > { %3148 = vmatpush3.bf16.msra.mxu1 %v3145_v41  ;;  %v2120_v41 = vld [vmem:[%s4455_s2 + $0x6b8] sm:$0xff] }
  0x8e   : > { %3404 = vmatpush3.bf16.msra.mxu0 %v3401_v42  ;;  %3150 = vmatprep.subr.bf16.mxu1 %v3149_v49  ;;  %v3185_v42 = vpack.c.bf16 %v1992_v39, %v1991_v38  ;;  %v3441_v43 = vpack.c.bf16 %v2120_v41, %v2119_v40  ;;  %v2012_v38 = vld [vmem:[%s4455_s2 + $0x358] sm:$0xff]  ;;  %v2139_v39 = vld [vmem:[%s4455_s2 + $0x750] sm:$0xff] }
  0x8f   : > { %3406 = vmatprep.subr.bf16.mxu0 %v3405_v50  ;;  %v2140_v40 = vld [vmem:[%s4455_s2 + $0x758] sm:$0xff] }
  0x91   : > { %3152 = vmatpush3.bf16.msra.mxu1 %v3149_v49  ;;  %v3445_v49 = vpack.c.bf16 %v2122_v47, %v2121_v46  ;;  %v2142_v46 = vld [vmem:[%s4455_s2 + $0x768] sm:$0xff] }
  0x92   : > { %3408 = vmatpush3.bf16.msra.mxu0 %v3405_v50  ;;  %3154 = vmatprep.subr.bf16.mxu1 %v3153_v56  ;;  %v1995_v50 = vld [vmem:[%s4455_s2 + $0x2d0] sm:$0xff] }
  0x93   : > { %3410 = vmatprep.subr.bf16.mxu0 %v3409_v57  ;;  %v3193_v55 = vpack.c.bf16 %v1996_v51, %v1995_v50  ;;  %v2016_v50 = vld [vmem:[%s4455_s2 + $0x378] sm:$0xff]  ;;  %v2143_v51 = vld [vmem:[%s4455_s2 + $0x770] sm:$0xff] }
  0x95   : > { %3156 = vmatpush3.bf16.msra.mxu1 %v3153_v56  ;;  %v3449_v56 = vpack.c.bf16 %v2124_v54, %v2123_v53  ;;  %v2144_v53 = vld [vmem:[%s4455_s2 + $0x778] sm:$0xff] }
  0x96   : > { %3412 = vmatpush3.bf16.msra.mxu0 %v3409_v57  ;;  %3158 = vmatprep.subr.bf16.mxu1 %v3157_v62  ;;  %v1997_v57 = vld [vmem:[%s4455_s2 + $0x2e0] sm:$0xff] }
  0x97   : > { %3414 = vmatprep.subr.bf16.mxu0 %v3413_v63  ;;  %v3197_v61 = vpack.c.bf16 %v1998_v58, %v1997_v57  ;;  %v2018_v57 = vld [vmem:[%s4455_s2 + $0x388] sm:$0xff]  ;;  %v2145_v58 = vld [vmem:[%s4455_s2 + $0x780] sm:$0xff] }
  0x99   : > { %3160 = vmatpush3.bf16.msra.mxu1 %v3157_v62  ;;  %v3453_v62 = vpack.c.bf16 %v2126_v60, %v2125_v59  ;;  %v2146_v59 = vld [vmem:[%s4455_s2 + $0x788] sm:$0xff] }
  0x9a   : > { %3416 = vmatpush3.bf16.msra.mxu0 %v3413_v63  ;;  %3162 = vmatprep.subr.bf16.mxu1 %v3161_v4  ;;  %v1999_v63 = vld [vmem:[%s4455_s2 + $0x2f0] sm:$0xff] }
  0x9b   : > { %3418 = vmatprep.subr.bf16.mxu0 %v3417_v5  ;;  %v3201_v3 = vpack.c.bf16 %v2000_v0, %v1999_v63  ;;  %v2020_v63 = vld [vmem:[%s4455_s2 + $0x398] sm:$0xff]  ;;  %v2147_v0 = vld [vmem:[%s4455_s2 + $0x790] sm:$0xff] }
  0x9d   : > { %3164 = vmatpush3.bf16.msra.mxu1 %v3161_v4  ;;  %v3457_v4 = vpack.c.bf16 %v2128_v2, %v2127_v1  ;;  %v2148_v1 = vld [vmem:[%s4455_s2 + $0x798] sm:$0xff] }
  0x9e   : > { %3420 = vmatpush3.bf16.msra.mxu0 %v3417_v5  ;;  %3166 = vmatprep.subr.bf16.mxu1 %v3165_v10  ;;  %v2001_v5 = vld [vmem:[%s4455_s2 + $0x300] sm:$0xff]  ;;  %v1635_v2 = vld [vmem:[#allocation2 + $0x16] sm:$0xff] }
  0x9f   : > { %3422 = vmatprep.subr.bf16.mxu0 %v3421_v11  ;;  %v3205_v9 = vpack.c.bf16 %v2002_v6, %v2001_v5  ;;  %v2021_v5 = vld [vmem:[%s4455_s2 + $0x3a0] sm:$0xff]  ;;  %v2022_v6 = vld [vmem:[%s4455_s2 + $0x3a8] sm:$0xff] }
  0xa1   : > { %3168 = vmatpush3.bf16.msra.mxu1 %v3165_v10  ;;  %v3461_v10 = vpack.c.bf16 %v2130_v8, %v2129_v7  ;;  %v2149_v7 = vld [vmem:[%s4455_s2 + $0x7a0] sm:$0xff]  ;;  %v2150_v8 = vld [vmem:[%s4455_s2 + $0x7a8] sm:$0xff] }
  0xa2   : > { %3424 = vmatpush3.bf16.msra.mxu0 %v3421_v11  ;;  %3170 = vmatprep.subr.bf16.mxu1 %v3169_v15  ;;  %v2003_v11 = vld [vmem:[%s4455_s2 + $0x310] sm:$0xff] }
  0xa3   : > { %3426 = vmatprep.subr.bf16.mxu0 %v3425_v16 }
  0xa5   : > { %3172 = vmatpush3.bf16.msra.mxu1 %v3169_v15  ;;  %v3209_v15 = vpack.c.bf16 %v2004_v12, %v2003_v11  ;;  %v3245_v11 = vpack.c.bf16 %v2022_v6, %v2021_v5  ;;  %v3501_v12 = vpack.c.bf16 %v2150_v8, %v2149_v7 }
  0xa6   : > { %3428 = vmatpush3.bf16.msra.mxu0 %v3425_v16  ;;  %3174 = vmatprep.subr.bf16.mxu1 %v3173_v21  ;;  %v3465_v16 = vpack.c.bf16 %v2132_v52, %v2131_v13  ;;  %v2023_v13 = vld [vmem:[%s4455_s2 + $0x3b0] sm:$0xff]  ;;  %v2024_v52 = vld [vmem:[%s4455_s2 + $0x3b8] sm:$0xff] }
  0xa7   : > { %3430 = vmatprep.subr.bf16.mxu0 %v3429_v22 }
  0xa8   : > { %2626 = vmatmul.mubr.f32.vlgmr.msra.gmra.mrb[0].mxu1 %v4081_v48  ;;  %v3189_v48 = vpack.c.bf16 %v1994_v45, %v1993_v44  ;;  %v2014_v44 = vld [vmem:[%s4455_s2 + $0x368] sm:$0xff]  ;;  %v2141_v45 = vld [vmem:[%s4455_s2 + $0x760] sm:$0xff] }
  0xa9   : > { %3176 = vmatpush3.bf16.msra.mxu1 %v3173_v21  ;;  %2906 = vmatmul.mubr.f32.vlgmr.msra.gmra.mrb[0].mxu0 %v1443_v27  ;;  %v866_v21 = vld [vmem:[#allocation2 + $0x6] sm:$0xff]  ;;  %v2135_v27 = vld [vmem:[%s4455_s2 + $0x730] sm:$0xff] }
  0xaa   : > { %3432 = vmatpush3.bf16.msra.mxu0 %v3429_v22  ;;  %3178 = vmatprep.subr.bf16.mxu1 %v3177_v28  ;;  %v4281_v22 = vld [vmem:[#allocation2 + $0xe] sm:$0xff] }
  0xab   : > { %3434 = vmatprep.subr.bf16.mxu0 %v3433_v29  ;;  %2660 = vmatprep.mubr.f32.mxu1 %v770_v34  ;;  %v2138_v34 = vld [vmem:[%s4455_s2 + $0x748] sm:$0xff] }
  0xac   : > { %2940 = vmatprep.mubr.f32.mxu0 %v4181_v35 }
  0xad   : > { %3180 = vmatpush3.bf16.msra.mxu1 %v3177_v28  ;;  %v2136_v28 = vld [vmem:[%s4455_s2 + $0x738] sm:$0xff] }
  0xae   : > { %3436 = vmatpush3.bf16.msra.mxu0 %v3433_v29  ;;  %3182 = vmatprep.subr.bf16.mxu1 %v3181_v36  ;;  %v3217_v29 = vpack.c.bf16 %v2008_v26, %v2007_v25  ;;  %v3473_v30 = vpack.c.bf16 %v2136_v28, %v2135_v27  ;;  %v2028_v25 = vld [vmem:[%s4455_s2 + $0x3d8] sm:$0xff]  ;;  %v2155_v26 = vld [vmem:[%s4455_s2 + $0x7d0] sm:$0xff] }
  0xaf   : > { %3438 = vmatprep.subr.bf16.mxu0 %v3437_v37  ;;  %v2156_v27 = vld [vmem:[%s4455_s2 + $0x7d8] sm:$0xff] }
  0xb1   : > { %3184 = vmatpush3.bf16.msra.mxu1 %v3181_v36  ;;  %v3477_v36 = vpack.c.bf16 %v2138_v34, %v2137_v33  ;;  %v2158_v33 = vld [vmem:[%s4455_s2 + $0x7e8] sm:$0xff] }
  0xb2   : > { %3440 = vmatpush3.bf16.msra.mxu0 %v3437_v37  ;;  %3186 = vmatprep.subr.bf16.mxu1 %v3185_v42  ;;  %v2011_v37 = vld [vmem:[%s4455_s2 + $0x350] sm:$0xff] }
  0xb3   : > { %3442 = vmatprep.subr.bf16.mxu0 %v3441_v43  ;;  %v3225_v41 = vpack.c.bf16 %v2012_v38, %v2011_v37  ;;  %v2032_v37 = vld [vmem:[%s4455_s2 + $0x3f8] sm:$0xff]  ;;  %v2159_v38 = vld [vmem:[%s4455_s2 + $0x7f0] sm:$0xff] }
  0xb5   : > { %3188 = vmatpush3.bf16.msra.mxu1 %v3185_v42  ;;  %v3481_v42 = vpack.c.bf16 %v2140_v40, %v2139_v39  ;;  %v2160_v39 = vld [vmem:[%s4455_s2 + $0x7f8] sm:$0xff] }
  0xb6   : > { %3444 = vmatpush3.bf16.msra.mxu0 %v3441_v43  ;;  %3190 = vmatprep.subr.bf16.mxu1 %v3189_v48  ;;  %v2013_v43 = vld [vmem:[%s4455_s2 + $0x360] sm:$0xff] }
  0xb7   : > { %3446 = vmatprep.subr.bf16.mxu0 %v3445_v49  ;;  %v3229_v47 = vpack.c.bf16 %v2014_v44, %v2013_v43 }
  0xb9   : > { %3192 = vmatpush3.bf16.msra.mxu1 %v3189_v48  ;;  %v3485_v48 = vpack.c.bf16 %v2142_v46, %v2141_v45 }
  0xba   : > { %3448 = vmatpush3.bf16.msra.mxu0 %v3445_v49  ;;  %3194 = vmatprep.subr.bf16.mxu1 %v3193_v55  ;;  %v2015_v49 = vld [vmem:[%s4455_s2 + $0x370] sm:$0xff] }
  0xbb   : > { %3450 = vmatprep.subr.bf16.mxu0 %v3449_v56  ;;  %v3233_v54 = vpack.c.bf16 %v2016_v50, %v2015_v49 }
  0xbd   : > { %3196 = vmatpush3.bf16.msra.mxu1 %v3193_v55  ;;  %v3489_v55 = vpack.c.bf16 %v2144_v53, %v2143_v51 }
  0xbe   : > { %3452 = vmatpush3.bf16.msra.mxu0 %v3449_v56  ;;  %3198 = vmatprep.subr.bf16.mxu1 %v3197_v61  ;;  %v2017_v56 = vld [vmem:[%s4455_s2 + $0x380] sm:$0xff] }
  0xbf   : > { %3454 = vmatprep.subr.bf16.mxu0 %v3453_v62  ;;  %v3237_v60 = vpack.c.bf16 %v2018_v57, %v2017_v56 }
  0xc1   : > { %3200 = vmatpush3.bf16.msra.mxu1 %v3197_v61  ;;  %v3493_v61 = vpack.c.bf16 %v2146_v59, %v2145_v58 }
  0xc2   : > { %3456 = vmatpush3.bf16.msra.mxu0 %v3453_v62  ;;  %3202 = vmatprep.subr.bf16.mxu1 %v3201_v3  ;;  %v2019_v62 = vld [vmem:[%s4455_s2 + $0x390] sm:$0xff] }
  0xc3   : > { %3458 = vmatprep.subr.bf16.mxu0 %v3457_v4 }
  0xc5   : > { %3204 = vmatpush3.bf16.msra.mxu1 %v3201_v3  ;;  %v3241_v3 = vpack.c.bf16 %v2020_v63, %v2019_v62 }
  0xc6   : > { %3460 = vmatpush3.bf16.msra.mxu0 %v3457_v4  ;;  %3206 = vmatprep.subr.bf16.mxu1 %v3205_v9  ;;  %v3497_v4 = vpack.c.bf16 %v2148_v1, %v2147_v0 }
  0xc7   : > { %3462 = vmatprep.subr.bf16.mxu0 %v3461_v10 }
  0xc8   : > { %2661 = vmatmul.mubr.f32.vlgmr.msra.gmra.mrb[0].mxu1 %v4181_v35  ;;  %v3221_v35 = vpack.c.bf16 %v2010_v32, %v2009_v31  ;;  %v2030_v31 = vld [vmem:[%s4455_s2 + $0x3e8] sm:$0xff]  ;;  %v2157_v32 = vld [vmem:[%s4455_s2 + $0x7e0] sm:$0xff] }
  0xc9   : > { %3208 = vmatpush3.bf16.msra.mxu1 %v3205_v9  ;;  %2941 = vmatmul.mubr.f32.vlgmr.msra.gmra.mrb[0].mxu0 %v1539_v14  ;;  %v962_v9 = vld [vmem:[#allocation2 + $0x7] sm:$0xff]  ;;  %v2151_v14 = vld [vmem:[%s4455_s2 + $0x7b0] sm:$0xff] }
  0xca   : > { %3464 = vmatpush3.bf16.msra.mxu0 %v3461_v10  ;;  %3210 = vmatprep.subr.bf16.mxu1 %v3209_v15  ;;  %v4381_v10 = vld [vmem:[#allocation2 + $0xf] sm:$0xff] }
  0xcb   : > { %3466 = vmatprep.subr.bf16.mxu0 %v3465_v16  ;;  %2695 = vmatprep.mubr.f32.mxu1 %v866_v21  ;;  %v2154_v21 = vld [vmem:[%s4455_s2 + $0x7c8] sm:$0xff] }
  0xcc   : > { %2975 = vmatprep.mubr.f32.mxu0 %v4281_v22 }
  0xcd   : > { %3212 = vmatpush3.bf16.msra.mxu1 %v3209_v15  ;;  %v2152_v15 = vld [vmem:[%s4455_s2 + $0x7b8] sm:$0xff] }
  0xce   : > { %3468 = vmatpush3.bf16.msra.mxu0 %v3465_v16  ;;  %3214 = vmatprep.subr.bf16.mxu1 %v3213_v23  ;;  %v3249_v16 = vpack.c.bf16 %v2024_v52, %v2023_v13  ;;  %v3505_v17 = vpack.c.bf16 %v2152_v15, %v2151_v14 }
  0xcf   : > { %3470 = vmatprep.subr.bf16.mxu0 %v3469_v24 }
  0xd1   : > { %3216 = vmatpush3.bf16.msra.mxu1 %v3213_v23  ;;  %v3509_v23 = vpack.c.bf16 %v2154_v21, %v2153_v20 }
  0xd2   : > { %3472 = vmatpush3.bf16.msra.mxu0 %v3469_v24  ;;  %3218 = vmatprep.subr.bf16.mxu1 %v3217_v29  ;;  %v2027_v24 = vld [vmem:[%s4455_s2 + $0x3d0] sm:$0xff] }
  0xd3   : > { %3474 = vmatprep.subr.bf16.mxu0 %v3473_v30  ;;  %v3257_v28 = vpack.c.bf16 %v2028_v25, %v2027_v24 }
  0xd5   : > { %3220 = vmatpush3.bf16.msra.mxu1 %v3217_v29  ;;  %v3513_v29 = vpack.c.bf16 %v2156_v27, %v2155_v26 }
  0xd6   : > { %3476 = vmatpush3.bf16.msra.mxu0 %v3473_v30  ;;  %3222 = vmatprep.subr.bf16.mxu1 %v3221_v35  ;;  %v2029_v30 = vld [vmem:[%s4455_s2 + $0x3e0] sm:$0xff] }
  0xd7   : > { %3478 = vmatprep.subr.bf16.mxu0 %v3477_v36  ;;  %v3261_v34 = vpack.c.bf16 %v2030_v31, %v2029_v30 }
  0xd9   : > { %3224 = vmatpush3.bf16.msra.mxu1 %v3221_v35  ;;  %v3517_v35 = vpack.c.bf16 %v2158_v33, %v2157_v32 }
  0xda   : > { %3480 = vmatpush3.bf16.msra.mxu0 %v3477_v36  ;;  %3226 = vmatprep.subr.bf16.mxu1 %v3225_v41  ;;  %v2031_v36 = vld [vmem:[%s4455_s2 + $0x3f0] sm:$0xff] }
  0xdb   : > { %3482 = vmatprep.subr.bf16.mxu0 %v3481_v42  ;;  %v3265_v40 = vpack.c.bf16 %v2032_v37, %v2031_v36 }
  0xdd   : > { %3228 = vmatpush3.bf16.msra.mxu1 %v3225_v41  ;;  %v3521_v41 = vpack.c.bf16 %v2160_v39, %v2159_v38 }
  0xde   : > { %3484 = vmatpush3.bf16.msra.mxu0 %v3481_v42  ;;  %3230 = vmatprep.subr.bf16.mxu1 %v3229_v47  ;;  %v1731_v42 = vld [vmem:[#allocation2 + $0x17] sm:$0xff] }
  0xdf   : > { %3486 = vmatprep.subr.bf16.mxu0 %v3485_v48 }
  0xe1   : > { %3232 = vmatpush3.bf16.msra.mxu1 %v3229_v47 }
  0xe2   : > { %3488 = vmatpush3.bf16.msra.mxu0 %v3485_v48  ;;  %3234 = vmatprep.subr.bf16.mxu1 %v3233_v54 }
  0xe3   : > { %3490 = vmatprep.subr.bf16.mxu0 %v3489_v55 }
  0xe5   : > { %3236 = vmatpush3.bf16.msra.mxu1 %v3233_v54 }
  0xe6   : > { %3492 = vmatpush3.bf16.msra.mxu0 %v3489_v55  ;;  %3238 = vmatprep.subr.bf16.mxu1 %v3237_v60 }
  0xe7   : > { %3494 = vmatprep.subr.bf16.mxu0 %v3493_v61 }
  0xe8   : > { %2696 = vmatmul.mubr.f32.vlgmr.msra.gmra.mrb[0].mxu1 %v4281_v22  ;;  %v3253_v22 = vpack.c.bf16 %v2026_v19, %v2025_v18 }
  0xe9   : > { %3240 = vmatpush3.bf16.msra.mxu1 %v3237_v60  ;;  %2976 = vmatmul.mubr.f32.vlgmr.msra.gmra.mrb[0].mxu0 %v1635_v2 }
  0xea   : > { %3496 = vmatpush3.bf16.msra.mxu0 %v3493_v61  ;;  %3242 = vmatprep.subr.bf16.mxu1 %v3241_v3 }
  0xeb   : > { %3498 = vmatprep.subr.bf16.mxu0 %v3497_v4  ;;  %2730 = vmatprep.mubr.f32.mxu1 %v962_v9 }
  0xec   : > { %3010 = vmatprep.mubr.f32.mxu0 %v4381_v10 }
  0xed   : > { %3244 = vmatpush3.bf16.msra.mxu1 %v3241_v3 }
  0xee   : > { %3500 = vmatpush3.bf16.msra.mxu0 %v3497_v4  ;;  %3246 = vmatprep.subr.bf16.mxu1 %v3245_v11 }
  0xef   : > { %3502 = vmatprep.subr.bf16.mxu0 %v3501_v12 }
  0xf1   : > { %3248 = vmatpush3.bf16.msra.mxu1 %v3245_v11 }
  0xf2   : > { %3504 = vmatpush3.bf16.msra.mxu0 %v3501_v12  ;;  %3250 = vmatprep.subr.bf16.mxu1 %v3249_v16 }
  0xf3   : > { %3506 = vmatprep.subr.bf16.mxu0 %v3505_v17 }
  0xf5   : > { %3252 = vmatpush3.bf16.msra.mxu1 %v3249_v16 }
  0xf6   : > { %3508 = vmatpush3.bf16.msra.mxu0 %v3505_v17  ;;  %3254 = vmatprep.subr.bf16.mxu1 %v3253_v22 }
  0xf7   : > { %3510 = vmatprep.subr.bf16.mxu0 %v3509_v23 }
  0xf9   : > { %3256 = vmatpush3.bf16.msra.mxu1 %v3253_v22 }
  0xfa   : > { %3512 = vmatpush3.bf16.msra.mxu0 %v3509_v23  ;;  %3258 = vmatprep.subr.bf16.mxu1 %v3257_v28 }
  0xfb   : > { %3514 = vmatprep.subr.bf16.mxu0 %v3513_v29 }
  0xfd   : > { %3260 = vmatpush3.bf16.msra.mxu1 %v3257_v28 }
  0xfe   : > { %3516 = vmatpush3.bf16.msra.mxu0 %v3513_v29  ;;  %3262 = vmatprep.subr.bf16.mxu1 %v3261_v34 }
  0xff   : > { %3518 = vmatprep.subr.bf16.mxu0 %v3517_v35 }
 0x101   : > { %3264 = vmatpush3.bf16.msra.mxu1 %v3261_v34 }
 0x102   : > { %3520 = vmatpush3.bf16.msra.mxu0 %v3517_v35  ;;  %3266 = vmatprep.subr.bf16.mxu1 %v3265_v40 }
 0x103   : > { %3522 = vmatprep.subr.bf16.mxu0 %v3521_v41 }
 0x105   : > { %3268 = vmatpush3.bf16.msra.mxu1 %v3265_v40 }
 0x106   : > { %3524 = vmatpush3.bf16.msra.mxu0 %v3521_v41 }
 0x108   : > { %2731 = vmatmul.mubr.f32.vlgmr.msra.gmra.mrb[0].mxu1 %v4381_v10 }
 0x109   : > { %3011 = vmatmul.mubr.f32.vlgmr.msra.gmra.mrb[0].mxu0 %v1731_v42 }
 0x1db   : > { %v2732_v43 = vpop.f32.mrb[0].mxu1 }
 0x1dc   : > { %v3012_v44 = vpop.f32.mrb[0].mxu0  ;;  %v1047_v45 = vpop.f32.mrb[1].mxu1 }
 0x1dd   : > { %v3525_v46 = vadd.f32 %v3012_v44, %v2732_v43  ;;  %v1815_v47 = vpop.f32.mrb[1].mxu0 }
 0x1de   : > { %v3526_v48 = vadd.f32 %v1815_v47, %v1047_v45 }
 0x1df   : > { %v1827_v49 = vsub.f32 0.0, %v3525_v46 }
 0x1e0   : > { %v1826_v50 = vsub.f32 0.0, %v3526_v48 }
 0x1e1   : > { %v1830_v51 = vmul.f32 1.442695, %v1827_v49 }
 0x1e2   : > { %v1828_v53 = vmul.f32 1.442695, %v1826_v50 }
 0x1e3   : > { %3563 = vpow2.f32 %v1830_v51 }
 0x1e4   : > { %3565 = vpow2.f32 %v1828_v53 }
 0x1ed   : > { %v3564_v54 = vpop.eup %3563 }
 0x1ee   : > { %v3566_v55 = vpop.eup %3565  ;;  %v1833_v56 = vadd.f32 1.0, %v3564_v54 }
 0x1ef   : > { %v1832_v57 = vadd.f32 1.0, %v3566_v55 }
 0x1f1   : > { %3567 = vrcp.f32 %v1832_v57 }
 0x1f2   : > { %3569 = vrcp.f32 %v1833_v56 }
 0x1fb   : > { %v3568_v58 = vpop.eup %3567 }
 0x1fc   : > { %v3570_v59 = vpop.eup %3569  ;;  %1838 = vst [vmem:[%s255_s20] sm:$0xff] %v3568_v58 }
 0x1fd   : > { %1839 = vst [vmem:[%s255_s20 + $0x8] sm:$0xff] %v3570_v59 }
 0x1fe PF: > { %s15_s18 = sadd.s32 1, %s3577_s18  }
 0x1ff   : > { %p12_p6 = scmp.ge.s32.totalorder %s15_s18, 4  }
 0x201   :  { %14 = sbr.rel (!%p12_p6) target bundleno = 1 (0x1), region = 88 }

</bundles_post_ra>
